<compile_context>
chip_gen: v7x
topology: tpu7x:2x2x1
jax: 0.10.0
libtpu: 0.0.40
codegen_flags: <defaults>
</compile_context>

<pallas_src>
import jax
import jax.numpy as jnp
from jax.experimental import pallas as pl
from jax.experimental.pallas import tpu as pltpu

HIDDEN = 50
NUM_LAYERS = 4
INPUT_SIZE = 2
FC1_OUT = 100
FC2_OUT = 2


# ---------------------------------------------------------------------------
# Fused Pallas kernel: whole forward pass in one call
# ---------------------------------------------------------------------------
def _fused_forward_kernel(*refs):
    """refs = [x, (wih, whh, b) * NUM_LAYERS, fc1_w, fc1_b, fc2_w, fc2_b, out].

    x:    (B, T, 2)              batch-first input (full array, VMEM)
    wih:  (2*d_in, 2H)           block-diagonal input->hidden (fwd | bwd)
    whh:  (2H, 2H)               block-diagonal hidden->hidden
    b:    (1, 2H)                combined (b_ih + b_hh), fwd | bwd
    fc1_w:(2H, 100)  fc1_b:(1,100)  fc2_w:(100, 2)  fc2_b:(1, 2)
    out:  (B, 2)
    """
    n_rnn = 3 * NUM_LAYERS
    x_ref = refs[0]
    rnn_refs = refs[1:1 + n_rnn]
    fc1w_ref, fc1b_ref, fc2w_ref, fc2b_ref = refs[1 + n_rnn:1 + n_rnn + 4]
    o_ref = refs[1 + n_rnn + 4]

    x = x_ref[...]                       # (B, T, D) tiny, load once
    B, T, _ = x.shape
    H = HIDDEN

    # Per-timestep inputs to the current layer (batch-first slices).
    xs = [x[:, t, :] for t in range(T)]

    for layer in range(NUM_LAYERS):
        wih = rnn_refs[3 * layer][...]       # (2*d_in, 2H)
        whh = rnn_refs[3 * layer + 1][...]   # (2H, 2H)
        b = rnn_refs[3 * layer + 2][...]     # (1, 2H)

        hp = jnp.zeros((B, 2 * H), jnp.float32)   # [fwd | bwd] hidden state
        steps = []
        # Fused fwd/bwd recurrence: at step t the fwd half sees x[t], the bwd
        # half sees x[T-1-t]; block-diagonal weights keep them independent.
        for t in range(T):
            xp = jnp.concatenate([xs[t], xs[T - 1 - t]], axis=-1)  # (B, 2*d_in)
            hp = jnp.tanh(
                jnp.dot(xp, wih, preferred_element_type=jnp.float32)
                + jnp.dot(hp, whh, preferred_element_type=jnp.float32)
                + b
            )
            steps.append(hp)

        # Layer output at time s = concat(h_fwd[s], h_bwd[s]); the bwd hidden
        # for actual time s was produced at fused step T-1-s.
        xs = [
            jnp.concatenate([steps[s][:, :H], steps[T - 1 - s][:, H:]], axis=-1)
            for s in range(T)
        ]

    # Head on the last timestep (dropouts are identity in eval mode).
    last = xs[T - 1]                                        # (B, 2H)
    h = jnp.dot(last, fc1w_ref[...], preferred_element_type=jnp.float32) + fc1b_ref[...]
    h = jnp.maximum(h, 0.0)
    out = jnp.dot(h, fc2w_ref[...], preferred_element_type=jnp.float32) + fc2b_ref[...]
    o_ref[...] = out.astype(o_ref.dtype)


def complex_rnn_forward(x, packed):
    """x: (B, T, 2) float32, batch-first.  Returns (B, 2) float32."""
    B, T, _ = x.shape
    args = [x]
    for (wih, whh, b) in packed["rnn"]:
        args += [wih, whh, b]
    args += [packed["fc1_w_t"], packed["fc1_b"], packed["fc2_w_t"], packed["fc2_b"]]

    vmem_spec = lambda: pl.BlockSpec(memory_space=pltpu.MemorySpace.VMEM)
    return pl.pallas_call(
        _fused_forward_kernel,
        out_shape=jax.ShapeDtypeStruct((B, FC2_OUT), jnp.float32),
        in_specs=[vmem_spec() for _ in args],
        out_specs=vmem_spec(),
    )(*args)


# ---------------------------------------------------------------------------
# Parameter init (mirrors nn.RNN / nn.Linear shapes) + block-diagonal packing
# ---------------------------------------------------------------------------
def init_params(key):
    k = 1.0 / jnp.sqrt(jnp.float32(HIDDEN))
    params = {"rnn": []}
    for layer in range(NUM_LAYERS):
        d_in = INPUT_SIZE if layer == 0 else 2 * HIDDEN
        layer_p = {}
        for direction in ("fwd", "bwd"):
            key, k1, k2, k3, k4 = jax.random.split(key, 5)
            w_ih = jax.random.uniform(k1, (HIDDEN, d_in), jnp.float32, -k, k)
            w_hh = jax.random.uniform(k2, (HIDDEN, HIDDEN), jnp.float32, -k, k)
            b_ih = jax.random.uniform(k3, (HIDDEN,), jnp.float32, -k, k)
            b_hh = jax.random.uniform(k4, (HIDDEN,), jnp.float32, -k, k)
            layer_p[direction] = {
                "w_ih_t": w_ih.T,                       # (d_in, H)
                "w_hh_t": w_hh.T,                       # (H, H)
                "b": (b_ih + b_hh).reshape(1, HIDDEN),  # (1, H)
            }
        params["rnn"].append(layer_p)

    kf1 = 1.0 / jnp.sqrt(jnp.float32(2 * HIDDEN))
    key, k1, k2 = jax.random.split(key, 3)
    fc1_w = jax.random.uniform(k1, (FC1_OUT, 2 * HIDDEN), jnp.float32, -kf1, kf1)
    fc1_b = jax.random.uniform(k2, (FC1_OUT,), jnp.float32, -kf1, kf1)
    kf2 = 1.0 / jnp.sqrt(jnp.float32(FC1_OUT))
    key, k1, k2 = jax.random.split(key, 3)
    fc2_w = jax.random.uniform(k1, (FC2_OUT, FC1_OUT), jnp.float32, -kf2, kf2)
    fc2_b = jax.random.uniform(k2, (FC2_OUT,), jnp.float32, -kf2, kf2)

    params["fc1_w_t"] = fc1_w.T                      # (100, 100)
    params["fc1_b"] = fc1_b.reshape(1, FC1_OUT)      # (1, 100)
    params["fc2_w_t"] = fc2_w.T                      # (100, 2)
    params["fc2_b"] = fc2_b.reshape(1, FC2_OUT)      # (1, 2)
    return params


def pack_params(params):
    """Pack per-direction weights into block-diagonal (fwd|bwd) matrices (once)."""
    packed = {"rnn": []}
    H = HIDDEN
    for layer in range(NUM_LAYERS):
        p = params["rnn"][layer]
        d_in = INPUT_SIZE if layer == 0 else 2 * HIDDEN
        wih = jnp.zeros((2 * d_in, 2 * H), jnp.float32)
        wih = wih.at[:d_in, :H].set(p["fwd"]["w_ih_t"])
        wih = wih.at[d_in:, H:].set(p["bwd"]["w_ih_t"])
        whh = jnp.zeros((2 * H, 2 * H), jnp.float32)
        whh = whh.at[:H, :H].set(p["fwd"]["w_hh_t"])
        whh = whh.at[H:, H:].set(p["bwd"]["w_hh_t"])
        b = jnp.concatenate([p["fwd"]["b"], p["bwd"]["b"]], axis=-1)  # (1, 2H)
        packed["rnn"].append((wih, whh, b))
    packed["fc1_w_t"] = params["fc1_w_t"]
    packed["fc1_b"] = params["fc1_b"]
    packed["fc2_w_t"] = params["fc2_w_t"]
    packed["fc2_b"] = params["fc2_b"]
    return packed


# ---------------------------------------------------------------------------
# Pure-JAX reference (correctness check)
# ---------------------------------------------------------------------------
def reference_forward(x, params):
    B, T, _ = x.shape
    h = jnp.transpose(x, (1, 0, 2))  # time-major

    def run_dir(seq, p):
        def step(hprev, xt):
            hnew = jnp.tanh(xt @ p["w_ih_t"] + hprev @ p["w_hh_t"] + p["b"])
            return hnew, hnew
        h0 = jnp.zeros((B, HIDDEN), jnp.float32)
        _, outs = jax.lax.scan(step, h0, seq)
        return outs

    for layer in range(NUM_LAYERS):
        p = params["rnn"][layer]
        h_f = run_dir(h, p["fwd"])
        h_b = run_dir(h[::-1], p["bwd"])[::-1]
        h = jnp.concatenate([h_f, h_b], axis=-1)
    last = h[-1]
    y = jnp.maximum(last @ params["fc1_w_t"] + params["fc1_b"], 0.0)
    return y @ params["fc2_w_t"] + params["fc2_b"]


# ---------------------------------------------------------------------------
if __name__ == "__main__":
    key = jax.random.PRNGKey(0)
    key, pkey, xkey = jax.random.split(key, 3)

    B, T = 4, 8
    params = init_params(pkey)
    packed = pack_params(params)
    x = jax.random.normal(xkey, (B, T, INPUT_SIZE), jnp.float32)

    out = jax.block_until_ready(complex_rnn_forward(x, packed))
    ref = jax.block_until_ready(reference_forward(x, params))

    assert out.shape == (B, FC2_OUT)
    assert jnp.allclose(out, ref, rtol=1e-4, atol=1e-4), (out, ref)
    print("KERNEL_OK")
</pallas_src>

<mosaic_0001>
module attributes {stable_mosaic.version = 11 : i64} {
  func.func @_fused_forward_kernel(%arg0: memref<4x8x2xf32, #tpu.memory_space<vmem>>, %arg1: memref<4x100xf32, #tpu.memory_space<vmem>>, %arg2: memref<100x100xf32, #tpu.memory_space<vmem>>, %arg3: memref<1x100xf32, #tpu.memory_space<vmem>>, %arg4: memref<200x100xf32, #tpu.memory_space<vmem>>, %arg5: memref<100x100xf32, #tpu.memory_space<vmem>>, %arg6: memref<1x100xf32, #tpu.memory_space<vmem>>, %arg7: memref<200x100xf32, #tpu.memory_space<vmem>>, %arg8: memref<100x100xf32, #tpu.memory_space<vmem>>, %arg9: memref<1x100xf32, #tpu.memory_space<vmem>>, %arg10: memref<200x100xf32, #tpu.memory_space<vmem>>, %arg11: memref<100x100xf32, #tpu.memory_space<vmem>>, %arg12: memref<1x100xf32, #tpu.memory_space<vmem>>, %arg13: memref<100x100xf32, #tpu.memory_space<vmem>>, %arg14: memref<1x100xf32, #tpu.memory_space<vmem>>, %arg15: memref<100x2xf32, #tpu.memory_space<vmem>>, %arg16: memref<1x2xf32, #tpu.memory_space<vmem>>, %arg17: memref<4x2xf32, #tpu.memory_space<vmem>>) attributes {dimension_semantics = [], scalar_prefetch = 0 : i64, scratch_operands = 0 : i64, tpu.core_type = #tpu.core_type<tc>} {
    %c0 = arith.constant 0 : index
    %c0_0 = arith.constant 0 : index
    %c0_1 = arith.constant 0 : index
    %0 = vector.load %arg0[%c0, %c0_0, %c0_1] : memref<4x8x2xf32, #tpu.memory_space<vmem>>, vector<4x8x2xf32>
    %1 = vector.extract_strided_slice %0 {offsets = [0, 0, 0], sizes = [4, 1, 2], strides = [1, 1, 1]} : vector<4x8x2xf32> to vector<4x1x2xf32>
    %2 = vector.shape_cast %1 : vector<4x1x2xf32> to vector<4x2xf32>
    %3 = vector.extract_strided_slice %0 {offsets = [0, 1, 0], sizes = [4, 1, 2], strides = [1, 1, 1]} : vector<4x8x2xf32> to vector<4x1x2xf32>
    %4 = vector.shape_cast %3 : vector<4x1x2xf32> to vector<4x2xf32>
    %5 = vector.extract_strided_slice %0 {offsets = [0, 2, 0], sizes = [4, 1, 2], strides = [1, 1, 1]} : vector<4x8x2xf32> to vector<4x1x2xf32>
    %6 = vector.shape_cast %5 : vector<4x1x2xf32> to vector<4x2xf32>
    %7 = vector.extract_strided_slice %0 {offsets = [0, 3, 0], sizes = [4, 1, 2], strides = [1, 1, 1]} : vector<4x8x2xf32> to vector<4x1x2xf32>
    %8 = vector.shape_cast %7 : vector<4x1x2xf32> to vector<4x2xf32>
    %9 = vector.extract_strided_slice %0 {offsets = [0, 4, 0], sizes = [4, 1, 2], strides = [1, 1, 1]} : vector<4x8x2xf32> to vector<4x1x2xf32>
    %10 = vector.shape_cast %9 : vector<4x1x2xf32> to vector<4x2xf32>
    %11 = vector.extract_strided_slice %0 {offsets = [0, 5, 0], sizes = [4, 1, 2], strides = [1, 1, 1]} : vector<4x8x2xf32> to vector<4x1x2xf32>
    %12 = vector.shape_cast %11 : vector<4x1x2xf32> to vector<4x2xf32>
    %13 = vector.extract_strided_slice %0 {offsets = [0, 6, 0], sizes = [4, 1, 2], strides = [1, 1, 1]} : vector<4x8x2xf32> to vector<4x1x2xf32>
    %14 = vector.shape_cast %13 : vector<4x1x2xf32> to vector<4x2xf32>
    %15 = vector.extract_strided_slice %0 {offsets = [0, 7, 0], sizes = [4, 1, 2], strides = [1, 1, 1]} : vector<4x8x2xf32> to vector<4x1x2xf32>
    %16 = vector.shape_cast %15 : vector<4x1x2xf32> to vector<4x2xf32>
    %c0_2 = arith.constant 0 : index
    %c0_3 = arith.constant 0 : index
    %17 = vector.load %arg1[%c0_2, %c0_3] : memref<4x100xf32, #tpu.memory_space<vmem>>, vector<4x100xf32>
    %c0_4 = arith.constant 0 : index
    %c0_5 = arith.constant 0 : index
    %18 = vector.load %arg2[%c0_4, %c0_5] : memref<100x100xf32, #tpu.memory_space<vmem>>, vector<100x100xf32>
    %c0_6 = arith.constant 0 : index
    %c0_7 = arith.constant 0 : index
    %19 = vector.load %arg3[%c0_6, %c0_7] : memref<1x100xf32, #tpu.memory_space<vmem>>, vector<1x100xf32>
    %cst = arith.constant 0.000000e+00 : f32
    %20 = vector.broadcast %cst : f32 to vector<4x100xf32>
    %21 = tpu.concatenate %2, %16 in 1 : vector<4x2xf32>, vector<4x2xf32> -> vector<4x4xf32>
    %cst_8 = arith.constant dense<0.000000e+00> : vector<4x100xf32>
    %22 = tpu.matmul %21, %17, %cst_8 {dimension_numbers = #tpu.dot_dimension_numbers<[1], [0], [0], [1], [0, 0, 1, 1], [], []>} : vector<4x4xf32>, vector<4x100xf32>, vector<4x100xf32> -> vector<4x100xf32>
    %cst_9 = arith.constant dense<0.000000e+00> : vector<4x100xf32>
    %23 = tpu.matmul %20, %18, %cst_9 {dimension_numbers = #tpu.dot_dimension_numbers<[1], [0], [0], [1], [0, 0, 1, 1], [], []>} : vector<4x100xf32>, vector<100x100xf32>, vector<4x100xf32> -> vector<4x100xf32>
    %24 = arith.addf %22, %23 : vector<4x100xf32>
    %25 = vector.broadcast %19 : vector<1x100xf32> to vector<4x100xf32>
    %26 = arith.addf %24, %25 : vector<4x100xf32>
    %27 = math.tanh %26 : vector<4x100xf32>
    %28 = tpu.concatenate %4, %14 in 1 : vector<4x2xf32>, vector<4x2xf32> -> vector<4x4xf32>
    %cst_10 = arith.constant dense<0.000000e+00> : vector<4x100xf32>
    %29 = tpu.matmul %28, %17, %cst_10 {dimension_numbers = #tpu.dot_dimension_numbers<[1], [0], [0], [1], [0, 0, 1, 1], [], []>} : vector<4x4xf32>, vector<4x100xf32>, vector<4x100xf32> -> vector<4x100xf32>
    %cst_11 = arith.constant dense<0.000000e+00> : vector<4x100xf32>
    %30 = tpu.matmul %27, %18, %cst_11 {dimension_numbers = #tpu.dot_dimension_numbers<[1], [0], [0], [1], [0, 0, 1, 1], [], []>} : vector<4x100xf32>, vector<100x100xf32>, vector<4x100xf32> -> vector<4x100xf32>
    %31 = arith.addf %29, %30 : vector<4x100xf32>
    %32 = vector.broadcast %19 : vector<1x100xf32> to vector<4x100xf32>
    %33 = arith.addf %31, %32 : vector<4x100xf32>
    %34 = math.tanh %33 : vector<4x100xf32>
    %35 = tpu.concatenate %6, %12 in 1 : vector<4x2xf32>, vector<4x2xf32> -> vector<4x4xf32>
    %cst_12 = arith.constant dense<0.000000e+00> : vector<4x100xf32>
    %36 = tpu.matmul %35, %17, %cst_12 {dimension_numbers = #tpu.dot_dimension_numbers<[1], [0], [0], [1], [0, 0, 1, 1], [], []>} : vector<4x4xf32>, vector<4x100xf32>, vector<4x100xf32> -> vector<4x100xf32>
    %cst_13 = arith.constant dense<0.000000e+00> : vector<4x100xf32>
    %37 = tpu.matmul %34, %18, %cst_13 {dimension_numbers = #tpu.dot_dimension_numbers<[1], [0], [0], [1], [0, 0, 1, 1], [], []>} : vector<4x100xf32>, vector<100x100xf32>, vector<4x100xf32> -> vector<4x100xf32>
    %38 = arith.addf %36, %37 : vector<4x100xf32>
    %39 = vector.broadcast %19 : vector<1x100xf32> to vector<4x100xf32>
    %40 = arith.addf %38, %39 : vector<4x100xf32>
    %41 = math.tanh %40 : vector<4x100xf32>
    %42 = tpu.concatenate %8, %10 in 1 : vector<4x2xf32>, vector<4x2xf32> -> vector<4x4xf32>
    %cst_14 = arith.constant dense<0.000000e+00> : vector<4x100xf32>
    %43 = tpu.matmul %42, %17, %cst_14 {dimension_numbers = #tpu.dot_dimension_numbers<[1], [0], [0], [1], [0, 0, 1, 1], [], []>} : vector<4x4xf32>, vector<4x100xf32>, vector<4x100xf32> -> vector<4x100xf32>
    %cst_15 = arith.constant dense<0.000000e+00> : vector<4x100xf32>
    %44 = tpu.matmul %41, %18, %cst_15 {dimension_numbers = #tpu.dot_dimension_numbers<[1], [0], [0], [1], [0, 0, 1, 1], [], []>} : vector<4x100xf32>, vector<100x100xf32>, vector<4x100xf32> -> vector<4x100xf32>
    %45 = arith.addf %43, %44 : vector<4x100xf32>
    %46 = vector.broadcast %19 : vector<1x100xf32> to vector<4x100xf32>
    %47 = arith.addf %45, %46 : vector<4x100xf32>
    %48 = math.tanh %47 : vector<4x100xf32>
    %49 = tpu.concatenate %10, %8 in 1 : vector<4x2xf32>, vector<4x2xf32> -> vector<4x4xf32>
    %cst_16 = arith.constant dense<0.000000e+00> : vector<4x100xf32>
    %50 = tpu.matmul %49, %17, %cst_16 {dimension_numbers = #tpu.dot_dimension_numbers<[1], [0], [0], [1], [0, 0, 1, 1], [], []>} : vector<4x4xf32>, vector<4x100xf32>, vector<4x100xf32> -> vector<4x100xf32>
    %cst_17 = arith.constant dense<0.000000e+00> : vector<4x100xf32>
    %51 = tpu.matmul %48, %18, %cst_17 {dimension_numbers = #tpu.dot_dimension_numbers<[1], [0], [0], [1], [0, 0, 1, 1], [], []>} : vector<4x100xf32>, vector<100x100xf32>, vector<4x100xf32> -> vector<4x100xf32>
    %52 = arith.addf %50, %51 : vector<4x100xf32>
    %53 = vector.broadcast %19 : vector<1x100xf32> to vector<4x100xf32>
    %54 = arith.addf %52, %53 : vector<4x100xf32>
    %55 = math.tanh %54 : vector<4x100xf32>
    %56 = tpu.concatenate %12, %6 in 1 : vector<4x2xf32>, vector<4x2xf32> -> vector<4x4xf32>
    %cst_18 = arith.constant dense<0.000000e+00> : vector<4x100xf32>
    %57 = tpu.matmul %56, %17, %cst_18 {dimension_numbers = #tpu.dot_dimension_numbers<[1], [0], [0], [1], [0, 0, 1, 1], [], []>} : vector<4x4xf32>, vector<4x100xf32>, vector<4x100xf32> -> vector<4x100xf32>
    %cst_19 = arith.constant dense<0.000000e+00> : vector<4x100xf32>
    %58 = tpu.matmul %55, %18, %cst_19 {dimension_numbers = #tpu.dot_dimension_numbers<[1], [0], [0], [1], [0, 0, 1, 1], [], []>} : vector<4x100xf32>, vector<100x100xf32>, vector<4x100xf32> -> vector<4x100xf32>
    %59 = arith.addf %57, %58 : vector<4x100xf32>
    %60 = vector.broadcast %19 : vector<1x100xf32> to vector<4x100xf32>
    %61 = arith.addf %59, %60 : vector<4x100xf32>
    %62 = math.tanh %61 : vector<4x100xf32>
    %63 = tpu.concatenate %14, %4 in 1 : vector<4x2xf32>, vector<4x2xf32> -> vector<4x4xf32>
    %cst_20 = arith.constant dense<0.000000e+00> : vector<4x100xf32>
    %64 = tpu.matmul %63, %17, %cst_20 {dimension_numbers = #tpu.dot_dimension_numbers<[1], [0], [0], [1], [0, 0, 1, 1], [], []>} : vector<4x4xf32>, vector<4x100xf32>, vector<4x100xf32> -> vector<4x100xf32>
    %cst_21 = arith.constant dense<0.000000e+00> : vector<4x100xf32>
    %65 = tpu.matmul %62, %18, %cst_21 {dimension_numbers = #tpu.dot_dimension_numbers<[1], [0], [0], [1], [0, 0, 1, 1], [], []>} : vector<4x100xf32>, vector<100x100xf32>, vector<4x100xf32> -> vector<4x100xf32>
    %66 = arith.addf %64, %65 : vector<4x100xf32>
    %67 = vector.broadcast %19 : vector<1x100xf32> to vector<4x100xf32>
    %68 = arith.addf %66, %67 : vector<4x100xf32>
    %69 = math.tanh %68 : vector<4x100xf32>
    %70 = tpu.concatenate %16, %2 in 1 : vector<4x2xf32>, vector<4x2xf32> -> vector<4x4xf32>
    %cst_22 = arith.constant dense<0.000000e+00> : vector<4x100xf32>
    %71 = tpu.matmul %70, %17, %cst_22 {dimension_numbers = #tpu.dot_dimension_numbers<[1], [0], [0], [1], [0, 0, 1, 1], [], []>} : vector<4x4xf32>, vector<4x100xf32>, vector<4x100xf32> -> vector<4x100xf32>
    %cst_23 = arith.constant dense<0.000000e+00> : vector<4x100xf32>
    %72 = tpu.matmul %69, %18, %cst_23 {dimension_numbers = #tpu.dot_dimension_numbers<[1], [0], [0], [1], [0, 0, 1, 1], [], []>} : vector<4x100xf32>, vector<100x100xf32>, vector<4x100xf32> -> vector<4x100xf32>
    %73 = arith.addf %71, %72 : vector<4x100xf32>
    %74 = vector.broadcast %19 : vector<1x100xf32> to vector<4x100xf32>
    %75 = arith.addf %73, %74 : vector<4x100xf32>
    %76 = math.tanh %75 : vector<4x100xf32>
    %77 = vector.extract_strided_slice %27 {offsets = [0, 0], sizes = [4, 50], strides = [1, 1]} : vector<4x100xf32> to vector<4x50xf32>
    %78 = vector.extract_strided_slice %76 {offsets = [0, 50], sizes = [4, 50], strides = [1, 1]} : vector<4x100xf32> to vector<4x50xf32>
    %79 = tpu.concatenate %77, %78 in 1 : vector<4x50xf32>, vector<4x50xf32> -> vector<4x100xf32>
    %80 = vector.extract_strided_slice %34 {offsets = [0, 0], sizes = [4, 50], strides = [1, 1]} : vector<4x100xf32> to vector<4x50xf32>
    %81 = vector.extract_strided_slice %69 {offsets = [0, 50], sizes = [4, 50], strides = [1, 1]} : vector<4x100xf32> to vector<4x50xf32>
    %82 = tpu.concatenate %80, %81 in 1 : vector<4x50xf32>, vector<4x50xf32> -> vector<4x100xf32>
    %83 = vector.extract_strided_slice %41 {offsets = [0, 0], sizes = [4, 50], strides = [1, 1]} : vector<4x100xf32> to vector<4x50xf32>
    %84 = vector.extract_strided_slice %62 {offsets = [0, 50], sizes = [4, 50], strides = [1, 1]} : vector<4x100xf32> to vector<4x50xf32>
    %85 = tpu.concatenate %83, %84 in 1 : vector<4x50xf32>, vector<4x50xf32> -> vector<4x100xf32>
    %86 = vector.extract_strided_slice %48 {offsets = [0, 0], sizes = [4, 50], strides = [1, 1]} : vector<4x100xf32> to vector<4x50xf32>
    %87 = vector.extract_strided_slice %55 {offsets = [0, 50], sizes = [4, 50], strides = [1, 1]} : vector<4x100xf32> to vector<4x50xf32>
    %88 = tpu.concatenate %86, %87 in 1 : vector<4x50xf32>, vector<4x50xf32> -> vector<4x100xf32>
    %89 = vector.extract_strided_slice %55 {offsets = [0, 0], sizes = [4, 50], strides = [1, 1]} : vector<4x100xf32> to vector<4x50xf32>
    %90 = vector.extract_strided_slice %48 {offsets = [0, 50], sizes = [4, 50], strides = [1, 1]} : vector<4x100xf32> to vector<4x50xf32>
    %91 = tpu.concatenate %89, %90 in 1 : vector<4x50xf32>, vector<4x50xf32> -> vector<4x100xf32>
    %92 = vector.extract_strided_slice %62 {offsets = [0, 0], sizes = [4, 50], strides = [1, 1]} : vector<4x100xf32> to vector<4x50xf32>
    %93 = vector.extract_strided_slice %41 {offsets = [0, 50], sizes = [4, 50], strides = [1, 1]} : vector<4x100xf32> to vector<4x50xf32>
    %94 = tpu.concatenate %92, %93 in 1 : vector<4x50xf32>, vector<4x50xf32> -> vector<4x100xf32>
    %95 = vector.extract_strided_slice %69 {offsets = [0, 0], sizes = [4, 50], strides = [1, 1]} : vector<4x100xf32> to vector<4x50xf32>
    %96 = vector.extract_strided_slice %34 {offsets = [0, 50], sizes = [4, 50], strides = [1, 1]} : vector<4x100xf32> to vector<4x50xf32>
    %97 = tpu.concatenate %95, %96 in 1 : vector<4x50xf32>, vector<4x50xf32> -> vector<4x100xf32>
    %98 = vector.extract_strided_slice %76 {offsets = [0, 0], sizes = [4, 50], strides = [1, 1]} : vector<4x100xf32> to vector<4x50xf32>
    %99 = vector.extract_strided_slice %27 {offsets = [0, 50], sizes = [4, 50], strides = [1, 1]} : vector<4x100xf32> to vector<4x50xf32>
    %100 = tpu.concatenate %98, %99 in 1 : vector<4x50xf32>, vector<4x50xf32> -> vector<4x100xf32>
    %c0_24 = arith.constant 0 : index
    %c0_25 = arith.constant 0 : index
    %101 = vector.load %arg4[%c0_24, %c0_25] : memref<200x100xf32, #tpu.memory_space<vmem>>, vector<200x100xf32>
    %c0_26 = arith.constant 0 : index
    %c0_27 = arith.constant 0 : index
    %102 = vector.load %arg5[%c0_26, %c0_27] : memref<100x100xf32, #tpu.memory_space<vmem>>, vector<100x100xf32>
    %c0_28 = arith.constant 0 : index
    %c0_29 = arith.constant 0 : index
    %103 = vector.load %arg6[%c0_28, %c0_29] : memref<1x100xf32, #tpu.memory_space<vmem>>, vector<1x100xf32>
    %cst_30 = arith.constant 0.000000e+00 : f32
    %104 = vector.broadcast %cst_30 : f32 to vector<4x100xf32>
    %105 = tpu.concatenate %79, %100 in 1 : vector<4x100xf32>, vector<4x100xf32> -> vector<4x200xf32>
    %cst_31 = arith.constant dense<0.000000e+00> : vector<4x100xf32>
    %106 = tpu.matmul %105, %101, %cst_31 {dimension_numbers = #tpu.dot_dimension_numbers<[1], [0], [0], [1], [0, 0, 1, 1], [], []>} : vector<4x200xf32>, vector<200x100xf32>, vector<4x100xf32> -> vector<4x100xf32>
    %cst_32 = arith.constant dense<0.000000e+00> : vector<4x100xf32>
    %107 = tpu.matmul %104, %102, %cst_32 {dimension_numbers = #tpu.dot_dimension_numbers<[1], [0], [0], [1], [0, 0, 1, 1], [], []>} : vector<4x100xf32>, vector<100x100xf32>, vector<4x100xf32> -> vector<4x100xf32>
    %108 = arith.addf %106, %107 : vector<4x100xf32>
    %109 = vector.broadcast %103 : vector<1x100xf32> to vector<4x100xf32>
    %110 = arith.addf %108, %109 : vector<4x100xf32>
    %111 = math.tanh %110 : vector<4x100xf32>
    %112 = tpu.concatenate %82, %97 in 1 : vector<4x100xf32>, vector<4x100xf32> -> vector<4x200xf32>
    %cst_33 = arith.constant dense<0.000000e+00> : vector<4x100xf32>
    %113 = tpu.matmul %112, %101, %cst_33 {dimension_numbers = #tpu.dot_dimension_numbers<[1], [0], [0], [1], [0, 0, 1, 1], [], []>} : vector<4x200xf32>, vector<200x100xf32>, vector<4x100xf32> -> vector<4x100xf32>
    %cst_34 = arith.constant dense<0.000000e+00> : vector<4x100xf32>
    %114 = tpu.matmul %111, %102, %cst_34 {dimension_numbers = #tpu.dot_dimension_numbers<[1], [0], [0], [1], [0, 0, 1, 1], [], []>} : vector<4x100xf32>, vector<100x100xf32>, vector<4x100xf32> -> vector<4x100xf32>
    %115 = arith.addf %113, %114 : vector<4x100xf32>
    %116 = vector.broadcast %103 : vector<1x100xf32> to vector<4x100xf32>
    %117 = arith.addf %115, %116 : vector<4x100xf32>
    %118 = math.tanh %117 : vector<4x100xf32>
    %119 = tpu.concatenate %85, %94 in 1 : vector<4x100xf32>, vector<4x100xf32> -> vector<4x200xf32>
    %cst_35 = arith.constant dense<0.000000e+00> : vector<4x100xf32>
    %120 = tpu.matmul %119, %101, %cst_35 {dimension_numbers = #tpu.dot_dimension_numbers<[1], [0], [0], [1], [0, 0, 1, 1], [], []>} : vector<4x200xf32>, vector<200x100xf32>, vector<4x100xf32> -> vector<4x100xf32>
    %cst_36 = arith.constant dense<0.000000e+00> : vector<4x100xf32>
    %121 = tpu.matmul %118, %102, %cst_36 {dimension_numbers = #tpu.dot_dimension_numbers<[1], [0], [0], [1], [0, 0, 1, 1], [], []>} : vector<4x100xf32>, vector<100x100xf32>, vector<4x100xf32> -> vector<4x100xf32>
    %122 = arith.addf %120, %121 : vector<4x100xf32>
    %123 = vector.broadcast %103 : vector<1x100xf32> to vector<4x100xf32>
    %124 = arith.addf %122, %123 : vector<4x100xf32>
    %125 = math.tanh %124 : vector<4x100xf32>
    %126 = tpu.concatenate %88, %91 in 1 : vector<4x100xf32>, vector<4x100xf32> -> vector<4x200xf32>
    %cst_37 = arith.constant dense<0.000000e+00> : vector<4x100xf32>
    %127 = tpu.matmul %126, %101, %cst_37 {dimension_numbers = #tpu.dot_dimension_numbers<[1], [0], [0], [1], [0, 0, 1, 1], [], []>} : vector<4x200xf32>, vector<200x100xf32>, vector<4x100xf32> -> vector<4x100xf32>
    %cst_38 = arith.constant dense<0.000000e+00> : vector<4x100xf32>
    %128 = tpu.matmul %125, %102, %cst_38 {dimension_numbers = #tpu.dot_dimension_numbers<[1], [0], [0], [1], [0, 0, 1, 1], [], []>} : vector<4x100xf32>, vector<100x100xf32>, vector<4x100xf32> -> vector<4x100xf32>
    %129 = arith.addf %127, %128 : vector<4x100xf32>
    %130 = vector.broadcast %103 : vector<1x100xf32> to vector<4x100xf32>
    %131 = arith.addf %129, %130 : vector<4x100xf32>
    %132 = math.tanh %131 : vector<4x100xf32>
    %133 = tpu.concatenate %91, %88 in 1 : vector<4x100xf32>, vector<4x100xf32> -> vector<4x200xf32>
    %cst_39 = arith.constant dense<0.000000e+00> : vector<4x100xf32>
    %134 = tpu.matmul %133, %101, %cst_39 {dimension_numbers = #tpu.dot_dimension_numbers<[1], [0], [0], [1], [0, 0, 1, 1], [], []>} : vector<4x200xf32>, vector<200x100xf32>, vector<4x100xf32> -> vector<4x100xf32>
    %cst_40 = arith.constant dense<0.000000e+00> : vector<4x100xf32>
    %135 = tpu.matmul %132, %102, %cst_40 {dimension_numbers = #tpu.dot_dimension_numbers<[1], [0], [0], [1], [0, 0, 1, 1], [], []>} : vector<4x100xf32>, vector<100x100xf32>, vector<4x100xf32> -> vector<4x100xf32>
    %136 = arith.addf %134, %135 : vector<4x100xf32>
    %137 = vector.broadcast %103 : vector<1x100xf32> to vector<4x100xf32>
    %138 = arith.addf %136, %137 : vector<4x100xf32>
    %139 = math.tanh %138 : vector<4x100xf32>
    %140 = tpu.concatenate %94, %85 in 1 : vector<4x100xf32>, vector<4x100xf32> -> vector<4x200xf32>
    %cst_41 = arith.constant dense<0.000000e+00> : vector<4x100xf32>
    %141 = tpu.matmul %140, %101, %cst_41 {dimension_numbers = #tpu.dot_dimension_numbers<[1], [0], [0], [1], [0, 0, 1, 1], [], []>} : vector<4x200xf32>, vector<200x100xf32>, vector<4x100xf32> -> vector<4x100xf32>
    %cst_42 = arith.constant dense<0.000000e+00> : vector<4x100xf32>
    %142 = tpu.matmul %139, %102, %cst_42 {dimension_numbers = #tpu.dot_dimension_numbers<[1], [0], [0], [1], [0, 0, 1, 1], [], []>} : vector<4x100xf32>, vector<100x100xf32>, vector<4x100xf32> -> vector<4x100xf32>
    %143 = arith.addf %141, %142 : vector<4x100xf32>
    %144 = vector.broadcast %103 : vector<1x100xf32> to vector<4x100xf32>
    %145 = arith.addf %143, %144 : vector<4x100xf32>
    %146 = math.tanh %145 : vector<4x100xf32>
    %147 = tpu.concatenate %97, %82 in 1 : vector<4x100xf32>, vector<4x100xf32> -> vector<4x200xf32>
    %cst_43 = arith.constant dense<0.000000e+00> : vector<4x100xf32>
    %148 = tpu.matmul %147, %101, %cst_43 {dimension_numbers = #tpu.dot_dimension_numbers<[1], [0], [0], [1], [0, 0, 1, 1], [], []>} : vector<4x200xf32>, vector<200x100xf32>, vector<4x100xf32> -> vector<4x100xf32>
    %cst_44 = arith.constant dense<0.000000e+00> : vector<4x100xf32>
    %149 = tpu.matmul %146, %102, %cst_44 {dimension_numbers = #tpu.dot_dimension_numbers<[1], [0], [0], [1], [0, 0, 1, 1], [], []>} : vector<4x100xf32>, vector<100x100xf32>, vector<4x100xf32> -> vector<4x100xf32>
    %150 = arith.addf %148, %149 : vector<4x100xf32>
    %151 = vector.broadcast %103 : vector<1x100xf32> to vector<4x100xf32>
    %152 = arith.addf %150, %151 : vector<4x100xf32>
    %153 = math.tanh %152 : vector<4x100xf32>
    %154 = tpu.concatenate %100, %79 in 1 : vector<4x100xf32>, vector<4x100xf32> -> vector<4x200xf32>
    %cst_45 = arith.constant dense<0.000000e+00> : vector<4x100xf32>
    %155 = tpu.matmul %154, %101, %cst_45 {dimension_numbers = #tpu.dot_dimension_numbers<[1], [0], [0], [1], [0, 0, 1, 1], [], []>} : vector<4x200xf32>, vector<200x100xf32>, vector<4x100xf32> -> vector<4x100xf32>
    %cst_46 = arith.constant dense<0.000000e+00> : vector<4x100xf32>
    %156 = tpu.matmul %153, %102, %cst_46 {dimension_numbers = #tpu.dot_dimension_numbers<[1], [0], [0], [1], [0, 0, 1, 1], [], []>} : vector<4x100xf32>, vector<100x100xf32>, vector<4x100xf32> -> vector<4x100xf32>
    %157 = arith.addf %155, %156 : vector<4x100xf32>
    %158 = vector.broadcast %103 : vector<1x100xf32> to vector<4x100xf32>
    %159 = arith.addf %157, %158 : vector<4x100xf32>
    %160 = math.tanh %159 : vector<4x100xf32>
    %161 = vector.extract_strided_slice %111 {offsets = [0, 0], sizes = [4, 50], strides = [1, 1]} : vector<4x100xf32> to vector<4x50xf32>
    %162 = vector.extract_strided_slice %160 {offsets = [0, 50], sizes = [4, 50], strides = [1, 1]} : vector<4x100xf32> to vector<4x50xf32>
    %163 = tpu.concatenate %161, %162 in 1 : vector<4x50xf32>, vector<4x50xf32> -> vector<4x100xf32>
    %164 = vector.extract_strided_slice %118 {offsets = [0, 0], sizes = [4, 50], strides = [1, 1]} : vector<4x100xf32> to vector<4x50xf32>
    %165 = vector.extract_strided_slice %153 {offsets = [0, 50], sizes = [4, 50], strides = [1, 1]} : vector<4x100xf32> to vector<4x50xf32>
    %166 = tpu.concatenate %164, %165 in 1 : vector<4x50xf32>, vector<4x50xf32> -> vector<4x100xf32>
    %167 = vector.extract_strided_slice %125 {offsets = [0, 0], sizes = [4, 50], strides = [1, 1]} : vector<4x100xf32> to vector<4x50xf32>
    %168 = vector.extract_strided_slice %146 {offsets = [0, 50], sizes = [4, 50], strides = [1, 1]} : vector<4x100xf32> to vector<4x50xf32>
    %169 = tpu.concatenate %167, %168 in 1 : vector<4x50xf32>, vector<4x50xf32> -> vector<4x100xf32>
    %170 = vector.extract_strided_slice %132 {offsets = [0, 0], sizes = [4, 50], strides = [1, 1]} : vector<4x100xf32> to vector<4x50xf32>
    %171 = vector.extract_strided_slice %139 {offsets = [0, 50], sizes = [4, 50], strides = [1, 1]} : vector<4x100xf32> to vector<4x50xf32>
    %172 = tpu.concatenate %170, %171 in 1 : vector<4x50xf32>, vector<4x50xf32> -> vector<4x100xf32>
    %173 = vector.extract_strided_slice %139 {offsets = [0, 0], sizes = [4, 50], strides = [1, 1]} : vector<4x100xf32> to vector<4x50xf32>
    %174 = vector.extract_strided_slice %132 {offsets = [0, 50], sizes = [4, 50], strides = [1, 1]} : vector<4x100xf32> to vector<4x50xf32>
    %175 = tpu.concatenate %173, %174 in 1 : vector<4x50xf32>, vector<4x50xf32> -> vector<4x100xf32>
    %176 = vector.extract_strided_slice %146 {offsets = [0, 0], sizes = [4, 50], strides = [1, 1]} : vector<4x100xf32> to vector<4x50xf32>
    %177 = vector.extract_strided_slice %125 {offsets = [0, 50], sizes = [4, 50], strides = [1, 1]} : vector<4x100xf32> to vector<4x50xf32>
    %178 = tpu.concatenate %176, %177 in 1 : vector<4x50xf32>, vector<4x50xf32> -> vector<4x100xf32>
    %179 = vector.extract_strided_slice %153 {offsets = [0, 0], sizes = [4, 50], strides = [1, 1]} : vector<4x100xf32> to vector<4x50xf32>
    %180 = vector.extract_strided_slice %118 {offsets = [0, 50], sizes = [4, 50], strides = [1, 1]} : vector<4x100xf32> to vector<4x50xf32>
    %181 = tpu.concatenate %179, %180 in 1 : vector<4x50xf32>, vector<4x50xf32> -> vector<4x100xf32>
    %182 = vector.extract_strided_slice %160 {offsets = [0, 0], sizes = [4, 50], strides = [1, 1]} : vector<4x100xf32> to vector<4x50xf32>
    %183 = vector.extract_strided_slice %111 {offsets = [0, 50], sizes = [4, 50], strides = [1, 1]} : vector<4x100xf32> to vector<4x50xf32>
    %184 = tpu.concatenate %182, %183 in 1 : vector<4x50xf32>, vector<4x50xf32> -> vector<4x100xf32>
    %c0_47 = arith.constant 0 : index
    %c0_48 = arith.constant 0 : index
    %185 = vector.load %arg7[%c0_47, %c0_48] : memref<200x100xf32, #tpu.memory_space<vmem>>, vector<200x100xf32>
    %c0_49 = arith.constant 0 : index
    %c0_50 = arith.constant 0 : index
    %186 = vector.load %arg8[%c0_49, %c0_50] : memref<100x100xf32, #tpu.memory_space<vmem>>, vector<100x100xf32>
    %c0_51 = arith.constant 0 : index
    %c0_52 = arith.constant 0 : index
    %187 = vector.load %arg9[%c0_51, %c0_52] : memref<1x100xf32, #tpu.memory_space<vmem>>, vector<1x100xf32>
    %cst_53 = arith.constant 0.000000e+00 : f32
    %188 = vector.broadcast %cst_53 : f32 to vector<4x100xf32>
    %189 = tpu.concatenate %163, %184 in 1 : vector<4x100xf32>, vector<4x100xf32> -> vector<4x200xf32>
    %cst_54 = arith.constant dense<0.000000e+00> : vector<4x100xf32>
    %190 = tpu.matmul %189, %185, %cst_54 {dimension_numbers = #tpu.dot_dimension_numbers<[1], [0], [0], [1], [0, 0, 1, 1], [], []>} : vector<4x200xf32>, vector<200x100xf32>, vector<4x100xf32> -> vector<4x100xf32>
    %cst_55 = arith.constant dense<0.000000e+00> : vector<4x100xf32>
    %191 = tpu.matmul %188, %186, %cst_55 {dimension_numbers = #tpu.dot_dimension_numbers<[1], [0], [0], [1], [0, 0, 1, 1], [], []>} : vector<4x100xf32>, vector<100x100xf32>, vector<4x100xf32> -> vector<4x100xf32>
    %192 = arith.addf %190, %191 : vector<4x100xf32>
    %193 = vector.broadcast %187 : vector<1x100xf32> to vector<4x100xf32>
    %194 = arith.addf %192, %193 : vector<4x100xf32>
    %195 = math.tanh %194 : vector<4x100xf32>
    %196 = tpu.concatenate %166, %181 in 1 : vector<4x100xf32>, vector<4x100xf32> -> vector<4x200xf32>
    %cst_56 = arith.constant dense<0.000000e+00> : vector<4x100xf32>
    %197 = tpu.matmul %196, %185, %cst_56 {dimension_numbers = #tpu.dot_dimension_numbers<[1], [0], [0], [1], [0, 0, 1, 1], [], []>} : vector<4x200xf32>, vector<200x100xf32>, vector<4x100xf32> -> vector<4x100xf32>
    %cst_57 = arith.constant dense<0.000000e+00> : vector<4x100xf32>
    %198 = tpu.matmul %195, %186, %cst_57 {dimension_numbers = #tpu.dot_dimension_numbers<[1], [0], [0], [1], [0, 0, 1, 1], [], []>} : vector<4x100xf32>, vector<100x100xf32>, vector<4x100xf32> -> vector<4x100xf32>
    %199 = arith.addf %197, %198 : vector<4x100xf32>
    %200 = vector.broadcast %187 : vector<1x100xf32> to vector<4x100xf32>
    %201 = arith.addf %199, %200 : vector<4x100xf32>
    %202 = math.tanh %201 : vector<4x100xf32>
    %203 = tpu.concatenate %169, %178 in 1 : vector<4x100xf32>, vector<4x100xf32> -> vector<4x200xf32>
    %cst_58 = arith.constant dense<0.000000e+00> : vector<4x100xf32>
    %204 = tpu.matmul %203, %185, %cst_58 {dimension_numbers = #tpu.dot_dimension_numbers<[1], [0], [0], [1], [0, 0, 1, 1], [], []>} : vector<4x200xf32>, vector<200x100xf32>, vector<4x100xf32> -> vector<4x100xf32>
    %cst_59 = arith.constant dense<0.000000e+00> : vector<4x100xf32>
    %205 = tpu.matmul %202, %186, %cst_59 {dimension_numbers = #tpu.dot_dimension_numbers<[1], [0], [0], [1], [0, 0, 1, 1], [], []>} : vector<4x100xf32>, vector<100x100xf32>, vector<4x100xf32> -> vector<4x100xf32>
    %206 = arith.addf %204, %205 : vector<4x100xf32>
    %207 = vector.broadcast %187 : vector<1x100xf32> to vector<4x100xf32>
    %208 = arith.addf %206, %207 : vector<4x100xf32>
    %209 = math.tanh %208 : vector<4x100xf32>
    %210 = tpu.concatenate %172, %175 in 1 : vector<4x100xf32>, vector<4x100xf32> -> vector<4x200xf32>
    %cst_60 = arith.constant dense<0.000000e+00> : vector<4x100xf32>
    %211 = tpu.matmul %210, %185, %cst_60 {dimension_numbers = #tpu.dot_dimension_numbers<[1], [0], [0], [1], [0, 0, 1, 1], [], []>} : vector<4x200xf32>, vector<200x100xf32>, vector<4x100xf32> -> vector<4x100xf32>
    %cst_61 = arith.constant dense<0.000000e+00> : vector<4x100xf32>
    %212 = tpu.matmul %209, %186, %cst_61 {dimension_numbers = #tpu.dot_dimension_numbers<[1], [0], [0], [1], [0, 0, 1, 1], [], []>} : vector<4x100xf32>, vector<100x100xf32>, vector<4x100xf32> -> vector<4x100xf32>
    %213 = arith.addf %211, %212 : vector<4x100xf32>
    %214 = vector.broadcast %187 : vector<1x100xf32> to vector<4x100xf32>
    %215 = arith.addf %213, %214 : vector<4x100xf32>
    %216 = math.tanh %215 : vector<4x100xf32>
    %217 = tpu.concatenate %175, %172 in 1 : vector<4x100xf32>, vector<4x100xf32> -> vector<4x200xf32>
    %cst_62 = arith.constant dense<0.000000e+00> : vector<4x100xf32>
    %218 = tpu.matmul %217, %185, %cst_62 {dimension_numbers = #tpu.dot_dimension_numbers<[1], [0], [0], [1], [0, 0, 1, 1], [], []>} : vector<4x200xf32>, vector<200x100xf32>, vector<4x100xf32> -> vector<4x100xf32>
    %cst_63 = arith.constant dense<0.000000e+00> : vector<4x100xf32>
    %219 = tpu.matmul %216, %186, %cst_63 {dimension_numbers = #tpu.dot_dimension_numbers<[1], [0], [0], [1], [0, 0, 1, 1], [], []>} : vector<4x100xf32>, vector<100x100xf32>, vector<4x100xf32> -> vector<4x100xf32>
    %220 = arith.addf %218, %219 : vector<4x100xf32>
    %221 = vector.broadcast %187 : vector<1x100xf32> to vector<4x100xf32>
    %222 = arith.addf %220, %221 : vector<4x100xf32>
    %223 = math.tanh %222 : vector<4x100xf32>
    %224 = tpu.concatenate %178, %169 in 1 : vector<4x100xf32>, vector<4x100xf32> -> vector<4x200xf32>
    %cst_64 = arith.constant dense<0.000000e+00> : vector<4x100xf32>
    %225 = tpu.matmul %224, %185, %cst_64 {dimension_numbers = #tpu.dot_dimension_numbers<[1], [0], [0], [1], [0, 0, 1, 1], [], []>} : vector<4x200xf32>, vector<200x100xf32>, vector<4x100xf32> -> vector<4x100xf32>
    %cst_65 = arith.constant dense<0.000000e+00> : vector<4x100xf32>
    %226 = tpu.matmul %223, %186, %cst_65 {dimension_numbers = #tpu.dot_dimension_numbers<[1], [0], [0], [1], [0, 0, 1, 1], [], []>} : vector<4x100xf32>, vector<100x100xf32>, vector<4x100xf32> -> vector<4x100xf32>
    %227 = arith.addf %225, %226 : vector<4x100xf32>
    %228 = vector.broadcast %187 : vector<1x100xf32> to vector<4x100xf32>
    %229 = arith.addf %227, %228 : vector<4x100xf32>
    %230 = math.tanh %229 : vector<4x100xf32>
    %231 = tpu.concatenate %181, %166 in 1 : vector<4x100xf32>, vector<4x100xf32> -> vector<4x200xf32>
    %cst_66 = arith.constant dense<0.000000e+00> : vector<4x100xf32>
    %232 = tpu.matmul %231, %185, %cst_66 {dimension_numbers = #tpu.dot_dimension_numbers<[1], [0], [0], [1], [0, 0, 1, 1], [], []>} : vector<4x200xf32>, vector<200x100xf32>, vector<4x100xf32> -> vector<4x100xf32>
    %cst_67 = arith.constant dense<0.000000e+00> : vector<4x100xf32>
    %233 = tpu.matmul %230, %186, %cst_67 {dimension_numbers = #tpu.dot_dimension_numbers<[1], [0], [0], [1], [0, 0, 1, 1], [], []>} : vector<4x100xf32>, vector<100x100xf32>, vector<4x100xf32> -> vector<4x100xf32>
    %234 = arith.addf %232, %233 : vector<4x100xf32>
    %235 = vector.broadcast %187 : vector<1x100xf32> to vector<4x100xf32>
    %236 = arith.addf %234, %235 : vector<4x100xf32>
    %237 = math.tanh %236 : vector<4x100xf32>
    %238 = tpu.concatenate %184, %163 in 1 : vector<4x100xf32>, vector<4x100xf32> -> vector<4x200xf32>
    %cst_68 = arith.constant dense<0.000000e+00> : vector<4x100xf32>
    %239 = tpu.matmul %238, %185, %cst_68 {dimension_numbers = #tpu.dot_dimension_numbers<[1], [0], [0], [1], [0, 0, 1, 1], [], []>} : vector<4x200xf32>, vector<200x100xf32>, vector<4x100xf32> -> vector<4x100xf32>
    %cst_69 = arith.constant dense<0.000000e+00> : vector<4x100xf32>
    %240 = tpu.matmul %237, %186, %cst_69 {dimension_numbers = #tpu.dot_dimension_numbers<[1], [0], [0], [1], [0, 0, 1, 1], [], []>} : vector<4x100xf32>, vector<100x100xf32>, vector<4x100xf32> -> vector<4x100xf32>
    %241 = arith.addf %239, %240 : vector<4x100xf32>
    %242 = vector.broadcast %187 : vector<1x100xf32> to vector<4x100xf32>
    %243 = arith.addf %241, %242 : vector<4x100xf32>
    %244 = math.tanh %243 : vector<4x100xf32>
    %245 = vector.extract_strided_slice %195 {offsets = [0, 0], sizes = [4, 50], strides = [1, 1]} : vector<4x100xf32> to vector<4x50xf32>
    %246 = vector.extract_strided_slice %244 {offsets = [0, 50], sizes = [4, 50], strides = [1, 1]} : vector<4x100xf32> to vector<4x50xf32>
    %247 = tpu.concatenate %245, %246 in 1 : vector<4x50xf32>, vector<4x50xf32> -> vector<4x100xf32>
    %248 = vector.extract_strided_slice %202 {offsets = [0, 0], sizes = [4, 50], strides = [1, 1]} : vector<4x100xf32> to vector<4x50xf32>
    %249 = vector.extract_strided_slice %237 {offsets = [0, 50], sizes = [4, 50], strides = [1, 1]} : vector<4x100xf32> to vector<4x50xf32>
    %250 = tpu.concatenate %248, %249 in 1 : vector<4x50xf32>, vector<4x50xf32> -> vector<4x100xf32>
    %251 = vector.extract_strided_slice %209 {offsets = [0, 0], sizes = [4, 50], strides = [1, 1]} : vector<4x100xf32> to vector<4x50xf32>
    %252 = vector.extract_strided_slice %230 {offsets = [0, 50], sizes = [4, 50], strides = [1, 1]} : vector<4x100xf32> to vector<4x50xf32>
    %253 = tpu.concatenate %251, %252 in 1 : vector<4x50xf32>, vector<4x50xf32> -> vector<4x100xf32>
    %254 = vector.extract_strided_slice %216 {offsets = [0, 0], sizes = [4, 50], strides = [1, 1]} : vector<4x100xf32> to vector<4x50xf32>
    %255 = vector.extract_strided_slice %223 {offsets = [0, 50], sizes = [4, 50], strides = [1, 1]} : vector<4x100xf32> to vector<4x50xf32>
    %256 = tpu.concatenate %254, %255 in 1 : vector<4x50xf32>, vector<4x50xf32> -> vector<4x100xf32>
    %257 = vector.extract_strided_slice %223 {offsets = [0, 0], sizes = [4, 50], strides = [1, 1]} : vector<4x100xf32> to vector<4x50xf32>
    %258 = vector.extract_strided_slice %216 {offsets = [0, 50], sizes = [4, 50], strides = [1, 1]} : vector<4x100xf32> to vector<4x50xf32>
    %259 = tpu.concatenate %257, %258 in 1 : vector<4x50xf32>, vector<4x50xf32> -> vector<4x100xf32>
    %260 = vector.extract_strided_slice %230 {offsets = [0, 0], sizes = [4, 50], strides = [1, 1]} : vector<4x100xf32> to vector<4x50xf32>
    %261 = vector.extract_strided_slice %209 {offsets = [0, 50], sizes = [4, 50], strides = [1, 1]} : vector<4x100xf32> to vector<4x50xf32>
    %262 = tpu.concatenate %260, %261 in 1 : vector<4x50xf32>, vector<4x50xf32> -> vector<4x100xf32>
    %263 = vector.extract_strided_slice %237 {offsets = [0, 0], sizes = [4, 50], strides = [1, 1]} : vector<4x100xf32> to vector<4x50xf32>
    %264 = vector.extract_strided_slice %202 {offsets = [0, 50], sizes = [4, 50], strides = [1, 1]} : vector<4x100xf32> to vector<4x50xf32>
    %265 = tpu.concatenate %263, %264 in 1 : vector<4x50xf32>, vector<4x50xf32> -> vector<4x100xf32>
    %266 = vector.extract_strided_slice %244 {offsets = [0, 0], sizes = [4, 50], strides = [1, 1]} : vector<4x100xf32> to vector<4x50xf32>
    %267 = vector.extract_strided_slice %195 {offsets = [0, 50], sizes = [4, 50], strides = [1, 1]} : vector<4x100xf32> to vector<4x50xf32>
    %268 = tpu.concatenate %266, %267 in 1 : vector<4x50xf32>, vector<4x50xf32> -> vector<4x100xf32>
    %c0_70 = arith.constant 0 : index
    %c0_71 = arith.constant 0 : index
    %269 = vector.load %arg10[%c0_70, %c0_71] : memref<200x100xf32, #tpu.memory_space<vmem>>, vector<200x100xf32>
    %c0_72 = arith.constant 0 : index
    %c0_73 = arith.constant 0 : index
    %270 = vector.load %arg11[%c0_72, %c0_73] : memref<100x100xf32, #tpu.memory_space<vmem>>, vector<100x100xf32>
    %c0_74 = arith.constant 0 : index
    %c0_75 = arith.constant 0 : index
    %271 = vector.load %arg12[%c0_74, %c0_75] : memref<1x100xf32, #tpu.memory_space<vmem>>, vector<1x100xf32>
    %cst_76 = arith.constant 0.000000e+00 : f32
    %272 = vector.broadcast %cst_76 : f32 to vector<4x100xf32>
    %273 = tpu.concatenate %247, %268 in 1 : vector<4x100xf32>, vector<4x100xf32> -> vector<4x200xf32>
    %cst_77 = arith.constant dense<0.000000e+00> : vector<4x100xf32>
    %274 = tpu.matmul %273, %269, %cst_77 {dimension_numbers = #tpu.dot_dimension_numbers<[1], [0], [0], [1], [0, 0, 1, 1], [], []>} : vector<4x200xf32>, vector<200x100xf32>, vector<4x100xf32> -> vector<4x100xf32>
    %cst_78 = arith.constant dense<0.000000e+00> : vector<4x100xf32>
    %275 = tpu.matmul %272, %270, %cst_78 {dimension_numbers = #tpu.dot_dimension_numbers<[1], [0], [0], [1], [0, 0, 1, 1], [], []>} : vector<4x100xf32>, vector<100x100xf32>, vector<4x100xf32> -> vector<4x100xf32>
    %276 = arith.addf %274, %275 : vector<4x100xf32>
    %277 = vector.broadcast %271 : vector<1x100xf32> to vector<4x100xf32>
    %278 = arith.addf %276, %277 : vector<4x100xf32>
    %279 = math.tanh %278 : vector<4x100xf32>
    %280 = tpu.concatenate %250, %265 in 1 : vector<4x100xf32>, vector<4x100xf32> -> vector<4x200xf32>
    %cst_79 = arith.constant dense<0.000000e+00> : vector<4x100xf32>
    %281 = tpu.matmul %280, %269, %cst_79 {dimension_numbers = #tpu.dot_dimension_numbers<[1], [0], [0], [1], [0, 0, 1, 1], [], []>} : vector<4x200xf32>, vector<200x100xf32>, vector<4x100xf32> -> vector<4x100xf32>
    %cst_80 = arith.constant dense<0.000000e+00> : vector<4x100xf32>
    %282 = tpu.matmul %279, %270, %cst_80 {dimension_numbers = #tpu.dot_dimension_numbers<[1], [0], [0], [1], [0, 0, 1, 1], [], []>} : vector<4x100xf32>, vector<100x100xf32>, vector<4x100xf32> -> vector<4x100xf32>
    %283 = arith.addf %281, %282 : vector<4x100xf32>
    %284 = vector.broadcast %271 : vector<1x100xf32> to vector<4x100xf32>
    %285 = arith.addf %283, %284 : vector<4x100xf32>
    %286 = math.tanh %285 : vector<4x100xf32>
    %287 = tpu.concatenate %253, %262 in 1 : vector<4x100xf32>, vector<4x100xf32> -> vector<4x200xf32>
    %cst_81 = arith.constant dense<0.000000e+00> : vector<4x100xf32>
    %288 = tpu.matmul %287, %269, %cst_81 {dimension_numbers = #tpu.dot_dimension_numbers<[1], [0], [0], [1], [0, 0, 1, 1], [], []>} : vector<4x200xf32>, vector<200x100xf32>, vector<4x100xf32> -> vector<4x100xf32>
    %cst_82 = arith.constant dense<0.000000e+00> : vector<4x100xf32>
    %289 = tpu.matmul %286, %270, %cst_82 {dimension_numbers = #tpu.dot_dimension_numbers<[1], [0], [0], [1], [0, 0, 1, 1], [], []>} : vector<4x100xf32>, vector<100x100xf32>, vector<4x100xf32> -> vector<4x100xf32>
    %290 = arith.addf %288, %289 : vector<4x100xf32>
    %291 = vector.broadcast %271 : vector<1x100xf32> to vector<4x100xf32>
    %292 = arith.addf %290, %291 : vector<4x100xf32>
    %293 = math.tanh %292 : vector<4x100xf32>
    %294 = tpu.concatenate %256, %259 in 1 : vector<4x100xf32>, vector<4x100xf32> -> vector<4x200xf32>
    %cst_83 = arith.constant dense<0.000000e+00> : vector<4x100xf32>
    %295 = tpu.matmul %294, %269, %cst_83 {dimension_numbers = #tpu.dot_dimension_numbers<[1], [0], [0], [1], [0, 0, 1, 1], [], []>} : vector<4x200xf32>, vector<200x100xf32>, vector<4x100xf32> -> vector<4x100xf32>
    %cst_84 = arith.constant dense<0.000000e+00> : vector<4x100xf32>
    %296 = tpu.matmul %293, %270, %cst_84 {dimension_numbers = #tpu.dot_dimension_numbers<[1], [0], [0], [1], [0, 0, 1, 1], [], []>} : vector<4x100xf32>, vector<100x100xf32>, vector<4x100xf32> -> vector<4x100xf32>
    %297 = arith.addf %295, %296 : vector<4x100xf32>
    %298 = vector.broadcast %271 : vector<1x100xf32> to vector<4x100xf32>
    %299 = arith.addf %297, %298 : vector<4x100xf32>
    %300 = math.tanh %299 : vector<4x100xf32>
    %301 = tpu.concatenate %259, %256 in 1 : vector<4x100xf32>, vector<4x100xf32> -> vector<4x200xf32>
    %cst_85 = arith.constant dense<0.000000e+00> : vector<4x100xf32>
    %302 = tpu.matmul %301, %269, %cst_85 {dimension_numbers = #tpu.dot_dimension_numbers<[1], [0], [0], [1], [0, 0, 1, 1], [], []>} : vector<4x200xf32>, vector<200x100xf32>, vector<4x100xf32> -> vector<4x100xf32>
    %cst_86 = arith.constant dense<0.000000e+00> : vector<4x100xf32>
    %303 = tpu.matmul %300, %270, %cst_86 {dimension_numbers = #tpu.dot_dimension_numbers<[1], [0], [0], [1], [0, 0, 1, 1], [], []>} : vector<4x100xf32>, vector<100x100xf32>, vector<4x100xf32> -> vector<4x100xf32>
    %304 = arith.addf %302, %303 : vector<4x100xf32>
    %305 = vector.broadcast %271 : vector<1x100xf32> to vector<4x100xf32>
    %306 = arith.addf %304, %305 : vector<4x100xf32>
    %307 = math.tanh %306 : vector<4x100xf32>
    %308 = tpu.concatenate %262, %253 in 1 : vector<4x100xf32>, vector<4x100xf32> -> vector<4x200xf32>
    %cst_87 = arith.constant dense<0.000000e+00> : vector<4x100xf32>
    %309 = tpu.matmul %308, %269, %cst_87 {dimension_numbers = #tpu.dot_dimension_numbers<[1], [0], [0], [1], [0, 0, 1, 1], [], []>} : vector<4x200xf32>, vector<200x100xf32>, vector<4x100xf32> -> vector<4x100xf32>
    %cst_88 = arith.constant dense<0.000000e+00> : vector<4x100xf32>
    %310 = tpu.matmul %307, %270, %cst_88 {dimension_numbers = #tpu.dot_dimension_numbers<[1], [0], [0], [1], [0, 0, 1, 1], [], []>} : vector<4x100xf32>, vector<100x100xf32>, vector<4x100xf32> -> vector<4x100xf32>
    %311 = arith.addf %309, %310 : vector<4x100xf32>
    %312 = vector.broadcast %271 : vector<1x100xf32> to vector<4x100xf32>
    %313 = arith.addf %311, %312 : vector<4x100xf32>
    %314 = math.tanh %313 : vector<4x100xf32>
    %315 = tpu.concatenate %265, %250 in 1 : vector<4x100xf32>, vector<4x100xf32> -> vector<4x200xf32>
    %cst_89 = arith.constant dense<0.000000e+00> : vector<4x100xf32>
    %316 = tpu.matmul %315, %269, %cst_89 {dimension_numbers = #tpu.dot_dimension_numbers<[1], [0], [0], [1], [0, 0, 1, 1], [], []>} : vector<4x200xf32>, vector<200x100xf32>, vector<4x100xf32> -> vector<4x100xf32>
    %cst_90 = arith.constant dense<0.000000e+00> : vector<4x100xf32>
    %317 = tpu.matmul %314, %270, %cst_90 {dimension_numbers = #tpu.dot_dimension_numbers<[1], [0], [0], [1], [0, 0, 1, 1], [], []>} : vector<4x100xf32>, vector<100x100xf32>, vector<4x100xf32> -> vector<4x100xf32>
    %318 = arith.addf %316, %317 : vector<4x100xf32>
    %319 = vector.broadcast %271 : vector<1x100xf32> to vector<4x100xf32>
    %320 = arith.addf %318, %319 : vector<4x100xf32>
    %321 = math.tanh %320 : vector<4x100xf32>
    %322 = tpu.concatenate %268, %247 in 1 : vector<4x100xf32>, vector<4x100xf32> -> vector<4x200xf32>
    %cst_91 = arith.constant dense<0.000000e+00> : vector<4x100xf32>
    %323 = tpu.matmul %322, %269, %cst_91 {dimension_numbers = #tpu.dot_dimension_numbers<[1], [0], [0], [1], [0, 0, 1, 1], [], []>} : vector<4x200xf32>, vector<200x100xf32>, vector<4x100xf32> -> vector<4x100xf32>
    %cst_92 = arith.constant dense<0.000000e+00> : vector<4x100xf32>
    %324 = tpu.matmul %321, %270, %cst_92 {dimension_numbers = #tpu.dot_dimension_numbers<[1], [0], [0], [1], [0, 0, 1, 1], [], []>} : vector<4x100xf32>, vector<100x100xf32>, vector<4x100xf32> -> vector<4x100xf32>
    %325 = arith.addf %323, %324 : vector<4x100xf32>
    %326 = vector.broadcast %271 : vector<1x100xf32> to vector<4x100xf32>
    %327 = arith.addf %325, %326 : vector<4x100xf32>
    %328 = math.tanh %327 : vector<4x100xf32>
    %329 = vector.extract_strided_slice %328 {offsets = [0, 0], sizes = [4, 50], strides = [1, 1]} : vector<4x100xf32> to vector<4x50xf32>
    %330 = vector.extract_strided_slice %279 {offsets = [0, 50], sizes = [4, 50], strides = [1, 1]} : vector<4x100xf32> to vector<4x50xf32>
    %331 = tpu.concatenate %329, %330 in 1 : vector<4x50xf32>, vector<4x50xf32> -> vector<4x100xf32>
    %c0_93 = arith.constant 0 : index
    %c0_94 = arith.constant 0 : index
    %332 = vector.load %arg13[%c0_93, %c0_94] : memref<100x100xf32, #tpu.memory_space<vmem>>, vector<100x100xf32>
    %cst_95 = arith.constant dense<0.000000e+00> : vector<4x100xf32>
    %333 = tpu.matmul %331, %332, %cst_95 {dimension_numbers = #tpu.dot_dimension_numbers<[1], [0], [0], [1], [0, 0, 1, 1], [], []>} : vector<4x100xf32>, vector<100x100xf32>, vector<4x100xf32> -> vector<4x100xf32>
    %c0_96 = arith.constant 0 : index
    %c0_97 = arith.constant 0 : index
    %334 = vector.load %arg14[%c0_96, %c0_97] : memref<1x100xf32, #tpu.memory_space<vmem>>, vector<1x100xf32>
    %335 = vector.broadcast %334 : vector<1x100xf32> to vector<4x100xf32>
    %336 = arith.addf %333, %335 : vector<4x100xf32>
    %cst_98 = arith.constant 0.000000e+00 : f32
    %337 = vector.broadcast %cst_98 : f32 to vector<4x100xf32>
    %338 = arith.maximumf %336, %337 : vector<4x100xf32>
    %c0_99 = arith.constant 0 : index
    %c0_100 = arith.constant 0 : index
    %339 = vector.load %arg15[%c0_99, %c0_100] : memref<100x2xf32, #tpu.memory_space<vmem>>, vector<100x2xf32>
    %cst_101 = arith.constant dense<0.000000e+00> : vector<4x2xf32>
    %340 = tpu.matmul %338, %339, %cst_101 {dimension_numbers = #tpu.dot_dimension_numbers<[1], [0], [0], [1], [0, 0, 1, 1], [], []>} : vector<4x100xf32>, vector<100x2xf32>, vector<4x2xf32> -> vector<4x2xf32>
    %c0_102 = arith.constant 0 : index
    %c0_103 = arith.constant 0 : index
    %341 = vector.load %arg16[%c0_102, %c0_103] : memref<1x2xf32, #tpu.memory_space<vmem>>, vector<1x2xf32>
    %342 = vector.broadcast %341 : vector<1x2xf32> to vector<4x2xf32>
    %343 = arith.addf %340, %342 : vector<4x2xf32>
    %c0_104 = arith.constant 0 : index
    %c0_105 = arith.constant 0 : index
    %344 = vector.load %arg17[%c0_104, %c0_105] : memref<4x2xf32, #tpu.memory_space<vmem>>, vector<4x2xf32>
    tpu.vector_store %arg17[%c0_104, %c0_105], %343 {strides = array<i32>} : memref<4x2xf32, #tpu.memory_space<vmem>>, vector<4x2xf32>,
    return
  }
}

</mosaic_0001>

<bundles_post_ra>
// kernel: tpu_custom_call.1
= control target key start
LH: loop header
LB: loop body
LE: loop exit
PB: predicated region body
PF: predicated region fallthrough
CT: control target
= control target key end

     0   :  { %s11129_s0 = inlined_call_operand.vmem [shape: f32[4,8,2], index: 0, kind: input, shape index: {}]   ;;  %s11130_s1 = inlined_call_operand.vmem [shape: f32[4,100], index: 1, kind: input, shape index: {}]   ;;  %s11131_s2 = inlined_call_operand.vmem [shape: f32[100,100], index: 2, kind: input, shape index: {}]   ;;  %s11132_s3 = inlined_call_operand.vmem [shape: f32[1,100], index: 3, kind: input, shape index: {}]   ;;  %s11133_s4 = inlined_call_operand.hbm [shape: f32[200,100], index: 4, kind: input, shape index: {}]   ;;  %s11134_s5 = inlined_call_operand.hbm [shape: f32[100,100], index: 5, kind: input, shape index: {}]   ;;  %s11135_s6 = inlined_call_operand.vmem [shape: f32[1,100], index: 6, kind: input, shape index: {}]   ;;  %s11136_s7 = inlined_call_operand.hbm [shape: f32[200,100], index: 7, kind: input, shape index: {}]   ;;  %s11137_s8 = inlined_call_operand.hbm [shape: f32[100,100], index: 8, kind: input, shape index: {}]   ;;  %s11138_s9 = inlined_call_operand.vmem [shape: f32[1,100], index: 9, kind: input, shape index: {}]   ;;  %s11139_s10 = inlined_call_operand.hbm [shape: f32[200,100], index: 10, kind: input, shape index: {}]   ;;  %s11140_s11 = inlined_call_operand.hbm [shape: f32[100,100], index: 11, kind: input, shape index: {}]   ;;  %s11141_s12 = inlined_call_operand.vmem [shape: f32[1,100], index: 12, kind: input, shape index: {}]   ;;  %s11142_s13 = inlined_call_operand.hbm [shape: f32[100,100], index: 13, kind: input, shape index: {}]   ;;  %s11143_s14 = inlined_call_operand.vmem [shape: f32[1,100], index: 14, kind: input, shape index: {}]   ;;  %s11144_s15 = inlined_call_operand.vmem [shape: f32[100,2], index: 15, kind: input, shape index: {}]   ;;  %s11145_s16 = inlined_call_operand.vmem [shape: f32[1,2], index: 16, kind: input, shape index: {}]   ;;  %s11146_s17 = inlined_call_operand.vmem [shape: f32[4,2], index: 17, kind: output, shape index: {}]  }
   0x1   :  { %11148 = sst [smem:[#allocation17_spill]] %s11129_s0 }
   0x2   :  { %11149 = sst [smem:[#allocation18_spill]] %s11130_s1 }
   0x3   :  { %22 = vsyncpa [#allocation3], 0 }
   0x4   :  { %23 = vsyncpa [#allocation5], 0 }
   0x5   :  { %24 = vsyncpa [#allocation8], 0 }
   0x6   :  { %25 = vsyncpa [#allocation11], 0  ;;  %s8871_s24 = smov [#allocation4]   ;;  %s8872_s26 = smov [#allocation7]  }
   0x7   :  { %s51_s25 = sshll.u32 %s8871_s24, 4  ;;  %s77_s27 = sshll.u32 %s8872_s26, 4  ;;  %s52_s25 = int_to_ptr.vmem [resolvable:$true] %s51_s25  ;;  %s8975_s27 = int_to_ptr.vmem [resolvable:$true] %s77_s27 }
   0x8   :  { %s8709_s0 = scalar_lea.hbm %s11134_s5, 1664 }
   0x9   :  { %p8710_p0 = scmp.ne.s32.totalorder %s11134_s5, %s8709_s0  ;;  %p8713_p1 = scmp.lt.u32.totalorder %s8709_s0, %s11134_s5 }
   0xb   :  { %p8715_p2 = pnand %p8713_p1, %p8710_p0 }
   0xd   :  { %8718 = shalt.err (!%p8715_p2)
}
   0xe   :  { %s8719_s20 = scalar_lea.vmem %s52_s25, 1664  ;;  %p8724_p4 = scmp.lt.s32.totalorder %s52_s25, %s52_s25 }
   0xf   :  { %p8720_p3 = scmp.ne.s32.totalorder %s52_s25, %s8719_s20  ;;  %p8725_p5 = scmp.lt.s32.totalorder %s8719_s20, %s8719_s20 }
  0x11   :  { %p8726_p6 = por %p8725_p5, %p8724_p4 }
  0x13   :  { %p8727_p7 = pnand %p8726_p6, %p8720_p3 }
  0x15   :  { %8730 = shalt.err (!%p8727_p7)
}
  0x16   :  { %s8873_s21 = smov 128   ;;  %s8874_s22 = smov 8  }
  0x17   :  { %57 = dma.hbm_to_vmem [thread:$0]  %s11134_s5, 1664, %s52_s25, [#allocation5], %s8873_s21, %s8873_s21, %s8874_s22  }
  0x18   :  { %s8731_s29 = scalar_lea.hbm %s11137_s8, 1664 }
  0x19   :  { %p8732_p8 = scmp.ne.s32.totalorder %s11137_s8, %s8731_s29  ;;  %p8735_p9 = scmp.lt.u32.totalorder %s8731_s29, %s11137_s8 }
  0x1b   :  { %p8737_p10 = pnand %p8735_p9, %p8732_p8 }
  0x1d   :  { %8740 = shalt.err (!%p8737_p10)
}
  0x1e   :  { %s8741_s1 = scalar_lea.vmem %s8975_s27, 1664  ;;  %p8746_p12 = scmp.lt.s32.totalorder %s8975_s27, %s8975_s27 }
  0x1f   :  { %p8742_p11 = scmp.ne.s32.totalorder %s8975_s27, %s8741_s1  ;;  %p8747_p13 = scmp.lt.s32.totalorder %s8741_s1, %s8741_s1 }
  0x21   :  { %p8748_p0 = por %p8747_p13, %p8746_p12 }
  0x23   :  { %p8749_p1 = pnand %p8748_p0, %p8742_p11 }
  0x25   :  { %8752 = shalt.err (!%p8749_p1)
}
  0x26   :  { %83 = dma.hbm_to_vmem [thread:$0]  %s11137_s8, 1664, %s8975_s27, [#allocation8], %s8873_s21, %s8873_s21, %s8874_s22  }
  0x27   :  { %s8875_s20 = smov [#allocation10]   ;;  %s8876_s24 = smov [#allocation2]  }
  0x28   :  { %s103_s23 = sshll.u32 %s8875_s20, 4  ;;  %s39_s26 = sshll.u32 %s8876_s24, 4  ;;  %s104_s23 = int_to_ptr.vmem [resolvable:$true] %s103_s23  ;;  %s9012_s26 = int_to_ptr.vmem [resolvable:$true] %s39_s26 }
  0x29   :  { %s8753_s0 = scalar_lea.hbm %s11140_s11, 1664 }
  0x2a   :  { %p8754_p2 = scmp.ne.s32.totalorder %s11140_s11, %s8753_s0  ;;  %p8757_p3 = scmp.lt.u32.totalorder %s8753_s0, %s11140_s11 }
  0x2c   :  { %p8759_p4 = pnand %p8757_p3, %p8754_p2 }
  0x2e   :  { %8762 = shalt.err (!%p8759_p4)
}
  0x2f   :  { %s8763_s8 = scalar_lea.vmem %s104_s23, 1664  ;;  %p8768_p6 = scmp.lt.s32.totalorder %s104_s23, %s104_s23 }
  0x30   :  { %p8764_p5 = scmp.ne.s32.totalorder %s104_s23, %s8763_s8  ;;  %p8769_p7 = scmp.lt.s32.totalorder %s8763_s8, %s8763_s8 }
  0x32   :  { %p8770_p8 = por %p8769_p7, %p8768_p6 }
  0x34   :  { %p8771_p9 = pnand %p8770_p8, %p8764_p5 }
  0x36   :  { %8774 = shalt.err (!%p8771_p9)
}
  0x37   :  { %109 = dma.hbm_to_vmem [thread:$0]  %s11140_s11, 1664, %s104_s23, [#allocation11], %s8873_s21, %s8873_s21, %s8874_s22  }
  0x38   :  { %s8775_s24 = scalar_lea.hbm %s11133_s4, 3200 }
  0x39   :  { %p8776_p10 = scmp.ne.s32.totalorder %s11133_s4, %s8775_s24  ;;  %p8779_p11 = scmp.lt.u32.totalorder %s8775_s24, %s11133_s4 }
  0x3b   :  { %p8781_p12 = pnand %p8779_p11, %p8776_p10 }
  0x3d   :  { %8784 = shalt.err (!%p8781_p12)
}
  0x3e   :  { %s8785_s18 = scalar_lea.vmem %s9012_s26, 3200  ;;  %p8790_p0 = scmp.lt.s32.totalorder %s9012_s26, %s9012_s26 }
  0x3f   :  { %p8786_p13 = scmp.ne.s32.totalorder %s9012_s26, %s8785_s18  ;;  %p8791_p1 = scmp.lt.s32.totalorder %s8785_s18, %s8785_s18 }
  0x41   :  { %p8792_p2 = por %p8791_p1, %p8790_p0 }
  0x43   :  { %p8793_p3 = pnand %p8792_p2, %p8786_p13 }
  0x45   :  { %8796 = shalt.err (!%p8793_p3)
}
  0x46   :  { %45 = dma.hbm_to_vmem [thread:$0]  %s11133_s4, 3200, %s9012_s26, [#allocation3], %s8873_s21, %s8873_s21, %s8874_s22  }
  0x47   :  { %s8877_s19 = smov [#allocation6]   ;;  %s8878_s8 = smov [#allocation9]  }
  0x48   :  { %s65_s1 = sshll.u32 %s8877_s19, 4  ;;  %s91_s27 = sshll.u32 %s8878_s8, 4  ;;  %s66_s1 = int_to_ptr.vmem [resolvable:$true] %s65_s1  ;;  %s9049_s27 = int_to_ptr.vmem [resolvable:$true] %s91_s27 }
  0x49   :  { %s8797_s20 = scalar_lea.hbm %s11136_s7, 3200 }
  0x4a   :  { %p8798_p4 = scmp.ne.s32.totalorder %s11136_s7, %s8797_s20  ;;  %p8801_p5 = scmp.lt.u32.totalorder %s8797_s20, %s11136_s7 }
  0x4c   :  { %p8803_p6 = pnand %p8801_p5, %p8798_p4 }
  0x4e   :  { %8806 = shalt.err (!%p8803_p6)
}
  0x4f   :  { %s8807_s4 = scalar_lea.vmem %s66_s1, 3200  ;;  %p8812_p8 = scmp.lt.s32.totalorder %s66_s1, %s66_s1 }
  0x50   :  { %p8808_p7 = scmp.ne.s32.totalorder %s66_s1, %s8807_s4  ;;  %p8813_p9 = scmp.lt.s32.totalorder %s8807_s4, %s8807_s4 }
  0x52   :  { %p8814_p10 = por %p8813_p9, %p8812_p8 }
  0x54   :  { %p8815_p11 = pnand %p8814_p10, %p8808_p7 }
  0x56   :  { %8818 = shalt.err (!%p8815_p11)
}
  0x57   :  { %71 = dma.hbm_to_vmem [thread:$0]  %s11136_s7, 3200, %s66_s1, [#allocation5], %s8873_s21, %s8873_s21, %s8874_s22  }
  0x58   :  { %s8819_s23 = scalar_lea.hbm %s11139_s10, 3200 }
  0x59   :  { %p8820_p12 = scmp.ne.s32.totalorder %s11139_s10, %s8819_s23  ;;  %p8823_p13 = scmp.lt.u32.totalorder %s8819_s23, %s11139_s10 }
  0x5b   :  { %p8825_p0 = pnand %p8823_p13, %p8820_p12 }
  0x5d   :  { %8828 = shalt.err (!%p8825_p0)
}
  0x5e   :  { %s8829_s20 = scalar_lea.vmem %s9049_s27, 3200  ;;  %p8834_p2 = scmp.lt.s32.totalorder %s9049_s27, %s9049_s27 }
  0x5f   :  { %p8830_p1 = scmp.ne.s32.totalorder %s9049_s27, %s8829_s20  ;;  %p8835_p3 = scmp.lt.s32.totalorder %s8829_s20, %s8829_s20 }
  0x61   :  { %p8836_p4 = por %p8835_p3, %p8834_p2 }
  0x63   :  { %p8837_p5 = pnand %p8836_p4, %p8830_p1 }
  0x65   :  { %8840 = shalt.err (!%p8837_p5)
}
  0x66   :  { %97 = dma.hbm_to_vmem [thread:$0]  %s11139_s10, 3200, %s9049_s27, [#allocation8], %s8873_s21, %s8873_s21, %s8874_s22  }
  0x67   :  { %s8879_s24 = smov [#allocation12]   ;;  %s8841_s4 = scalar_lea.hbm %s11142_s13, 1664 }
  0x68   :  { %s117_s28 = sshll.u32 %s8879_s24, 4  ;;  %p8842_p6 = scmp.ne.s32.totalorder %s11142_s13, %s8841_s4  ;;  %s118_s28 = int_to_ptr.vmem [resolvable:$true] %s117_s28 }
  0x69   :  { %p8845_p7 = scmp.lt.u32.totalorder %s8841_s4, %s11142_s13 }
  0x6b   :  { %p8847_p8 = pnand %p8845_p7, %p8842_p6 }
  0x6d   :  { %8850 = shalt.err (!%p8847_p8)
}
  0x6e   :  { %s8851_s23 = scalar_lea.vmem %s118_s28, 1664  ;;  %p8856_p10 = scmp.lt.s32.totalorder %s118_s28, %s118_s28 }
  0x6f   :  { %p8852_p9 = scmp.ne.s32.totalorder %s118_s28, %s8851_s23  ;;  %p8857_p11 = scmp.lt.s32.totalorder %s8851_s23, %s8851_s23 }
  0x71   :  { %p8858_p12 = por %p8857_p11, %p8856_p10 }
  0x73   :  { %p8859_p13 = pnand %p8858_p12, %p8852_p9 }
  0x75   :  { %8862 = shalt.err (!%p8859_p13)
}
  0x76   :  { %123 = dma.hbm_to_vmem [thread:$0]  %s11142_s13, 1664, %s118_s28, [#allocation11], %s8873_s21, %s8873_s21, %s8874_s22  }
  0x77   :  { %8863 = dma.done.wait [#allocation3], 3200  }
  0x78   :  { %8864 = vsyncadd [#allocation3], 4294964096 }
  0x79   :  { %8865 = dma.done.wait [#allocation5], 4864  }
  0x7a   :  { %8866 = vsyncadd [#allocation5], 4294962432 }
  0x7b   :  { %8867 = dma.done.wait [#allocation8], 4864  }
  0x7c   :  { %8868 = vsyncadd [#allocation8], 4294962432 }
  0x7d   :  { %8869 = dma.done.wait [#allocation11], 3328  }
  0x7e   :  { %8870 = vsyncadd [#allocation11], 4294963968  ;;  %v8880_v0 = vmov 0.0|0.0   ;;  %vm8881_vm0 = vmmov 0   ;;  %v8882_v1 = vmov 0.0   ;;  %s11150_s22 = sld [smem:[#allocation17_spill]] }
  0x7f   :  { %7155 = vmatprep.subr.bf16.mxu0 %v8880_v0  ;;  %6155 = vmatprep.mubr.msk.f32.mxu0 %vm8881_vm0, %v8882_v1  ;;  %vm175_vm1 = vcmask 1041409   ;;  %vm178_vm2 = vcmask 1042434   ;;  %v156_v8 = vld [vmem:[%s11131_s2] sm:$0xff]  ;;  %vm181_vm3 = vcmask 1043459   ;;  %v157_v11 = vld [vmem:[%s11131_s2 + $0x8] sm:$0xff]  ;;  %v158_v12 = vld [vmem:[%s11131_s2 + $0x10] sm:$0xff] }
  0x80   :  { %6158 = vmatprep.subr.mxu1 %v8882_v1  ;;  %6160 = vmatprep.mubr.msk.f32.mxu1 %vm8881_vm0, %v8882_v1  ;;  %v159_v13 = vld [vmem:[%s11131_s2 + $0x18] sm:$0xff]  ;;  %v9148_v15 = vpack.c.bf16 %v157_v11, %v156_v8  ;;  %vm200_vm4 = vcmask 1043456   ;;  %v160_v20 = vld [vmem:[%s11131_s2 + $0x20] sm:$0xff]  ;;  %s8883_s23 = smov 2   ;;  %v161_v21 = vld [vmem:[%s11131_s2 + $0x28] sm:$0xff]  ;;  %vm361_vm5 = vcmask 1044484  }
  0x81   :  { %v9158_v19 = vpack.c.bf16 %v159_v13, %v158_v12  ;;  %v9185_v27 = vpack.c.bf16 %v161_v21, %v160_v20  ;;  %v162_v29 = vld [vmem:[%s11131_s2 + $0x30] sm:$0xff]  ;;  %v163_v30 = vld [vmem:[%s11131_s2 + $0x38] sm:$0xff]  ;;  %v164_v33 = vld [vmem:[%s11131_s2 + $0x40] sm:$0xff]  ;;  %vm194_vm6 = vcmask 15360   ;;  %vm274_vm7 = vcmask 31744  }
  0x82   :  { %7157 = vmatpush3.bf16.msra.mxu0 %v9148_v15  ;;  %v9202_v32 = vpack.c.bf16 %v163_v30, %v162_v29  ;;  %v165_v34 = vld [vmem:[%s11131_s2 + $0x48] sm:$0xff]  ;;  %v166_v36 = vld [vmem:[%s11131_s2 + $0x50] sm:$0xff]  ;;  %v167_v37 = vld [vmem:[%s11131_s2 + $0x58] sm:$0xff]  ;;  %vm526_vm8 = vcmask 1045509   ;;  %vm196_vm9 = vcmask 818176   ;;  %vm690_vm10 = vcmask 1046534  }
  0x83   :  { %7158 = vmatprep.subr.bf16.mxu0 %v8880_v0  ;;  %v9212_v35 = vpack.c.bf16 %v165_v34, %v164_v33  ;;  %v9222_v38 = vpack.c.bf16 %v167_v37, %v166_v36  ;;  %v9230_v39 = vld [vmem:[%s11131_s2 + $0x60] sm:$0xf]  ;;  %vm854_vm11 = vcmask 1047559   ;;  %vm1102_vm12 = vcmask 1042432  }
  0x84   :  { %v9110_v2 = vld [vmem:[%s11150_s22] sm:$0xff]  ;;  %v9115_v3 = vld [vmem:[%s11150_s22 + $0x8] sm:$0xff]  ;;  %v9120_v4 = vld [vmem:[%s11150_s22 + $0x10] sm:$0xff]  ;;  %vm1269_vm13 = vcmask 1041408   ;;  %vm1436_vm14 = vcmask 1040384   ;;  %vm1514_vm15 = vcmask 408576  }
  0x85   :  { %v9125_v5 = vld [vmem:[%s11150_s22 + $0x18] sm:$0xff]  ;;  %v184_v6 = vrot.slane %v9110_v2, 7  ;;  %v185_v7 = vrot.slane %v9115_v3, 6  ;;  %v187_v9 = vrot.slane %v9120_v4, 5  ;;  %v364_v17 = vrot.slane %v9110_v2, 5  ;;  %s11151_s22 = sld [smem:[#allocation18_spill]] }
  0x86   :  { %v189_v10 = vrot.slane %v9125_v5, 4  ;;  %v365_v23 = vrot.slane %v9115_v3, 4  ;;  %v367_v24 = vrot.slane %v9120_v4, 3  ;;  %v369_v25 = vrot.slane %v9125_v5, 2  ;;  %7160 = vmatpush3.bf16.msra.mxu0 %v9158_v19  ;;  %v9307_v62 = vld [vmem:[%s11132_s3] ss:$0 sm:$0xff] }
  0x87   :  { %v186_v14 = vsel %vm175_vm1, %v185_v7, %v184_v6  ;;  %7161 = vmatprep.subr.bf16.mxu0 %v8880_v0  ;;  %v9242_v40 = vrot.slane %v9115_v3, 7  ;;  %v9245_v41 = vrot.slane %v9120_v4, 6  ;;  %v9251_v43 = vrot.slane %v9125_v5, 5  ;;  %s8884_s3 = smov 100  }
  0x88   :  { %v188_v16 = vsel %vm178_vm2, %v187_v9, %v186_v14  ;;  %v366_v26 = vsel %vm178_vm2, %v365_v23, %v364_v17  ;;  %v529_v54 = vrot.slane %v9110_v2, 3  ;;  %v530_v55 = vrot.slane %v9115_v3, 2 }
  0x89   :  { %v190_v18 = vsel %vm181_vm3, %v189_v10, %v188_v16  ;;  %v368_v28 = vsel %vm181_vm3, %v367_v24, %v366_v26  ;;  %v176_v42 = vsel %vm175_vm1, %v9242_v40, %v9110_v2  ;;  %v359_v48 = vsel %vm178_vm2, %v9242_v40, %v9110_v2 }
  0x8a   :  { %191 = vrot.lane.b32.xlu0 %v190_v18, %s8883_s23  ;;  %v370_v31 = vsel %vm361_vm5, %v369_v25, %v368_v28  ;;  %7163 = vmatpush3.bf16.msra.mxu0 %v9185_v27  ;;  %v179_v44 = vsel %vm178_vm2, %v9245_v41, %v176_v42  ;;  %v360_v50 = vsel %vm181_vm3, %v9245_v41, %v359_v48  ;;  %v532_v56 = vrot.slane %v9120_v4, 1 }
  0x8b   :  { %v9171_v22 = vld [vmem:[%s11151_s22] sm:$0xf]  ;;  %7164 = vmatprep.subr.bf16.mxu0 %v8880_v0  ;;  %v182_v45 = vsel %vm181_vm3, %v9251_v43, %v179_v44  ;;  %v362_v51 = vsel %vm361_vm5, %v9251_v43, %v360_v50  ;;  %v531_v57 = vsel %vm181_vm3, %v530_v55, %v529_v54  ;;  %v524_v20 = vsel %vm181_vm3, %v9242_v40, %v9110_v2 }
  0x8c   :  { %6159 = vmatpush3.msk.msra.mxu1 %vm200_vm4, %v9171_v22  ;;  %v533_v58 = vsel %vm361_vm5, %v532_v56, %v531_v57  ;;  %v525_v21 = vsel %vm361_vm5, %v9245_v41, %v524_v20  ;;  %v693_v30 = vrot.slane %v9110_v2, 1  ;;  %v697_v33 = vrot.slane %v9125_v5, 6 }
  0x8d   :  { %7173 = vmatprep.subr.bf16.mxu1 %v8880_v0  ;;  %v534_v59 = vsel %vm526_vm8, %v9125_v5, %v533_v58  ;;  %v527_v26 = vsel %vm526_vm8, %v9251_v43, %v525_v21  ;;  %v688_v50 = vsel %vm361_vm5, %v9242_v40, %v9110_v2  ;;  %v1017_v21 = vsel %vm690_vm10, %v365_v23, %v364_v17 }
  0x8e   :  { %371 = vrot.lane.b32.xlu0 %v370_v31, %s8883_s23  ;;  %7166 = vmatpush3.bf16.msra.mxu0 %v9202_v32  ;;  %v695_v31 = vrot.slane %v9120_v4, 7  ;;  %v694_v34 = vsel %vm361_vm5, %v9115_v3, %v693_v30 }
  0x8f   :  { %7167 = vmatprep.subr.bf16.mxu0 %v8880_v0  ;;  %535 = vrot.lane.b32.xlu1 %v534_v59, %s8883_s23  ;;  %v857_v59 = vsel %vm526_vm8, %v185_v7, %v184_v6 }
  0x90   :  { %v696_v36 = vsel %vm526_vm8, %v695_v31, %v694_v34 }
  0x91   :  { %v698_v37 = vsel %vm690_vm10, %v697_v33, %v696_v36 }
  0x92   :  { %7169 = vmatpush3.bf16.msra.mxu0 %v9212_v35 }
  0x93   :  { %7170 = vmatprep.subr.bf16.mxu0 %v8880_v0  ;;  %699 = vrot.lane.b32.xlu1 %v698_v37, %s8883_s23  ;;  %v1013_v37 = vsel %vm690_vm10, %v9242_v40, %v9110_v2 }
  0x96   :  { %7172 = vmatpush3.bf16.msra.mxu0 %v9222_v38 }
  0x97   :  { %6153 = vmatprep.subr.mxu0 %v8882_v1 }
  0x9a   :  { %6154 = vmatpush3.msk.msra.mxu0 %vm200_vm4, %v9230_v39 }
  0x9b   :  { %6156 = vmatmul.mubr.f32.vlgmr.msra.gmra.mrb[0].mxu0 %v8882_v1  ;;  %6192 = vmatprep.subr.mxu0 %v8882_v1 }
  0x9c   :  { %6193 = vmatpush3.msk.msra.mxu0 %vm200_vm4, %v9171_v22  ;;  %6194 = vmatprep.mubr.msk.f32.mxu0 %vm8881_vm0, %v8882_v1 }
  0x9d   :  { %6226 = vmatprep.subr.mxu0 %v8882_v1 }
  0xfc   :  { %v192_v46 = vpop.permute.xlu0 %191 }
  0xfd   :  { %v195_v47 = vsel %vm194_vm6, %v182_v45, %v192_v46 }
  0xfe   :  { %6161 = vmatmul.mubr.msk.f32.vlgmr.msra.gmra.mrb[0].mxu1 %vm274_vm7, %v195_v47 }
  0xff   :  { %7175 = vmatpush3.bf16.msra.mxu1 %v9148_v15  ;;  %6189 = vmatprep.mubr.msk.f32.mxu1 %vm8881_vm0, %v8882_v1 }
 0x100   :  { %7176 = vmatprep.subr.bf16.mxu1 %v8880_v0  ;;  %v372_v49 = vpop.permute.xlu0 %371 }
 0x101   :  { %v374_v52 = vsel %vm194_vm6, %v362_v51, %v372_v49  ;;  %v536_v18 = vpop.permute.xlu1 %535 }
 0x102   :  { %v449_v53 = vrot.slane %v374_v52, 1  ;;  %v538_v28 = vsel %vm194_vm6, %v527_v26, %v536_v18  ;;  %v689_v52 = vsel %vm526_vm8, %v9245_v41, %v688_v50  ;;  %v1018_v26 = vsel %vm854_vm11, %v367_v24, %v1017_v21 }
 0x103   :  { %7178 = vmatpush3.bf16.msra.mxu1 %v9158_v19  ;;  %v613_v29 = vrot.slane %v538_v28, 2  ;;  %1019 = vrot.lane.b32.xlu1 %v1018_v26, %s8883_s23 }
 0x104   :  { %7179 = vmatprep.subr.bf16.mxu1 %v8880_v0  ;;  %6195 = vmatmul.mubr.msk.f32.vlgmr.msra.gmra.mrb[2].mxu0 %vm274_vm7, %v449_v53  ;;  %v691_v53 = vsel %vm690_vm10, %v9251_v43, %v689_v52  ;;  %v1184_v52 = vsel %vm854_vm11, %v530_v55, %v529_v54 }
 0x105   :  { %6227 = vmatpush3.msk.msra.mxu0 %vm200_vm4, %v9171_v22  ;;  %6228 = vmatprep.mubr.msk.f32.mxu0 %vm8881_vm0, %v8882_v1  ;;  %v700_v51 = vpop.permute.xlu1 %699 }
 0x106   :  { %7209 = vmatprep.subr.bf16.mxu0 %v8880_v0  ;;  %v702_v57 = vsel %vm194_vm6, %v691_v53, %v700_v51  ;;  %v1185_v53 = vsel %vm175_vm1, %v9125_v5, %v532_v56 }
 0x107   :  { %7181 = vmatpush3.bf16.msra.mxu1 %v9185_v27  ;;  %v777_v58 = vrot.slane %v702_v57, 3  ;;  %1186 = vrot.lane.b32.xlu1 %v1184_v52, %s8883_s23  ;;  %v1550_v52 = vld [vmem:[#allocation4 + $0x10] sm:$0xff] }
 0x108   :  { %7182 = vmatprep.subr.bf16.mxu1 %v8880_v0  ;;  %6229 = vmatmul.mubr.msk.f32.vlgmr.msra.gmra.mrb[4].mxu0 %vm274_vm7, %v613_v29 }
 0x109   :  { %7211 = vmatpush3.bf16.msra.mxu0 %v9148_v15  ;;  %6257 = vmatprep.mubr.msk.f32.mxu0 %vm8881_vm0, %v8882_v1 }
 0x10a   :  { %7212 = vmatprep.subr.bf16.mxu0 %v8880_v0 }
 0x10b   :  { %7184 = vmatpush3.bf16.msra.mxu1 %v9202_v32  ;;  %1353 = vrot.lane.b32.xlu1 %v693_v30, %s8883_s23 }
 0x10c   :  { %7185 = vmatprep.subr.bf16.mxu1 %v8880_v0 }
 0x10d   :  { %7214 = vmatpush3.bf16.msra.mxu0 %v9158_v19 }
 0x10e   :  { %7215 = vmatprep.subr.bf16.mxu0 %v8880_v0 }
 0x10f   :  { %7187 = vmatpush3.bf16.msra.mxu1 %v9212_v35 }
 0x110   :  { %7188 = vmatprep.subr.bf16.mxu1 %v8880_v0 }
 0x111   :  { %7217 = vmatpush3.bf16.msra.mxu0 %v9185_v27 }
 0x112   :  { %7218 = vmatprep.subr.bf16.mxu0 %v8880_v0 }
 0x113   :  { %7190 = vmatpush3.bf16.msra.mxu1 %v9222_v38 }
 0x114   :  { %6187 = vmatprep.subr.mxu1 %v8882_v1 }
 0x115   :  { %7220 = vmatpush3.bf16.msra.mxu0 %v9202_v32 }
 0x116   :  { %7221 = vmatprep.subr.bf16.mxu0 %v8880_v0 }
 0x117   :  { %6188 = vmatpush3.msk.msra.mxu1 %vm200_vm4, %v9230_v39 }
 0x118   :  { %7191 = vmatprep.subr.bf16.mxu1 %v8880_v0 }
 0x119   :  { %7223 = vmatpush3.bf16.msra.mxu0 %v9212_v35 }
 0x11a   :  { %7224 = vmatprep.subr.bf16.mxu0 %v8880_v0 }
 0x11d   :  { %7226 = vmatpush3.bf16.msra.mxu0 %v9222_v38 }
 0x11e   :  { %6255 = vmatprep.subr.mxu0 %v8882_v1 }
 0x121   :  { %6256 = vmatpush3.msk.msra.mxu0 %vm200_vm4, %v9230_v39 }
 0x122   :  { %6294 = vmatprep.subr.mxu0 %v8882_v1 }
 0x16e   :  { %v270_v60 = vpop.f32.mrb[0].mxu0 }
 0x16f   :  { %v6157_v61 = vpop.f32.mrb[1].mxu0 }
 0x1d1   :  { %v347_v63 = vpop.f32.mrb[0].mxu1 }
 0x1d2   :  { %v348_v8 = vadd.f32 %v347_v63, %v270_v60  ;;  %v6162_v11 = vpop.f32.mrb[1].mxu1  ;;  %v858_v60 = vsel %vm690_vm10, %v187_v9, %v857_v59 }
 0x1d3   :  { %v859_v61 = vsel %vm854_vm11, %v189_v10, %v858_v60  ;;  %v852_v11 = vsel %vm526_vm8, %v9242_v40, %v9110_v2  ;;  %v1180_v60 = vsel %vm854_vm11, %v9242_v40, %v9110_v2 }
 0x1d4   :  { %v357_v12 = vadd.f32 %v9307_v62, %v348_v8  ;;  %860 = vrot.lane.b32.xlu0 %v859_v61, %s8883_s23 }
 0x1d6   :  { %8645 = vtanh.f32 %v357_v12 }
 0x1d7   :  { %v518_v14 = vpop.f32.mrb[2].mxu0 }
 0x1d8   :  { %v6196_v16 = vpop.f32.mrb[3].mxu0  ;;  %1021 = vrot.lane.b32.xlu0 %v369_v25, %s8883_s23 }
 0x1db   :  { %v682_v48 = vpop.f32.mrb[4].mxu0 }
 0x1dc   :  { %v6230_v49 = vpop.f32.mrb[5].mxu0  ;;  %1188 = vrot.lane.b32.xlu0 %v1185_v53, %s8883_s23  ;;  %v1551_v53 = vld [vmem:[#allocation4 + $0x18] sm:$0xff] }
 0x1e0   :  { %v9310_v13 = vpop.eup %8645 }
 0x1e1   :  { %6190 = vmatmul.mubr.msk.f32.vlgmr.msra.gmra.mrb[2].mxu1 %vm196_vm9, %v9310_v13 }
 0x1e2   :  { %7193 = vmatpush3.bf16.msra.mxu1 %v9148_v15  ;;  %6223 = vmatprep.mubr.msk.f32.mxu1 %vm8881_vm0, %v8882_v1 }
 0x1e3   :  { %7194 = vmatprep.subr.bf16.mxu1 %v8880_v0 }
 0x1e6   :  { %7196 = vmatpush3.bf16.msra.mxu1 %v9158_v19 }
 0x1e7   :  { %7197 = vmatprep.subr.bf16.mxu1 %v8880_v0 }
 0x1ea   :  { %7199 = vmatpush3.bf16.msra.mxu1 %v9185_v27 }
 0x1eb   :  { %7200 = vmatprep.subr.bf16.mxu1 %v8880_v0 }
 0x1ee   :  { %7202 = vmatpush3.bf16.msra.mxu1 %v9202_v32 }
 0x1ef   :  { %7203 = vmatprep.subr.bf16.mxu1 %v8880_v0 }
 0x1f2   :  { %7205 = vmatpush3.bf16.msra.mxu1 %v9212_v35 }
 0x1f3   :  { %7206 = vmatprep.subr.bf16.mxu1 %v8880_v0 }
 0x1f6   :  { %7208 = vmatpush3.bf16.msra.mxu1 %v9222_v38 }
 0x1f7   :  { %6221 = vmatprep.subr.mxu1 %v8882_v1 }
 0x1fa   :  { %6222 = vmatpush3.msk.msra.mxu1 %vm200_vm4, %v9230_v39 }
 0x1fb   :  { %6260 = vmatprep.subr.mxu1 %v8882_v1 }
 0x246   :  { %v861_v12 = vpop.permute.xlu0 %860 }
 0x2b4   :  { %v444_v42 = vpop.f32.mrb[2].mxu1 }
 0x2b5   :  { %v519_v44 = vadd.f32 %v518_v14, %v444_v42  ;;  %v6191_v45 = vpop.f32.mrb[3].mxu1  ;;  %v853_v14 = vsel %vm690_vm10, %v9245_v41, %v852_v11  ;;  %v1020_v42 = vpop.permute.xlu1 %1019 }
 0x2b6   :  { %v855_v16 = vsel %vm854_vm11, %v9251_v43, %v853_v14  ;;  %v1014_v45 = vsel %vm854_vm11, %v9245_v41, %v1013_v37  ;;  %v1525_v37 = vld [vmem:[#allocation2 + $0x10] sm:$0xff] }
 0x2b7   :  { %v522_v46 = vadd.f32 %v9307_v62, %v519_v44  ;;  %v863_v18 = vsel %vm194_vm6, %v855_v16, %v861_v12  ;;  %v1022_v44 = vpop.permute.xlu0 %1021  ;;  %v1351_v12 = vsel %vm175_vm1, %v695_v31, %v9115_v3 }
 0x2b8   :  { %v938_v20 = vrot.slane %v863_v18, 4  ;;  %v1352_v14 = vsel %vm178_vm2, %v697_v33, %v1351_v12  ;;  %v1534_v12 = vld [vmem:[#allocation2 + $0x58] sm:$0xff] }
 0x2b9   :  { %8647 = vtanh.f32 %v522_v46  ;;  %v1026_v46 = vsel %vm194_vm6, %v9251_v43, %v1022_v44  ;;  %v1187_v61 = vpop.permute.xlu1 %1186  ;;  %1355 = vrot.lane.b32.xlu0 %v1352_v14, %s8883_s23  ;;  %v1526_v44 = vld [vmem:[#allocation2 + $0x18] sm:$0xff]  ;;  %v1556_v14 = vld [vmem:[#allocation4 + $0x40] sm:$0xff] }
 0x2ba   :  { %v1104_v49 = vrot.slane %v1026_v46, 5  ;;  %v1527_v46 = vld [vmem:[#allocation2 + $0x20] sm:$0xff] }
 0x2c3   :  { %v9372_v47 = vpop.eup %8647 }
 0x2c4   :  { %6224 = vmatmul.mubr.msk.f32.vlgmr.msra.gmra.mrb[4].mxu1 %vm196_vm9, %v9372_v47 }
 0x2c5   :  { %6261 = vmatpush3.msk.msra.mxu1 %vm200_vm4, %v9171_v22  ;;  %6262 = vmatprep.mubr.msk.f32.mxu1 %vm8881_vm0, %v8882_v1 }
 0x2c6   :  { %7227 = vmatprep.subr.bf16.mxu1 %v8880_v0 }
 0x2c8   :  { %6263 = vmatmul.mubr.msk.f32.vlgmr.msra.gmra.mrb[6].mxu1 %vm274_vm7, %v777_v58 }
 0x2c9   :  { %7229 = vmatpush3.bf16.msra.mxu1 %v9148_v15  ;;  %6291 = vmatprep.mubr.msk.f32.mxu1 %vm8881_vm0, %v8882_v1 }
 0x2ca   :  { %7230 = vmatprep.subr.bf16.mxu1 %v8880_v0 }
 0x2cd   :  { %7232 = vmatpush3.bf16.msra.mxu1 %v9158_v19 }
 0x2ce   :  { %7233 = vmatprep.subr.bf16.mxu1 %v8880_v0 }
 0x2d1   :  { %7235 = vmatpush3.bf16.msra.mxu1 %v9185_v27 }
 0x2d2   :  { %7236 = vmatprep.subr.bf16.mxu1 %v8880_v0 }
 0x2d5   :  { %7238 = vmatpush3.bf16.msra.mxu1 %v9202_v32 }
 0x2d6   :  { %7239 = vmatprep.subr.bf16.mxu1 %v8880_v0 }
 0x2d9   :  { %7241 = vmatpush3.bf16.msra.mxu1 %v9212_v35 }
 0x2da   :  { %7242 = vmatprep.subr.bf16.mxu1 %v8880_v0 }
 0x2dd   :  { %7244 = vmatpush3.bf16.msra.mxu1 %v9222_v38 }
 0x2de   :  { %6289 = vmatprep.subr.mxu1 %v8882_v1 }
 0x2e1   :  { %6290 = vmatpush3.msk.msra.mxu1 %vm200_vm4, %v9230_v39 }
 0x2e2   :  { %6328 = vmatprep.subr.mxu1 %v8882_v1 }
 0x397   :  { %v608_v6 = vpop.f32.mrb[4].mxu1 }
 0x398   :  { %v683_v7 = vadd.f32 %v682_v48, %v608_v6  ;;  %v6225_v9 = vpop.f32.mrb[5].mxu1  ;;  %v1025_v48 = vsel %vm194_vm6, %v1014_v45, %v1020_v42  ;;  %v1181_v6 = vsel %vm175_vm1, %v9251_v43, %v9245_v41  ;;  %v9613_v45 = vpack.c.bf16 %v1526_v44, %v1525_v37  ;;  %v1545_v37 = vld [vmem:[#allocation2 + $0xb0] sm:$0xff]  ;;  %v1546_v44 = vld [vmem:[#allocation2 + $0xb8] sm:$0xff] }
 0x399   :  { %v1103_v50 = vrot.slane %v1025_v48, 5  ;;  %v1192_v9 = vsel %vm194_vm6, %v1180_v60, %v1187_v61  ;;  %v1528_v48 = vld [vmem:[#allocation2 + $0x28] sm:$0xff]  ;;  %v1531_v61 = vld [vmem:[#allocation2 + $0x40] sm:$0xff] }
 0x39a   :  { %v686_v10 = vadd.f32 %v9307_v62, %v683_v7  ;;  %v1189_v7 = vpop.permute.xlu0 %1188 }
 0x39b   :  { %v846_v63 = vpop.f32.mrb[6].mxu1  ;;  %v1105_v51 = vsel %vm1102_vm12, %v1103_v50, %v1104_v49  ;;  %v1548_v49 = vld [vmem:[#allocation4] sm:$0xff]  ;;  %v1549_v50 = vld [vmem:[#allocation4 + $0x8] sm:$0xff] }
 0x39c   :  { %8649 = vtanh.f32 %v686_v10  ;;  %v6264_v8 = vpop.f32.mrb[7].mxu1  ;;  %v1193_v10 = vsel %vm194_vm6, %v1181_v6, %v1189_v7  ;;  %v1532_v7 = vld [vmem:[#allocation2 + $0x48] sm:$0xff] }
 0x39d   :  { %v1271_v8 = vrot.slane %v1193_v10, 6  ;;  %v1555_v10 = vld [vmem:[#allocation4 + $0x38] sm:$0xff] }
 0x3a6   :  { %v9423_v25 = vpop.eup %8649 }
 0x3a7   :  { %6258 = vmatmul.mubr.msk.f32.vlgmr.msra.gmra.mrb[6].mxu0 %vm196_vm9, %v9423_v25 }
 0x3a8   :  { %6295 = vmatpush3.msk.msra.mxu0 %vm200_vm4, %v9171_v22  ;;  %6296 = vmatprep.mubr.msk.f32.mxu0 %vm8881_vm0, %v8882_v1 }
 0x3a9   :  { %7245 = vmatprep.subr.bf16.mxu0 %v8880_v0 }
 0x3ab   :  { %6297 = vmatmul.mubr.msk.f32.vlgmr.msra.gmra.mrb[8].mxu0 %vm274_vm7, %v938_v20 }
 0x3ac   :  { %7247 = vmatpush3.bf16.msra.mxu0 %v9148_v15  ;;  %6325 = vmatprep.mubr.msk.f32.mxu0 %vm8881_vm0, %v8882_v1 }
 0x3ad   :  { %7248 = vmatprep.subr.bf16.mxu0 %v8880_v0 }
 0x3b0   :  { %7250 = vmatpush3.bf16.msra.mxu0 %v9158_v19 }
 0x3b1   :  { %7251 = vmatprep.subr.bf16.mxu0 %v8880_v0 }
 0x3b4   :  { %7253 = vmatpush3.bf16.msra.mxu0 %v9185_v27 }
 0x3b5   :  { %7254 = vmatprep.subr.bf16.mxu0 %v8880_v0 }
 0x3b8   :  { %7256 = vmatpush3.bf16.msra.mxu0 %v9202_v32 }
 0x3b9   :  { %7257 = vmatprep.subr.bf16.mxu0 %v8880_v0 }
 0x3bc   :  { %7259 = vmatpush3.bf16.msra.mxu0 %v9212_v35 }
 0x3bd   :  { %7260 = vmatprep.subr.bf16.mxu0 %v8880_v0 }
 0x3c0   :  { %7262 = vmatpush3.bf16.msra.mxu0 %v9222_v38 }
 0x3c1   :  { %6323 = vmatprep.subr.mxu0 %v8882_v1 }
 0x3c4   :  { %6324 = vmatpush3.msk.msra.mxu0 %vm200_vm4, %v9230_v39 }
 0x3c5   :  { %6362 = vmatprep.subr.mxu0 %v8882_v1 }
 0x47a   :  { %v772_v17 = vpop.f32.mrb[6].mxu0 }
 0x47b   :  { %v847_v23 = vadd.f32 %v846_v63, %v772_v17  ;;  %v6259_v24 = vpop.f32.mrb[7].mxu0  ;;  %v1270_v63 = vrot.slane %v1192_v9, 6  ;;  %v1554_v9 = vld [vmem:[#allocation4 + $0x30] sm:$0xff] }
 0x47d   :  { %v850_v28 = vadd.f32 %v9307_v62, %v847_v23  ;;  %v1272_v11 = vsel %vm1269_vm13, %v1270_v63, %v1271_v8  ;;  %v9635_v63 = vpack.c.bf16 %v1532_v7, %v1531_v61  ;;  %v1533_v8 = vld [vmem:[#allocation2 + $0x50] sm:$0xff] }
 0x47e   :  { %v1007_v34 = vpop.f32.mrb[8].mxu0 }
 0x47f   :  { %8651 = vtanh.f32 %v850_v28  ;;  %v6298_v36 = vpop.f32.mrb[9].mxu0 }
 0x480   :  { %v1524_v36 = vld [vmem:[#allocation2 + $0x8] sm:$0xff] }
 0x489   :  { %v9468_v29 = vpop.eup %8651 }
 0x48a   :  { %6292 = vmatmul.mubr.msk.f32.vlgmr.msra.gmra.mrb[8].mxu1 %vm196_vm9, %v9468_v29 }
 0x48b   :  { %6329 = vmatpush3.msk.msra.mxu1 %vm200_vm4, %v9171_v22  ;;  %6330 = vmatprep.mubr.msk.f32.mxu1 %vm8881_vm0, %v8882_v1 }
 0x48c   :  { %7263 = vmatprep.subr.bf16.mxu1 %v8880_v0 }
 0x48e   :  { %6331 = vmatmul.mubr.msk.f32.vlgmr.msra.gmra.mrb[10].mxu1 %vm274_vm7, %v1105_v51  ;;  %v9616_v51 = vpack.c.bf16 %v1549_v50, %v1548_v49 }
 0x48f   :  { %7265 = vmatpush3.bf16.msra.mxu1 %v9148_v15  ;;  %6359 = vmatprep.mubr.msk.f32.mxu1 %vm8881_vm0, %v8882_v1 }
 0x490   :  { %7266 = vmatprep.subr.bf16.mxu1 %v8880_v0 }
 0x493   :  { %7268 = vmatpush3.bf16.msra.mxu1 %v9158_v19 }
 0x494   :  { %7269 = vmatprep.subr.bf16.mxu1 %v8880_v0 }
 0x497   :  { %7271 = vmatpush3.bf16.msra.mxu1 %v9185_v27 }
 0x498   :  { %7272 = vmatprep.subr.bf16.mxu1 %v8880_v0 }
 0x49b   :  { %7274 = vmatpush3.bf16.msra.mxu1 %v9202_v32 }
 0x49c   :  { %7275 = vmatprep.subr.bf16.mxu1 %v8880_v0 }
 0x49f   :  { %7277 = vmatpush3.bf16.msra.mxu1 %v9212_v35 }
 0x4a0   :  { %7278 = vmatprep.subr.bf16.mxu1 %v8880_v0 }
 0x4a3   :  { %7280 = vmatpush3.bf16.msra.mxu1 %v9222_v38 }
 0x4a4   :  { %6357 = vmatprep.subr.mxu1 %v8882_v1 }
 0x4a7   :  { %6358 = vmatpush3.msk.msra.mxu1 %vm200_vm4, %v9230_v39 }
 0x4a8   :  { %6396 = vmatprep.subr.mxu1 %v8882_v1 }
 0x55d   :  { %v933_v54 = vpop.f32.mrb[8].mxu1 }
 0x55e   :  { %v1008_v55 = vadd.f32 %v1007_v34, %v933_v54  ;;  %v6293_v56 = vpop.f32.mrb[9].mxu1  ;;  %v1523_v34 = vld [vmem:[#allocation2] sm:$0xff]  ;;  %v9619_v54 = vpack.c.bf16 %v1528_v48, %v1527_v46  ;;  %v9690_v46 = vpack.c.bf16 %v1546_v44, %v1545_v37 }
 0x55f   :  { %v9610_v42 = vpack.c.bf16 %v1524_v36, %v1523_v34  ;;  %v9622_v56 = vpack.c.bf16 %v1551_v53, %v1550_v52  ;;  %v1544_v34 = vld [vmem:[#allocation2 + $0xa8] sm:$0xff]  ;;  %v9698_v48 = vld [vmem:[#allocation2 + $0xc0] sm:$0xff] }
 0x560   :  { %v1011_v30 = vadd.f32 %v9307_v62, %v1008_v55  ;;  %v1529_v55 = vld [vmem:[#allocation2 + $0x30] sm:$0xff] }
 0x561   :  { %v1174_v58 = vpop.f32.mrb[10].mxu1 }
 0x562   :  { %8653 = vtanh.f32 %v1011_v30  ;;  %v6332_v59 = vpop.f32.mrb[11].mxu1  ;;  %v1530_v30 = vld [vmem:[#allocation2 + $0x38] sm:$0xff] }
 0x563   :  { %v1553_v59 = vld [vmem:[#allocation4 + $0x28] sm:$0xff]  ;;  %v9627_v60 = vpack.c.bf16 %v1530_v30, %v1529_v55 }
 0x56c   :  { %v9518_v57 = vpop.eup %8653 }
 0x56d   :  { %6326 = vmatmul.mubr.msk.f32.vlgmr.msra.gmra.mrb[10].mxu0 %vm196_vm9, %v9518_v57  ;;  %v9597_v17 = vsel %vm1514_vm15, %v9518_v57, %v9468_v29 }
 0x56e   :  { %6363 = vmatpush3.msk.msra.mxu0 %vm200_vm4, %v9171_v22  ;;  %6364 = vmatprep.mubr.msk.f32.mxu0 %vm8881_vm0, %v8882_v1 }
 0x56f   :  { %7281 = vmatprep.subr.bf16.mxu0 %v8880_v0 }
 0x571   :  { %6365 = vmatmul.mubr.msk.f32.vlgmr.msra.gmra.mrb[12].mxu0 %vm274_vm7, %v1272_v11  ;;  %v9638_v11 = vpack.c.bf16 %v1555_v10, %v1554_v9 }
 0x572   :  { %7283 = vmatpush3.bf16.msra.mxu0 %v9148_v15  ;;  %6393 = vmatprep.mubr.msk.f32.mxu0 %vm8881_vm0, %v8882_v1 }
 0x573   :  { %7284 = vmatprep.subr.bf16.mxu0 %v8880_v0 }
 0x576   :  { %7286 = vmatpush3.bf16.msra.mxu0 %v9158_v19 }
 0x577   :  { %7287 = vmatprep.subr.bf16.mxu0 %v8880_v0 }
 0x57a   :  { %7289 = vmatpush3.bf16.msra.mxu0 %v9185_v27 }
 0x57b   :  { %7290 = vmatprep.subr.bf16.mxu0 %v8880_v0 }
 0x57e   :  { %7292 = vmatpush3.bf16.msra.mxu0 %v9202_v32 }
 0x57f   :  { %7293 = vmatprep.subr.bf16.mxu0 %v8880_v0 }
 0x582   :  { %7295 = vmatpush3.bf16.msra.mxu0 %v9212_v35  ;;  %v1354_v35 = vpop.permute.xlu1 %1353 }
 0x583   :  { %7296 = vmatprep.subr.bf16.mxu0 %v8880_v0  ;;  %v1359_v31 = vsel %vm194_vm6, %v9110_v2, %v1354_v35  ;;  %v1559_v35 = vld [vmem:[#allocation4 + $0x58] sm:$0xff] }
 0x586   :  { %7298 = vmatpush3.bf16.msra.mxu0 %v9222_v38  ;;  %v1347_v38 = vsel %vm175_vm1, %v9245_v41, %v9242_v40  ;;  %vm1640_vm1 = vcmask 588800  }
 0x587   :  { %6391 = vmatprep.subr.mxu0 %v8882_v1  ;;  %v1348_v33 = vsel %vm178_vm2, %v9251_v43, %v1347_v38 }
 0x58a   :  { %6392 = vmatpush3.msk.msra.mxu0 %vm200_vm4, %v9230_v39  ;;  %v1356_v39 = vpop.permute.xlu0 %1355 }
 0x58b   :  { %7317 = vmatprep.subr.bf16.mxu0 %v8880_v0  ;;  %v1360_v16 = vsel %vm194_vm6, %v1348_v33, %v1356_v39  ;;  %v1538_v33 = vld [vmem:[#allocation2 + $0x78] sm:$0xff] }
 0x58c   :  { %v1438_v18 = vrot.slane %v1360_v16, 7  ;;  %v1539_v16 = vld [vmem:[#allocation2 + $0x80] sm:$0xff] }
 0x640   :  { %v1096_v3 = vpop.f32.mrb[10].mxu0 }
 0x641   :  { %v1175_v4 = vadd.f32 %v1174_v58, %v1096_v3  ;;  %v6327_v5 = vpop.f32.mrb[11].mxu0  ;;  %v1552_v58 = vld [vmem:[#allocation4 + $0x20] sm:$0xff]  ;;  %v1557_v3 = vld [vmem:[#allocation4 + $0x48] sm:$0xff] }
 0x642   :  { %v9630_v6 = vpack.c.bf16 %v1553_v59, %v1552_v58  ;;  %v1535_v5 = vld [vmem:[#allocation2 + $0x60] sm:$0xff] }
 0x643   :  { %v1178_v15 = vadd.f32 %v9307_v62, %v1175_v4  ;;  %v9643_v4 = vpack.c.bf16 %v1534_v12, %v1533_v8 }
 0x644   :  { %v1341_v27 = vpop.f32.mrb[12].mxu0 }
 0x645   :  { %8655 = vtanh.f32 %v1178_v15  ;;  %v6366_v32 = vpop.f32.mrb[13].mxu0  ;;  %v9646_v15 = vpack.c.bf16 %v1557_v3, %v1556_v14 }
 0x646   :  { %v1558_v32 = vld [vmem:[#allocation4 + $0x50] sm:$0xff] }
 0x647   :  { %v9654_v39 = vpack.c.bf16 %v1559_v35, %v1558_v32 }
 0x64f   :  { %v9562_v19 = vpop.eup %8655 }
 0x650   :  { %6360 = vmatmul.mubr.msk.f32.vlgmr.msra.gmra.mrb[12].mxu1 %vm196_vm9, %v9562_v19  ;;  %v9604_v23 = vsel %vm1514_vm15, %v9423_v25, %v9562_v19 }
 0x651   :  { %6397 = vmatpush3.msk.msra.mxu1 %vm200_vm4, %v9171_v22  ;;  %6398 = vmatprep.mubr.msk.f32.mxu1 %vm8881_vm0, %v8882_v1  ;;  %v1437_v22 = vrot.slane %v1359_v31, 7  ;;  %v1537_v31 = vld [vmem:[#allocation2 + $0x70] sm:$0xff] }
 0x652   :  { %7299 = vmatprep.subr.bf16.mxu1 %v8880_v0 }
 0x653   :  { %v1439_v20 = vsel %vm1436_vm14, %v1437_v22, %v1438_v18  ;;  %v9659_v22 = vpack.c.bf16 %v1538_v33, %v1537_v31  ;;  %v1540_v18 = vld [vmem:[#allocation2 + $0x88] sm:$0xff] }
 0x654   :  { %6399 = vmatmul.mubr.msk.f32.vlgmr.msra.gmra.mrb[14].mxu1 %vm274_vm7, %v1439_v20  ;;  %v9664_v20 = vld [vmem:[#allocation4 + $0x60] sm:$0xf] }
 0x655   :  { %6427 = vmatprep.mubr.msk.f32.mxu1 %vm8881_vm0, %v8882_v1  ;;  %7301 = vmatpush3.bf16.msra.mxu1 %v9616_v51 }
 0x656   :  { %7302 = vmatprep.subr.bf16.mxu1 %v8880_v0 }
 0x659   :  { %7304 = vmatpush3.bf16.msra.mxu1 %v9622_v56 }
 0x65a   :  { %7305 = vmatprep.subr.bf16.mxu1 %v8880_v0 }
 0x65d   :  { %7307 = vmatpush3.bf16.msra.mxu1 %v9630_v6 }
 0x65e   :  { %7308 = vmatprep.subr.bf16.mxu1 %v8880_v0 }
 0x661   :  { %7310 = vmatpush3.bf16.msra.mxu1 %v9638_v11 }
 0x662   :  { %7311 = vmatprep.subr.bf16.mxu1 %v8880_v0 }
 0x665   :  { %7313 = vmatpush3.bf16.msra.mxu1 %v9646_v15 }
 0x666   :  { %7314 = vmatprep.subr.bf16.mxu1 %v8880_v0 }
 0x669   :  { %7316 = vmatpush3.bf16.msra.mxu1 %v9654_v39 }
 0x66a   :  { %6425 = vmatprep.subr.mxu1 %v8882_v1 }
 0x66d   :  { %6426 = vmatpush3.msk.msra.mxu1 %vm200_vm4, %v9664_v20 }
 0x66e   :  { %6428 = vmatmul.mubr.f32.vlgmr.msra.gmra.mrb[16].mxu1 %v8882_v1  ;;  %7353 = vmatprep.subr.bf16.mxu1 %v8880_v0 }
 0x66f   :  { %6456 = vmatprep.mubr.msk.f32.mxu1 %vm8881_vm0, %v8882_v1  ;;  %7355 = vmatpush3.bf16.msra.mxu1 %v9616_v51 }
 0x670   :  { %7356 = vmatprep.subr.bf16.mxu1 %v8880_v0 }
 0x673   :  { %7358 = vmatpush3.bf16.msra.mxu1 %v9622_v56 }
 0x674   :  { %7359 = vmatprep.subr.bf16.mxu1 %v8880_v0 }
 0x677   :  { %7361 = vmatpush3.bf16.msra.mxu1 %v9630_v6 }
 0x678   :  { %7362 = vmatprep.subr.bf16.mxu1 %v8880_v0 }
 0x67b   :  { %7364 = vmatpush3.bf16.msra.mxu1 %v9638_v11 }
 0x67c   :  { %7365 = vmatprep.subr.bf16.mxu1 %v8880_v0 }
 0x67f   :  { %7367 = vmatpush3.bf16.msra.mxu1 %v9646_v15 }
 0x680   :  { %7368 = vmatprep.subr.bf16.mxu1 %v8880_v0 }
 0x683   :  { %7370 = vmatpush3.bf16.msra.mxu1 %v9654_v39 }
 0x684   :  { %6454 = vmatprep.subr.mxu1 %v8882_v1 }
 0x687   :  { %6455 = vmatpush3.msk.msra.mxu1 %vm200_vm4, %v9664_v20 }
 0x688   :  { %7407 = vmatprep.subr.bf16.mxu1 %v8880_v0 }
 0x723   :  { %v1263_v21 = vpop.f32.mrb[12].mxu1 }
 0x724   :  { %v1342_v40 = vadd.f32 %v1341_v27, %v1263_v21  ;;  %v6361_v41 = vpop.f32.mrb[13].mxu1  ;;  %v1536_v27 = vld [vmem:[#allocation2 + $0x68] sm:$0xff]  ;;  %v9667_v21 = vpack.c.bf16 %v1540_v18, %v1539_v16 }
 0x725   :  { %v9651_v38 = vpack.c.bf16 %v1536_v27, %v1535_v5  ;;  %v1542_v41 = vld [vmem:[#allocation2 + $0x98] sm:$0xff] }
 0x726   :  { %v1345_v26 = vadd.f32 %v9307_v62, %v1342_v40  ;;  %v1541_v40 = vld [vmem:[#allocation2 + $0x90] sm:$0xff] }
 0x727   :  { %v9608_v24 = vpop.f32.mrb[14].mxu1 }
 0x728   :  { %8657 = vtanh.f32 %v1345_v26  ;;  %v6400_v28 = vpop.f32.mrb[15].mxu1  ;;  %v9678_v26 = vpack.c.bf16 %v1542_v41, %v1541_v40 }
 0x729   :  { %v1543_v28 = vld [vmem:[#allocation2 + $0xa0] sm:$0xff] }
 0x72a   :  { %v9684_v36 = vpack.c.bf16 %v1544_v34, %v1543_v28 }
 0x732   :  { %v9583_v2 = vpop.eup %8657 }
 0x733   :  { %6394 = vmatmul.mubr.msk.f32.vlgmr.msra.gmra.mrb[14].mxu0 %vm196_vm9, %v9583_v2  ;;  %v9590_v43 = vsel %vm1514_vm15, %v9583_v2, %v9372_v47 }
 0x734   :  { %1722 = vrot.lane.b32.xlu0 %v9590_v43, %s8884_s3  ;;  %7319 = vmatpush1.bf16.msra.mxu0 %v9610_v42 }
 0x735   :  { %7320 = vmatprep.subr.bf16.mxu0 %v8880_v0 }
 0x738   :  { %2026 = vrot.lane.b32.xlu0 %v9597_v17, %s8884_s3  ;;  %7322 = vmatpush1.bf16.msra.mxu0 %v9613_v45 }
 0x739   :  { %7323 = vmatprep.subr.bf16.mxu0 %v8880_v0 }
 0x73c   :  { %2330 = vrot.lane.b32.xlu0 %v9604_v23, %s8884_s3  ;;  %7325 = vmatpush1.bf16.msra.mxu0 %v9619_v54 }
 0x73d   :  { %7326 = vmatprep.subr.bf16.mxu0 %v8880_v0 }
 0x740   :  { %7328 = vmatpush1.bf16.msra.mxu0 %v9627_v60 }
 0x741   :  { %7329 = vmatprep.subr.bf16.mxu0 %v8880_v0 }
 0x744   :  { %7331 = vmatpush1.bf16.msra.mxu0 %v9635_v63 }
 0x745   :  { %7332 = vmatprep.subr.bf16.mxu0 %v8880_v0 }
 0x748   :  { %7334 = vmatpush1.bf16.msra.mxu0 %v9643_v4 }
 0x749   :  { %7335 = vmatprep.subr.bf16.mxu0 %v8880_v0 }
 0x74c   :  { %7337 = vmatpush1.bf16.msra.mxu0 %v9651_v38 }
 0x74d   :  { %7338 = vmatprep.subr.bf16.mxu0 %v8880_v0 }
 0x750   :  { %7340 = vmatpush1.bf16.msra.mxu0 %v9659_v22 }
 0x751   :  { %7341 = vmatprep.subr.bf16.mxu0 %v8880_v0 }
 0x754   :  { %7343 = vmatpush1.bf16.msra.mxu0 %v9667_v21 }
 0x755   :  { %7344 = vmatprep.subr.bf16.mxu0 %v8880_v0 }
 0x758   :  { %7346 = vmatpush1.bf16.msra.mxu0 %v9678_v26 }
 0x759   :  { %7347 = vmatprep.subr.bf16.mxu0 %v8880_v0 }
 0x75c   :  { %7349 = vmatpush1.bf16.msra.mxu0 %v9684_v36 }
 0x75d   :  { %7350 = vmatprep.subr.bf16.mxu0 %v8880_v0 }
 0x760   :  { %7352 = vmatpush1.bf16.msra.mxu0 %v9690_v46 }
 0x761   :  { %1691 = vmatprep.subr.mxu0 %v8882_v1 }
 0x764   :  { %1692 = vmatpush1.msra.mxu0 %v9698_v48 }
 0x765   :  { %7371 = vmatprep.subr.bf16.mxu0 %v8880_v0 }
 0x7a6   :  { %v1723_v59 = vpop.permute.xlu0 %1722 }
 0x7aa   :  { %v2027_v37 = vpop.permute.xlu0 %2026 }
 0x806   :  { %v1430_v49 = vpop.f32.mrb[14].mxu0 }
 0x807   :  { %v1509_v50 = vadd.f32 %v9608_v24, %v1430_v49  ;;  %v6395_v52 = vpop.f32.mrb[15].mxu0  ;;  %v9723_v24 = vsel %vm1514_vm15, %v9562_v19, %v9423_v25 }
 0x809   :  { %v1512_v53 = vadd.f32 %v9307_v62, %v1509_v50  ;;  %v9730_v62 = vsel %vm1514_vm15, %v9468_v29, %v9518_v57 }
 0x80a   :  { %v2029_v44 = vsel %vm196_vm9, %v9730_v62, %v2027_v37 }
 0x80b   :  { %8659 = vtanh.f32 %v1512_v53 }
 0x815   :  { %v8660_v55 = vpop.eup %8659 }
 0x816   :  { %v9713_v30 = vsel %vm1514_vm15, %v8660_v55, %v9310_v13  ;;  %v1515_v58 = vsel %vm1514_vm15, %v9310_v13, %v8660_v55  ;;  %v1516_v13 = vsel %vm1514_vm15, %v9372_v47, %v9583_v2  ;;  %v1636_v47 = vpop.f32.mrb[16].mxu1  ;;  %v9788_v2 = vld [vmem:[%s11135_s6] ss:$0 sm:$0xff] }
 0x817   :  { %1563 = vrot.lane.b32.xlu1 %v9713_v30, %s8884_s3  ;;  %2634 = vrot.lane.b32.xlu0 %v1515_v58, %s8884_s3  ;;  %v6429_v29 = vpop.f32.mrb[17].mxu1  ;;  %v1725_v57 = vsel %vm196_vm9, %v1516_v13, %v1723_v59 }
 0x81b   :  { %1874 = vrot.lane.b32.xlu1 %v9723_v24, %s8884_s3 }
 0x81f   :  { %2178 = vrot.lane.b32.xlu1 %v9730_v62, %s8884_s3 }
 0x823   :  { %2482 = vrot.lane.b32.xlu1 %v1516_v13, %s8884_s3 }
 0x889   :  { %v1564_v25 = vpop.permute.xlu1 %1563 }
 0x88a   :  { %v1566_v19 = vsel %vm196_vm9, %v1515_v58, %v1564_v25  ;;  %5560 = vmatprep.mubr.msk.f32.mxu0 %vm1640_vm1, %v1564_v25 }
 0x88b   :  { %1708 = vmatmul.mubr.f32.vlgmr.msra.gmra.mrb[16].mxu0 %v1566_v19 }
 0x88c   :  { %7373 = vmatpush1.bf16.msra.mxu0 %v9610_v42  ;;  %5564 = vmatprep.mubr.msk.f32.mxu0 %vm1640_vm1, %v1723_v59 }
 0x88d   :  { %7374 = vmatprep.subr.bf16.mxu0 %v8880_v0  ;;  %v1875_v31 = vpop.permute.xlu1 %1874 }
 0x88e   :  { %v1877_v33 = vsel %vm196_vm9, %v9604_v23, %v1875_v31 }
 0x890   :  { %7376 = vmatpush1.bf16.msra.mxu0 %v9613_v45 }
 0x891   :  { %7377 = vmatprep.subr.bf16.mxu0 %v8880_v0  ;;  %v2179_v13 = vpop.permute.xlu1 %2178 }
 0x892   :  { %v2181_v25 = vsel %vm196_vm9, %v9597_v17, %v2179_v13 }
 0x894   :  { %7379 = vmatpush1.bf16.msra.mxu0 %v9619_v54 }
 0x895   :  { %7380 = vmatprep.subr.bf16.mxu0 %v8880_v0 }
 0x898   :  { %7382 = vmatpush1.bf16.msra.mxu0 %v9627_v60 }
 0x899   :  { %7383 = vmatprep.subr.bf16.mxu0 %v8880_v0 }
 0x89c   :  { %7385 = vmatpush1.bf16.msra.mxu0 %v9635_v63 }
 0x89d   :  { %7386 = vmatprep.subr.bf16.mxu0 %v8880_v0 }
 0x8a0   :  { %7388 = vmatpush1.bf16.msra.mxu0 %v9643_v4 }
 0x8a1   :  { %7389 = vmatprep.subr.bf16.mxu0 %v8880_v0 }
 0x8a4   :  { %7391 = vmatpush1.bf16.msra.mxu0 %v9651_v38 }
 0x8a5   :  { %7392 = vmatprep.subr.bf16.mxu0 %v8880_v0 }
 0x8a8   :  { %7394 = vmatpush1.bf16.msra.mxu0 %v9659_v22 }
 0x8a9   :  { %7395 = vmatprep.subr.bf16.mxu0 %v8880_v0 }
 0x8ac   :  { %7397 = vmatpush1.bf16.msra.mxu0 %v9667_v21 }
 0x8ad   :  { %7398 = vmatprep.subr.bf16.mxu0 %v8880_v0 }
 0x8b0   :  { %7400 = vmatpush1.bf16.msra.mxu0 %v9678_v26 }
 0x8b1   :  { %7401 = vmatprep.subr.bf16.mxu0 %v8880_v0 }
 0x8b4   :  { %7403 = vmatpush1.bf16.msra.mxu0 %v9684_v36 }
 0x8b5   :  { %7404 = vmatprep.subr.bf16.mxu0 %v8880_v0 }
 0x8b8   :  { %7406 = vmatpush1.bf16.msra.mxu0 %v9690_v46 }
 0x8b9   :  { %1849 = vmatprep.subr.mxu0 %v8882_v1 }
 0x8bc   :  { %1850 = vmatpush1.msra.mxu0 %v9698_v48 }
 0x8bd   :  { %1866 = vmatmul.mubr.f32.vlgmr.msra.gmra.mrb[18].mxu0 %v1725_v57  ;;  %7461 = vmatprep.subr.bf16.mxu0 %v8880_v0 }
 0x8be   :  { %7463 = vmatpush3.bf16.msra.mxu0 %v9616_v51  ;;  %6514 = vmatprep.mubr.msk.f32.mxu0 %vm8881_vm0, %v8882_v1 }
 0x8bf   :  { %7464 = vmatprep.subr.bf16.mxu0 %v8880_v0 }
 0x8c2   :  { %7466 = vmatpush3.bf16.msra.mxu0 %v9622_v56 }
 0x8c3   :  { %7467 = vmatprep.subr.bf16.mxu0 %v8880_v0 }
 0x8c6   :  { %7469 = vmatpush3.bf16.msra.mxu0 %v9630_v6 }
 0x8c7   :  { %7470 = vmatprep.subr.bf16.mxu0 %v8880_v0 }
 0x8ca   :  { %7472 = vmatpush3.bf16.msra.mxu0 %v9638_v11 }
 0x8cb   :  { %7473 = vmatprep.subr.bf16.mxu0 %v8880_v0 }
 0x8ce   :  { %7475 = vmatpush3.bf16.msra.mxu0 %v9646_v15 }
 0x8cf   :  { %7476 = vmatprep.subr.bf16.mxu0 %v8880_v0 }
 0x8d2   :  { %7478 = vmatpush3.bf16.msra.mxu0 %v9654_v39 }
 0x8d3   :  { %6512 = vmatprep.subr.mxu0 %v8882_v1 }
 0x8d6   :  { %6513 = vmatpush3.msk.msra.mxu0 %vm200_vm4, %v9664_v20 }
 0x8d7   :  { %7479 = vmatprep.subr.bf16.mxu0 %v8880_v0 }
 0x95e   :  { %v1709_v61 = vpop.f32.mrb[16].mxu0 }
 0x95f   :  { %v1710_v7 = vadd.f32 %v1709_v61, %v1636_v47  ;;  %v1711_v9 = vpop.f32.mrb[17].mxu0 }
 0x961   :  { %v1719_v10 = vadd.f32 %v9788_v2, %v1710_v7  ;;  %v2331_v7 = vpop.permute.xlu0 %2330 }
 0x962   :  { %v2333_v9 = vsel %vm196_vm9, %v9723_v24, %v2331_v7 }
 0x963   :  { %8661 = vtanh.f32 %v1719_v10 }
 0x96d   :  { %v9791_v8 = vpop.eup %8661 }
 0x96e   :  { %6457 = vmatmul.mubr.msk.f32.vlgmr.msra.gmra.mrb[18].mxu1 %vm196_vm9, %v9791_v8 }
 0x96f   :  { %7409 = vmatpush3.bf16.msra.mxu1 %v9616_v51  ;;  %6485 = vmatprep.mubr.msk.f32.mxu1 %vm8881_vm0, %v8882_v1 }
 0x970   :  { %7410 = vmatprep.subr.bf16.mxu1 %v8880_v0 }
 0x973   :  { %7412 = vmatpush3.bf16.msra.mxu1 %v9622_v56 }
 0x974   :  { %7413 = vmatprep.subr.bf16.mxu1 %v8880_v0 }
 0x977   :  { %7415 = vmatpush3.bf16.msra.mxu1 %v9630_v6 }
 0x978   :  { %7416 = vmatprep.subr.bf16.mxu1 %v8880_v0 }
 0x97b   :  { %7418 = vmatpush3.bf16.msra.mxu1 %v9638_v11 }
 0x97c   :  { %7419 = vmatprep.subr.bf16.mxu1 %v8880_v0 }
 0x97f   :  { %7421 = vmatpush3.bf16.msra.mxu1 %v9646_v15 }
 0x980   :  { %7422 = vmatprep.subr.bf16.mxu1 %v8880_v0 }
 0x983   :  { %7424 = vmatpush3.bf16.msra.mxu1 %v9654_v39 }
 0x984   :  { %6483 = vmatprep.subr.mxu1 %v8882_v1 }
 0x987   :  { %6484 = vmatpush3.msk.msra.mxu1 %vm200_vm4, %v9664_v20 }
 0x988   :  { %7425 = vmatprep.subr.bf16.mxu1 %v8880_v0 }
 0x990   :  { %v1867_v12 = vpop.f32.mrb[18].mxu0 }
 0x991   :  { %v1869_v14 = vpop.f32.mrb[19].mxu0 }
 0xa41   :  { %v1795_v3 = vpop.f32.mrb[18].mxu1 }
 0xa42   :  { %v1868_v5 = vadd.f32 %v1867_v12, %v1795_v3  ;;  %v6458_v27 = vpop.f32.mrb[19].mxu1  ;;  %v2483_v12 = vpop.permute.xlu1 %2482 }
 0xa44   :  { %v1871_v32 = vadd.f32 %v9788_v2, %v1868_v5 }
 0xa46   :  { %8663 = vtanh.f32 %v1871_v32 }
 0xa50   :  { %v9813_v35 = vpop.eup %8663 }
 0xa51   :  { %6486 = vmatmul.mubr.msk.f32.vlgmr.msra.gmra.mrb[20].mxu1 %vm196_vm9, %v9813_v35 }
 0xa52   :  { %7427 = vmatpush1.bf16.msra.mxu1 %v9610_v42  ;;  %5567 = vmatprep.mubr.msk.f32.mxu1 %vm1640_vm1, %v1875_v31 }
 0xa53   :  { %7428 = vmatprep.subr.bf16.mxu1 %v8880_v0 }
 0xa56   :  { %7430 = vmatpush1.bf16.msra.mxu1 %v9613_v45 }
 0xa57   :  { %7431 = vmatprep.subr.bf16.mxu1 %v8880_v0 }
 0xa5a   :  { %7433 = vmatpush1.bf16.msra.mxu1 %v9619_v54 }
 0xa5b   :  { %7434 = vmatprep.subr.bf16.mxu1 %v8880_v0 }
 0xa5e   :  { %7436 = vmatpush1.bf16.msra.mxu1 %v9627_v60 }
 0xa5f   :  { %7437 = vmatprep.subr.bf16.mxu1 %v8880_v0 }
 0xa62   :  { %7439 = vmatpush1.bf16.msra.mxu1 %v9635_v63 }
 0xa63   :  { %7440 = vmatprep.subr.bf16.mxu1 %v8880_v0 }
 0xa66   :  { %7442 = vmatpush1.bf16.msra.mxu1 %v9643_v4 }
 0xa67   :  { %7443 = vmatprep.subr.bf16.mxu1 %v8880_v0 }
 0xa6a   :  { %7445 = vmatpush1.bf16.msra.mxu1 %v9651_v38 }
 0xa6b   :  { %7446 = vmatprep.subr.bf16.mxu1 %v8880_v0 }
 0xa6e   :  { %7448 = vmatpush1.bf16.msra.mxu1 %v9659_v22 }
 0xa6f   :  { %7449 = vmatprep.subr.bf16.mxu1 %v8880_v0 }
 0xa72   :  { %7451 = vmatpush1.bf16.msra.mxu1 %v9667_v21 }
 0xa73   :  { %7452 = vmatprep.subr.bf16.mxu1 %v8880_v0 }
 0xa76   :  { %7454 = vmatpush1.bf16.msra.mxu1 %v9678_v26 }
 0xa77   :  { %7455 = vmatprep.subr.bf16.mxu1 %v8880_v0 }
 0xa7a   :  { %7457 = vmatpush1.bf16.msra.mxu1 %v9684_v36 }
 0xa7b   :  { %7458 = vmatprep.subr.bf16.mxu1 %v8880_v0 }
 0xa7e   :  { %7460 = vmatpush1.bf16.msra.mxu1 %v9690_v46 }
 0xa7f   :  { %2001 = vmatprep.subr.mxu1 %v8882_v1 }
 0xa82   :  { %2002 = vmatpush1.msra.mxu1 %v9698_v48 }
 0xa83   :  { %2018 = vmatmul.mubr.f32.vlgmr.msra.gmra.mrb[22].mxu1 %v1877_v33  ;;  %7515 = vmatprep.subr.bf16.mxu1 %v8880_v0  ;;  %v2635_v33 = vpop.permute.xlu0 %2634 }
 0xa84   :  { %7517 = vmatpush3.bf16.msra.mxu1 %v9616_v51  ;;  %6543 = vmatprep.mubr.msk.f32.mxu1 %vm8881_vm0, %v8882_v1 }
 0xa85   :  { %7518 = vmatprep.subr.bf16.mxu1 %v8880_v0 }
 0xa88   :  { %7520 = vmatpush3.bf16.msra.mxu1 %v9622_v56 }
 0xa89   :  { %7521 = vmatprep.subr.bf16.mxu1 %v8880_v0 }
 0xa8c   :  { %7523 = vmatpush3.bf16.msra.mxu1 %v9630_v6 }
 0xa8d   :  { %7524 = vmatprep.subr.bf16.mxu1 %v8880_v0 }
 0xa90   :  { %7526 = vmatpush3.bf16.msra.mxu1 %v9638_v11 }
 0xa91   :  { %7527 = vmatprep.subr.bf16.mxu1 %v8880_v0 }
 0xa94   :  { %7529 = vmatpush3.bf16.msra.mxu1 %v9646_v15 }
 0xa95   :  { %7530 = vmatprep.subr.bf16.mxu1 %v8880_v0 }
 0xa98   :  { %7532 = vmatpush3.bf16.msra.mxu1 %v9654_v39 }
 0xa99   :  { %6541 = vmatprep.subr.mxu1 %v8882_v1 }
 0xa9c   :  { %6542 = vmatpush3.msk.msra.mxu1 %vm200_vm4, %v9664_v20 }
 0xa9d   :  { %7533 = vmatprep.subr.bf16.mxu1 %v8880_v0 }
 0xb24   :  { %v1947_v23 = vpop.f32.mrb[20].mxu1 }
 0xb25   :  { %v6487_v16 = vpop.f32.mrb[21].mxu1 }
 0xb26   :  { %v2826_v16 = vld [vmem:[#allocation7 + $0x40] sm:$0xff] }
 0xb56   :  { %v2019_v18 = vpop.f32.mrb[22].mxu1 }
 0xb57   :  { %v2020_v40 = vadd.f32 %v2019_v18, %v1947_v23  ;;  %v2021_v41 = vpop.f32.mrb[23].mxu1  ;;  %v2827_v18 = vld [vmem:[#allocation7 + $0x48] sm:$0xff] }
 0xb58   :  { %v2828_v41 = vld [vmem:[#allocation7 + $0x50] sm:$0xff] }
 0xb59   :  { %v2023_v28 = vadd.f32 %v9788_v2, %v2020_v40  ;;  %v10130_v40 = vpack.c.bf16 %v2827_v18, %v2826_v16 }
 0xb5b   :  { %8665 = vtanh.f32 %v2023_v28  ;;  %v2829_v28 = vld [vmem:[#allocation7 + $0x58] sm:$0xff] }
 0xb65   :  { %v9864_v34 = vpop.eup %8665 }
 0xb66   :  { %6515 = vmatmul.mubr.msk.f32.vlgmr.msra.gmra.mrb[20].mxu0 %vm196_vm9, %v9864_v34 }
 0xb67   :  { %7481 = vmatpush1.bf16.msra.mxu0 %v9610_v42  ;;  %5570 = vmatprep.mubr.msk.f32.mxu0 %vm1640_vm1, %v2027_v37  ;;  %v10136_v37 = vpack.c.bf16 %v2829_v28, %v2828_v41  ;;  %v10203_v41 = vld [vmem:[#allocation6 + $0xc0] sm:$0xff] }
 0xb68   :  { %7482 = vmatprep.subr.bf16.mxu0 %v8880_v0 }
 0xb6b   :  { %7484 = vmatpush1.bf16.msra.mxu0 %v9613_v45 }
 0xb6c   :  { %7485 = vmatprep.subr.bf16.mxu0 %v8880_v0 }
 0xb6f   :  { %7487 = vmatpush1.bf16.msra.mxu0 %v9619_v54 }
 0xb70   :  { %7488 = vmatprep.subr.bf16.mxu0 %v8880_v0 }
 0xb73   :  { %7490 = vmatpush1.bf16.msra.mxu0 %v9627_v60 }
 0xb74   :  { %7491 = vmatprep.subr.bf16.mxu0 %v8880_v0 }
 0xb77   :  { %7493 = vmatpush1.bf16.msra.mxu0 %v9635_v63 }
 0xb78   :  { %7494 = vmatprep.subr.bf16.mxu0 %v8880_v0 }
 0xb7b   :  { %7496 = vmatpush1.bf16.msra.mxu0 %v9643_v4 }
 0xb7c   :  { %7497 = vmatprep.subr.bf16.mxu0 %v8880_v0 }
 0xb7f   :  { %7499 = vmatpush1.bf16.msra.mxu0 %v9651_v38 }
 0xb80   :  { %7500 = vmatprep.subr.bf16.mxu0 %v8880_v0 }
 0xb83   :  { %7502 = vmatpush1.bf16.msra.mxu0 %v9659_v22 }
 0xb84   :  { %7503 = vmatprep.subr.bf16.mxu0 %v8880_v0 }
 0xb87   :  { %7505 = vmatpush1.bf16.msra.mxu0 %v9667_v21 }
 0xb88   :  { %7506 = vmatprep.subr.bf16.mxu0 %v8880_v0 }
 0xb8b   :  { %7508 = vmatpush1.bf16.msra.mxu0 %v9678_v26 }
 0xb8c   :  { %7509 = vmatprep.subr.bf16.mxu0 %v8880_v0 }
 0xb8f   :  { %7511 = vmatpush1.bf16.msra.mxu0 %v9684_v36 }
 0xb90   :  { %7512 = vmatprep.subr.bf16.mxu0 %v8880_v0 }
 0xb93   :  { %7514 = vmatpush1.bf16.msra.mxu0 %v9690_v46 }
 0xb94   :  { %2153 = vmatprep.subr.mxu0 %v8882_v1 }
 0xb97   :  { %2154 = vmatpush1.msra.mxu0 %v9698_v48 }
 0xb98   :  { %2170 = vmatmul.mubr.f32.vlgmr.msra.gmra.mrb[22].mxu0 %v2029_v44  ;;  %7569 = vmatprep.subr.bf16.mxu0 %v8880_v0  ;;  %v2793_v44 = vld [vmem:[#allocation6] sm:$0xff] }
 0xb99   :  { %7571 = vmatpush3.bf16.msra.mxu0 %v9616_v51  ;;  %6572 = vmatprep.mubr.msk.f32.mxu0 %vm8881_vm0, %v8882_v1 }
 0xb9a   :  { %7572 = vmatprep.subr.bf16.mxu0 %v8880_v0 }
 0xb9d   :  { %7574 = vmatpush3.bf16.msra.mxu0 %v9622_v56 }
 0xb9e   :  { %7575 = vmatprep.subr.bf16.mxu0 %v8880_v0 }
 0xba1   :  { %7577 = vmatpush3.bf16.msra.mxu0 %v9630_v6 }
 0xba2   :  { %7578 = vmatprep.subr.bf16.mxu0 %v8880_v0 }
 0xba5   :  { %7580 = vmatpush3.bf16.msra.mxu0 %v9638_v11 }
 0xba6   :  { %7581 = vmatprep.subr.bf16.mxu0 %v8880_v0 }
 0xba9   :  { %7583 = vmatpush3.bf16.msra.mxu0 %v9646_v15 }
 0xbaa   :  { %7584 = vmatprep.subr.bf16.mxu0 %v8880_v0 }
 0xbad   :  { %7586 = vmatpush3.bf16.msra.mxu0 %v9654_v39 }
 0xbae   :  { %6570 = vmatprep.subr.mxu0 %v8882_v1 }
 0xbb1   :  { %6571 = vmatpush3.msk.msra.mxu0 %vm200_vm4, %v9664_v20 }
 0xbb2   :  { %7587 = vmatprep.subr.bf16.mxu0 %v8880_v0 }
 0xc39   :  { %v2099_v49 = vpop.f32.mrb[20].mxu0 }
 0xc3a   :  { %v6516_v50 = vpop.f32.mrb[21].mxu0 }
 0xc3b   :  { %v10144_v50 = vld [vmem:[#allocation7 + $0x60] sm:$0xf] }
 0xc6b   :  { %v2171_v52 = vpop.f32.mrb[22].mxu0 }
 0xc6c   :  { %v2172_v53 = vadd.f32 %v2171_v52, %v2099_v49  ;;  %v2173_v55 = vpop.f32.mrb[23].mxu0  ;;  %v2794_v49 = vld [vmem:[#allocation6 + $0x8] sm:$0xff] }
 0xc6d   :  { %v10147_v52 = vpack.c.bf16 %v2794_v49, %v2793_v44  ;;  %v2796_v55 = vld [vmem:[#allocation6 + $0x18] sm:$0xff] }
 0xc6e   :  { %v2175_v58 = vadd.f32 %v9788_v2, %v2172_v53  ;;  %v2795_v53 = vld [vmem:[#allocation6 + $0x10] sm:$0xff] }
 0xc70   :  { %8667 = vtanh.f32 %v2175_v58  ;;  %v10156_v58 = vpack.c.bf16 %v2796_v55, %v2795_v53 }
 0xc7a   :  { %v9915_v62 = vpop.eup %8667 }
 0xc7b   :  { %6544 = vmatmul.mubr.msk.f32.vlgmr.msra.gmra.mrb[24].mxu1 %vm196_vm9, %v9915_v62 }
 0xc7c   :  { %7535 = vmatpush1.bf16.msra.mxu1 %v9610_v42  ;;  %5573 = vmatprep.mubr.msk.f32.mxu1 %vm1640_vm1, %v2179_v13  ;;  %v2797_v13 = vld [vmem:[#allocation6 + $0x20] sm:$0xff] }
 0xc7d   :  { %7536 = vmatprep.subr.bf16.mxu1 %v8880_v0 }
 0xc80   :  { %7538 = vmatpush1.bf16.msra.mxu1 %v9613_v45 }
 0xc81   :  { %7539 = vmatprep.subr.bf16.mxu1 %v8880_v0 }
 0xc84   :  { %7541 = vmatpush1.bf16.msra.mxu1 %v9619_v54 }
 0xc85   :  { %7542 = vmatprep.subr.bf16.mxu1 %v8880_v0 }
 0xc88   :  { %7544 = vmatpush1.bf16.msra.mxu1 %v9627_v60 }
 0xc89   :  { %7545 = vmatprep.subr.bf16.mxu1 %v8880_v0 }
 0xc8c   :  { %7547 = vmatpush1.bf16.msra.mxu1 %v9635_v63 }
 0xc8d   :  { %7548 = vmatprep.subr.bf16.mxu1 %v8880_v0 }
 0xc90   :  { %7550 = vmatpush1.bf16.msra.mxu1 %v9643_v4 }
 0xc91   :  { %7551 = vmatprep.subr.bf16.mxu1 %v8880_v0 }
 0xc94   :  { %7553 = vmatpush1.bf16.msra.mxu1 %v9651_v38 }
 0xc95   :  { %7554 = vmatprep.subr.bf16.mxu1 %v8880_v0 }
 0xc98   :  { %7556 = vmatpush1.bf16.msra.mxu1 %v9659_v22 }
 0xc99   :  { %7557 = vmatprep.subr.bf16.mxu1 %v8880_v0 }
 0xc9c   :  { %7559 = vmatpush1.bf16.msra.mxu1 %v9667_v21 }
 0xc9d   :  { %7560 = vmatprep.subr.bf16.mxu1 %v8880_v0 }
 0xca0   :  { %7562 = vmatpush1.bf16.msra.mxu1 %v9678_v26 }
 0xca1   :  { %7563 = vmatprep.subr.bf16.mxu1 %v8880_v0 }
 0xca4   :  { %7565 = vmatpush1.bf16.msra.mxu1 %v9684_v36 }
 0xca5   :  { %7566 = vmatprep.subr.bf16.mxu1 %v8880_v0 }
 0xca8   :  { %7568 = vmatpush1.bf16.msra.mxu1 %v9690_v46 }
 0xca9   :  { %2305 = vmatprep.subr.mxu1 %v8882_v1 }
 0xcac   :  { %2306 = vmatpush1.msra.mxu1 %v9698_v48 }
 0xcad   :  { %2322 = vmatmul.mubr.f32.vlgmr.msra.gmra.mrb[26].mxu1 %v2181_v25  ;;  %7623 = vmatprep.subr.bf16.mxu1 %v8880_v0  ;;  %v2798_v25 = vld [vmem:[#allocation6 + $0x28] sm:$0xff] }
 0xcae   :  { %7625 = vmatpush3.bf16.msra.mxu1 %v9616_v51  ;;  %6601 = vmatprep.mubr.msk.f32.mxu1 %vm8881_vm0, %v8882_v1 }
 0xcaf   :  { %7626 = vmatprep.subr.bf16.mxu1 %v8880_v0 }
 0xcb2   :  { %7628 = vmatpush3.bf16.msra.mxu1 %v9622_v56 }
 0xcb3   :  { %7629 = vmatprep.subr.bf16.mxu1 %v8880_v0 }
 0xcb6   :  { %7631 = vmatpush3.bf16.msra.mxu1 %v9630_v6 }
 0xcb7   :  { %7632 = vmatprep.subr.bf16.mxu1 %v8880_v0 }
 0xcba   :  { %7634 = vmatpush3.bf16.msra.mxu1 %v9638_v11 }
 0xcbb   :  { %7635 = vmatprep.subr.bf16.mxu1 %v8880_v0 }
 0xcbe   :  { %7637 = vmatpush3.bf16.msra.mxu1 %v9646_v15 }
 0xcbf   :  { %7638 = vmatprep.subr.bf16.mxu1 %v8880_v0 }
 0xcc2   :  { %7640 = vmatpush3.bf16.msra.mxu1 %v9654_v39 }
 0xcc3   :  { %6599 = vmatprep.subr.mxu1 %v8882_v1 }
 0xcc6   :  { %6600 = vmatpush3.msk.msra.mxu1 %vm200_vm4, %v9664_v20 }
 0xcc7   :  { %7641 = vmatprep.subr.bf16.mxu1 %v8880_v0 }
 0xd4e   :  { %v2251_v17 = vpop.f32.mrb[24].mxu1 }
 0xd4f   :  { %v6545_v19 = vpop.f32.mrb[25].mxu1 }
 0xd50   :  { %v2799_v19 = vld [vmem:[#allocation6 + $0x30] sm:$0xff] }
 0xd80   :  { %v2323_v59 = vpop.f32.mrb[26].mxu1 }
 0xd81   :  { %v2324_v47 = vadd.f32 %v2323_v59, %v2251_v17  ;;  %v2325_v29 = vpop.f32.mrb[27].mxu1  ;;  %v10161_v17 = vpack.c.bf16 %v2798_v25, %v2797_v13  ;;  %v2800_v59 = vld [vmem:[#allocation6 + $0x38] sm:$0xff] }
 0xd82   :  { %v2801_v29 = vld [vmem:[#allocation6 + $0x40] sm:$0xff] }
 0xd83   :  { %v2327_v57 = vadd.f32 %v9788_v2, %v2324_v47  ;;  %v10165_v47 = vpack.c.bf16 %v2800_v59, %v2799_v19 }
 0xd85   :  { %8669 = vtanh.f32 %v2327_v57  ;;  %v2802_v57 = vld [vmem:[#allocation6 + $0x48] sm:$0xff] }
 0xd8f   :  { %v9966_v61 = vpop.eup %8669 }
 0xd90   :  { %6573 = vmatmul.mubr.msk.f32.vlgmr.msra.gmra.mrb[24].mxu0 %vm196_vm9, %v9966_v61  ;;  %v10070_v23 = vsel %vm1514_vm15, %v9966_v61, %v9915_v62  ;;  %v10226_v53 = vsel %vm1514_vm15, %v9915_v62, %v9966_v61  ;;  %v10256_v61 = vld [vmem:[%s11138_s9] ss:$0 sm:$0xff] }
 0xd91   :  { %7589 = vmatpush1.bf16.msra.mxu0 %v9610_v42  ;;  %5576 = vmatprep.mubr.msk.f32.mxu0 %vm1640_vm1, %v2331_v7  ;;  %v10169_v7 = vpack.c.bf16 %v2802_v57, %v2801_v29 }
 0xd92   :  { %7590 = vmatprep.subr.bf16.mxu0 %v8880_v0 }
 0xd95   :  { %7592 = vmatpush1.bf16.msra.mxu0 %v9613_v45 }
 0xd96   :  { %7593 = vmatprep.subr.bf16.mxu0 %v8880_v0 }
 0xd99   :  { %7595 = vmatpush1.bf16.msra.mxu0 %v9619_v54 }
 0xd9a   :  { %7596 = vmatprep.subr.bf16.mxu0 %v8880_v0 }
 0xd9d   :  { %7598 = vmatpush1.bf16.msra.mxu0 %v9627_v60 }
 0xd9e   :  { %7599 = vmatprep.subr.bf16.mxu0 %v8880_v0 }
 0xda1   :  { %7601 = vmatpush1.bf16.msra.mxu0 %v9635_v63 }
 0xda2   :  { %7602 = vmatprep.subr.bf16.mxu0 %v8880_v0 }
 0xda5   :  { %7604 = vmatpush1.bf16.msra.mxu0 %v9643_v4 }
 0xda6   :  { %7605 = vmatprep.subr.bf16.mxu0 %v8880_v0 }
 0xda9   :  { %7607 = vmatpush1.bf16.msra.mxu0 %v9651_v38 }
 0xdaa   :  { %7608 = vmatprep.subr.bf16.mxu0 %v8880_v0 }
 0xdad   :  { %7610 = vmatpush1.bf16.msra.mxu0 %v9659_v22 }
 0xdae   :  { %7611 = vmatprep.subr.bf16.mxu0 %v8880_v0 }
 0xdb1   :  { %7613 = vmatpush1.bf16.msra.mxu0 %v9667_v21 }
 0xdb2   :  { %7614 = vmatprep.subr.bf16.mxu0 %v8880_v0 }
 0xdb5   :  { %7616 = vmatpush1.bf16.msra.mxu0 %v9678_v26 }
 0xdb6   :  { %7617 = vmatprep.subr.bf16.mxu0 %v8880_v0 }
 0xdb9   :  { %7619 = vmatpush1.bf16.msra.mxu0 %v9684_v36 }
 0xdba   :  { %7620 = vmatprep.subr.bf16.mxu0 %v8880_v0 }
 0xdbd   :  { %7622 = vmatpush1.bf16.msra.mxu0 %v9690_v46 }
 0xdbe   :  { %2457 = vmatprep.subr.mxu0 %v8882_v1 }
 0xdc1   :  { %2458 = vmatpush1.msra.mxu0 %v9698_v48 }
 0xdc2   :  { %2474 = vmatmul.mubr.f32.vlgmr.msra.gmra.mrb[26].mxu0 %v2333_v9  ;;  %7677 = vmatprep.subr.bf16.mxu0 %v8880_v0  ;;  %v2803_v9 = vld [vmem:[#allocation6 + $0x50] sm:$0xff] }
 0xdc3   :  { %7679 = vmatpush3.bf16.msra.mxu0 %v9616_v51  ;;  %6630 = vmatprep.mubr.msk.f32.mxu0 %vm8881_vm0, %v8882_v1 }
 0xdc4   :  { %7680 = vmatprep.subr.bf16.mxu0 %v8880_v0 }
 0xdc7   :  { %7682 = vmatpush3.bf16.msra.mxu0 %v9622_v56 }
 0xdc8   :  { %7683 = vmatprep.subr.bf16.mxu0 %v8880_v0 }
 0xdcb   :  { %7685 = vmatpush3.bf16.msra.mxu0 %v9630_v6 }
 0xdcc   :  { %7686 = vmatprep.subr.bf16.mxu0 %v8880_v0 }
 0xdcf   :  { %7688 = vmatpush3.bf16.msra.mxu0 %v9638_v11 }
 0xdd0   :  { %7689 = vmatprep.subr.bf16.mxu0 %v8880_v0 }
 0xdd3   :  { %7691 = vmatpush3.bf16.msra.mxu0 %v9646_v15 }
 0xdd4   :  { %7692 = vmatprep.subr.bf16.mxu0 %v8880_v0 }
 0xdd7   :  { %7694 = vmatpush3.bf16.msra.mxu0 %v9654_v39  ;;  %v2485_v39 = vsel %vm196_vm9, %v9590_v43, %v2483_v12 }
 0xdd8   :  { %6628 = vmatprep.subr.mxu0 %v8882_v1 }
 0xddb   :  { %6629 = vmatpush3.msk.msra.mxu0 %vm200_vm4, %v9664_v20 }
 0xddc   :  { %7695 = vmatprep.subr.bf16.mxu0 %v8880_v0 }
 0xe63   :  { %v2403_v51 = vpop.f32.mrb[24].mxu0 }
 0xe64   :  { %v6574_v56 = vpop.f32.mrb[25].mxu0 }
 0xe95   :  { %v2475_v6 = vpop.f32.mrb[26].mxu0 }
 0xe96   :  { %v2476_v24 = vadd.f32 %v2475_v6, %v2403_v51  ;;  %v2477_v11 = vpop.f32.mrb[27].mxu0  ;;  %v2804_v51 = vld [vmem:[#allocation6 + $0x58] sm:$0xff]  ;;  %v2805_v6 = vld [vmem:[#allocation6 + $0x60] sm:$0xff] }
 0xe97   :  { %v10173_v56 = vpack.c.bf16 %v2804_v51, %v2803_v9 }
 0xe98   :  { %v2479_v10 = vadd.f32 %v9788_v2, %v2476_v24  ;;  %v2806_v24 = vld [vmem:[#allocation6 + $0x68] sm:$0xff] }
 0xe9a   :  { %8671 = vtanh.f32 %v2479_v10  ;;  %v10177_v10 = vpack.c.bf16 %v2806_v24, %v2805_v6 }
 0xea4   :  { %v10017_v15 = vpop.eup %8671 }
 0xea5   :  { %6602 = vmatmul.mubr.msk.f32.vlgmr.msra.gmra.mrb[28].mxu1 %vm196_vm9, %v10017_v15 }
 0xea6   :  { %7643 = vmatpush1.bf16.msra.mxu1 %v9610_v42  ;;  %5579 = vmatprep.mubr.msk.f32.mxu1 %vm1640_vm1, %v2483_v12 }
 0xea7   :  { %7644 = vmatprep.subr.bf16.mxu1 %v8880_v0 }
 0xeaa   :  { %7646 = vmatpush1.bf16.msra.mxu1 %v9613_v45 }
 0xeab   :  { %7647 = vmatprep.subr.bf16.mxu1 %v8880_v0 }
 0xeae   :  { %7649 = vmatpush1.bf16.msra.mxu1 %v9619_v54 }
 0xeaf   :  { %7650 = vmatprep.subr.bf16.mxu1 %v8880_v0 }
 0xeb2   :  { %7652 = vmatpush1.bf16.msra.mxu1 %v9627_v60 }
 0xeb3   :  { %7653 = vmatprep.subr.bf16.mxu1 %v8880_v0 }
 0xeb6   :  { %7655 = vmatpush1.bf16.msra.mxu1 %v9635_v63 }
 0xeb7   :  { %7656 = vmatprep.subr.bf16.mxu1 %v8880_v0 }
 0xeba   :  { %7658 = vmatpush1.bf16.msra.mxu1 %v9643_v4 }
 0xebb   :  { %7659 = vmatprep.subr.bf16.mxu1 %v8880_v0 }
 0xebe   :  { %7661 = vmatpush1.bf16.msra.mxu1 %v9651_v38 }
 0xebf   :  { %7662 = vmatprep.subr.bf16.mxu1 %v8880_v0 }
 0xec2   :  { %7664 = vmatpush1.bf16.msra.mxu1 %v9659_v22 }
 0xec3   :  { %7665 = vmatprep.subr.bf16.mxu1 %v8880_v0 }
 0xec6   :  { %7667 = vmatpush1.bf16.msra.mxu1 %v9667_v21 }
 0xec7   :  { %7668 = vmatprep.subr.bf16.mxu1 %v8880_v0 }
 0xeca   :  { %7670 = vmatpush1.bf16.msra.mxu1 %v9678_v26 }
 0xecb   :  { %7671 = vmatprep.subr.bf16.mxu1 %v8880_v0 }
 0xece   :  { %7673 = vmatpush1.bf16.msra.mxu1 %v9684_v36 }
 0xecf   :  { %7674 = vmatprep.subr.bf16.mxu1 %v8880_v0 }
 0xed2   :  { %7676 = vmatpush1.bf16.msra.mxu1 %v9690_v46 }
 0xed3   :  { %2609 = vmatprep.subr.mxu1 %v8882_v1 }
 0xed6   :  { %2610 = vmatpush1.msra.mxu1 %v9698_v48 }
 0xed7   :  { %2626 = vmatmul.mubr.f32.vlgmr.msra.gmra.mrb[30].mxu1 %v2485_v39  ;;  %7731 = vmatprep.subr.bf16.mxu1 %v8880_v0  ;;  %v2807_v39 = vld [vmem:[#allocation6 + $0x70] sm:$0xff] }
 0xed8   :  { %6659 = vmatprep.mubr.msk.f32.mxu1 %vm8881_vm0, %v8882_v1 }
 0xf78   :  { %v2555_v20 = vpop.f32.mrb[28].mxu1 }
 0xf79   :  { %v6603_v14 = vpop.f32.mrb[29].mxu1 }
 0xfaa   :  { %v2627_v3 = vpop.f32.mrb[30].mxu1 }
 0xfab   :  { %v2628_v5 = vadd.f32 %v2627_v3, %v2555_v20  ;;  %v2629_v27 = vpop.f32.mrb[31].mxu1  ;;  %v2808_v20 = vld [vmem:[#allocation6 + $0x78] sm:$0xff]  ;;  %v2809_v3 = vld [vmem:[#allocation6 + $0x80] sm:$0xff] }
 0xfac   :  { %v10181_v14 = vpack.c.bf16 %v2808_v20, %v2807_v39 }
 0xfad   :  { %v2631_v32 = vadd.f32 %v9788_v2, %v2628_v5  ;;  %v2810_v5 = vld [vmem:[#allocation6 + $0x88] sm:$0xff] }
 0xfae   :  { %v10185_v27 = vpack.c.bf16 %v2810_v5, %v2809_v3 }
 0xfaf   :  { %8673 = vtanh.f32 %v2631_v32  ;;  %v2811_v32 = vld [vmem:[#allocation6 + $0x90] sm:$0xff] }
 0xfb9   :  { %v10053_v31 = vpop.eup %8673 }
 0xfba   :  { %6631 = vmatmul.mubr.msk.f32.vlgmr.msra.gmra.mrb[28].mxu0 %vm196_vm9, %v10053_v31  ;;  %v10060_v43 = vsel %vm1514_vm15, %v10053_v31, %v9813_v35 }
 0xfbb   :  { %7697 = vmatpush1.bf16.msra.mxu0 %v9610_v42  ;;  %2991 = vrot.lane.b32.xlu0 %v10060_v43, %s8884_s3  ;;  %v10079_v42 = vsel %vm1514_vm15, %v9864_v34, %v10017_v15 }
 0xfbc   :  { %5582 = vmatprep.mubr.msk.f32.mxu0 %vm1640_vm1, %v2635_v33  ;;  %7698 = vmatprep.subr.bf16.mxu0 %v8880_v0 }
 0xfbf   :  { %7700 = vmatpush1.bf16.msra.mxu0 %v9613_v45  ;;  %3295 = vrot.lane.b32.xlu0 %v10070_v23, %s8884_s3  ;;  %v2637_v45 = vsel %vm196_vm9, %v9713_v30, %v2635_v33  ;;  %v2812_v33 = vld [vmem:[#allocation6 + $0x98] sm:$0xff] }
 0xfc0   :  { %7701 = vmatprep.subr.bf16.mxu0 %v8880_v0 }
 0xfc3   :  { %7703 = vmatpush1.bf16.msra.mxu0 %v9619_v54  ;;  %3599 = vrot.lane.b32.xlu0 %v10079_v42, %s8884_s3  ;;  %v2818_v54 = vld [vmem:[#allocation7] sm:$0xff] }
 0xfc4   :  { %7704 = vmatprep.subr.bf16.mxu0 %v8880_v0 }
 0xfc7   :  { %7706 = vmatpush1.bf16.msra.mxu0 %v9627_v60  ;;  %v2819_v60 = vld [vmem:[#allocation7 + $0x8] sm:$0xff] }
 0xfc8   :  { %7707 = vmatprep.subr.bf16.mxu0 %v8880_v0 }
 0xfcb   :  { %7709 = vmatpush1.bf16.msra.mxu0 %v9635_v63  ;;  %v2820_v63 = vld [vmem:[#allocation7 + $0x10] sm:$0xff] }
 0xfcc   :  { %7710 = vmatprep.subr.bf16.mxu0 %v8880_v0 }
 0xfcf   :  { %7712 = vmatpush1.bf16.msra.mxu0 %v9643_v4  ;;  %v10109_v4 = vpack.c.bf16 %v2819_v60, %v2818_v54  ;;  %v2813_v54 = vld [vmem:[#allocation6 + $0xa0] sm:$0xff]  ;;  %v2814_v60 = vld [vmem:[#allocation6 + $0xa8] sm:$0xff] }
 0xfd0   :  { %7713 = vmatprep.subr.bf16.mxu0 %v8880_v0 }
 0xfd1   :  { %7733 = vmatpush3.bf16.msra.mxu1 %v10109_v4 }
 0xfd2   :  { %7734 = vmatprep.subr.bf16.mxu1 %v8880_v0 }
 0xfd3   :  { %7715 = vmatpush1.bf16.msra.mxu0 %v9651_v38  ;;  %v2821_v38 = vld [vmem:[#allocation7 + $0x18] sm:$0xff] }
 0xfd4   :  { %7716 = vmatprep.subr.bf16.mxu0 %v8880_v0 }
 0xfd7   :  { %7718 = vmatpush1.bf16.msra.mxu0 %v9659_v22  ;;  %v10112_v22 = vpack.c.bf16 %v2821_v38, %v2820_v63  ;;  %v10193_v63 = vpack.c.bf16 %v2814_v60, %v2813_v54  ;;  %v2815_v38 = vld [vmem:[#allocation6 + $0xb0] sm:$0xff] }
 0xfd8   :  { %7719 = vmatprep.subr.bf16.mxu0 %v8880_v0 }
 0xfd9   :  { %7736 = vmatpush3.bf16.msra.mxu1 %v10112_v22 }
 0xfda   :  { %7737 = vmatprep.subr.bf16.mxu1 %v8880_v0 }
 0xfdb   :  { %7721 = vmatpush1.bf16.msra.mxu0 %v9667_v21  ;;  %v2822_v21 = vld [vmem:[#allocation7 + $0x20] sm:$0xff] }
 0xfdc   :  { %7722 = vmatprep.subr.bf16.mxu0 %v8880_v0 }
 0xfdf   :  { %7724 = vmatpush1.bf16.msra.mxu0 %v9678_v26  ;;  %v2823_v26 = vld [vmem:[#allocation7 + $0x28] sm:$0xff] }
 0xfe0   :  { %7725 = vmatprep.subr.bf16.mxu0 %v8880_v0 }
 0xfe3   :  { %7727 = vmatpush1.bf16.msra.mxu0 %v9684_v36  ;;  %v10118_v36 = vpack.c.bf16 %v2823_v26, %v2822_v21  ;;  %v2816_v21 = vld [vmem:[#allocation6 + $0xb8] sm:$0xff] }
 0xfe4   :  { %7728 = vmatprep.subr.bf16.mxu0 %v8880_v0  ;;  %v10197_v26 = vpack.c.bf16 %v2816_v21, %v2815_v38 }
 0xfe5   :  { %7739 = vmatpush3.bf16.msra.mxu1 %v10118_v36 }
 0xfe6   :  { %7740 = vmatprep.subr.bf16.mxu1 %v8880_v0 }
 0xfe7   :  { %7730 = vmatpush1.bf16.msra.mxu0 %v9690_v46  ;;  %v2824_v46 = vld [vmem:[#allocation7 + $0x30] sm:$0xff] }
 0xfe8   :  { %2761 = vmatprep.subr.mxu0 %v8882_v1 }
 0xfeb   :  { %2762 = vmatpush1.msra.mxu0 %v9698_v48  ;;  %v2825_v48 = vld [vmem:[#allocation7 + $0x38] sm:$0xff] }
 0xfec   :  { %2778 = vmatmul.mubr.f32.vlgmr.msra.gmra.mrb[30].mxu0 %v2637_v45  ;;  %7785 = vmatprep.subr.bf16.mxu0 %v8880_v0  ;;  %v10124_v30 = vpack.c.bf16 %v2825_v48, %v2824_v46  ;;  %v10189_v45 = vpack.c.bf16 %v2812_v33, %v2811_v32 }
 0xfed   :  { %6688 = vmatprep.mubr.msk.f32.mxu0 %vm8881_vm0, %v8882_v1  ;;  %7787 = vmatpush3.bf16.msra.mxu0 %v10109_v4 }
 0xfee   :  { %7788 = vmatprep.subr.bf16.mxu0 %v8880_v0  ;;  %7742 = vmatpush3.bf16.msra.mxu1 %v10124_v30 }
 0xfef   :  { %7743 = vmatprep.subr.bf16.mxu1 %v8880_v0 }
 0xff1   :  { %7790 = vmatpush3.bf16.msra.mxu0 %v10112_v22 }
 0xff2   :  { %7791 = vmatprep.subr.bf16.mxu0 %v8880_v0  ;;  %7745 = vmatpush3.bf16.msra.mxu1 %v10130_v40 }
 0xff3   :  { %7746 = vmatprep.subr.bf16.mxu1 %v8880_v0 }
 0xff5   :  { %7793 = vmatpush3.bf16.msra.mxu0 %v10118_v36 }
 0xff6   :  { %7794 = vmatprep.subr.bf16.mxu0 %v8880_v0  ;;  %7748 = vmatpush3.bf16.msra.mxu1 %v10136_v37 }
 0xff7   :  { %6657 = vmatprep.subr.mxu1 %v8882_v1 }
 0xff9   :  { %7796 = vmatpush3.bf16.msra.mxu0 %v10124_v30 }
 0xffa   :  { %7797 = vmatprep.subr.bf16.mxu0 %v8880_v0  ;;  %6658 = vmatpush3.msk.msra.mxu1 %vm200_vm4, %v10144_v50 }
 0xffb   :  { %6660 = vmatmul.mubr.f32.vlgmr.msra.gmra.mrb[32].mxu1 %v8882_v1  ;;  %7749 = vmatprep.subr.bf16.mxu1 %v8880_v0 }
 0xffc   :  { %7751 = vmatpush1.bf16.msra.mxu1 %v10147_v52 }
 0xffd   :  { %7799 = vmatpush3.bf16.msra.mxu0 %v10130_v40  ;;  %7752 = vmatprep.subr.bf16.mxu1 %v8880_v0 }
 0xffe   :  { %7800 = vmatprep.subr.bf16.mxu0 %v8880_v0 }
0x1000   :  { %7754 = vmatpush1.bf16.msra.mxu1 %v10156_v58 }
0x1001   :  { %7802 = vmatpush3.bf16.msra.mxu0 %v10136_v37  ;;  %7755 = vmatprep.subr.bf16.mxu1 %v8880_v0 }
0x1002   :  { %6686 = vmatprep.subr.mxu0 %v8882_v1 }
0x1004   :  { %7757 = vmatpush1.bf16.msra.mxu1 %v10161_v17 }
0x1005   :  { %6687 = vmatpush3.msk.msra.mxu0 %vm200_vm4, %v10144_v50  ;;  %7758 = vmatprep.subr.bf16.mxu1 %v8880_v0 }
0x1006   :  { %7803 = vmatprep.subr.bf16.mxu0 %v8880_v0 }
0x1008   :  { %7760 = vmatpush1.bf16.msra.mxu1 %v10165_v47 }
0x1009   :  { %7761 = vmatprep.subr.bf16.mxu1 %v8880_v0 }
0x100c   :  { %7763 = vmatpush1.bf16.msra.mxu1 %v10169_v7 }
0x100d   :  { %7764 = vmatprep.subr.bf16.mxu1 %v8880_v0 }
0x1010   :  { %7766 = vmatpush1.bf16.msra.mxu1 %v10173_v56 }
0x1011   :  { %7767 = vmatprep.subr.bf16.mxu1 %v8880_v0 }
0x1014   :  { %7769 = vmatpush1.bf16.msra.mxu1 %v10177_v10 }
0x1015   :  { %7770 = vmatprep.subr.bf16.mxu1 %v8880_v0 }
0x1018   :  { %7772 = vmatpush1.bf16.msra.mxu1 %v10181_v14 }
0x1019   :  { %7773 = vmatprep.subr.bf16.mxu1 %v8880_v0 }
0x101c   :  { %7775 = vmatpush1.bf16.msra.mxu1 %v10185_v27 }
0x101d   :  { %7776 = vmatprep.subr.bf16.mxu1 %v8880_v0 }
0x1020   :  { %7778 = vmatpush1.bf16.msra.mxu1 %v10189_v45 }
0x1021   :  { %7779 = vmatprep.subr.bf16.mxu1 %v8880_v0 }
0x1024   :  { %7781 = vmatpush1.bf16.msra.mxu1 %v10193_v63 }
0x1025   :  { %7782 = vmatprep.subr.bf16.mxu1 %v8880_v0 }
0x1028   :  { %7784 = vmatpush1.bf16.msra.mxu1 %v10197_v26 }
0x1029   :  { %2960 = vmatprep.subr.mxu1 %v8882_v1 }
0x102c   :  { %2961 = vmatpush1.msra.mxu1 %v10203_v41 }
0x102d   :  { %7839 = vmatprep.subr.bf16.mxu1 %v8880_v0  ;;  %v2992_v59 = vpop.permute.xlu0 %2991 }
0x1031   :  { %v3296_v38 = vpop.permute.xlu0 %3295 }
0x1032   :  { %v3298_v21 = vsel %vm196_vm9, %v10226_v53, %v3296_v38 }
0x108d   :  { %v2707_v11 = vpop.f32.mrb[28].mxu0 }
0x108e   :  { %v6632_v12 = vpop.f32.mrb[29].mxu0 }
0x10bf   :  { %v2779_v46 = vpop.f32.mrb[30].mxu0 }
0x10c0   :  { %v2780_v48 = vadd.f32 %v2779_v46, %v2707_v11  ;;  %v2781_v16 = vpop.f32.mrb[31].mxu0 }
0x10c2   :  { %v2783_v18 = vadd.f32 %v9788_v2, %v2780_v48  ;;  %v10219_v2 = vsel %vm1514_vm15, %v10017_v15, %v9864_v34 }
0x10c4   :  { %8675 = vtanh.f32 %v2783_v18 }
0x10ce   :  { %v8676_v28 = vpop.eup %8675 }
0x10cf   :  { %v10209_v44 = vsel %vm1514_vm15, %v8676_v28, %v9791_v8  ;;  %v2785_v49 = vsel %vm1514_vm15, %v9791_v8, %v8676_v28  ;;  %v2786_v8 = vsel %vm1514_vm15, %v9813_v35, %v10053_v31  ;;  %v2906_v35 = vpop.f32.mrb[32].mxu1 }
0x10d0   :  { %2833 = vrot.lane.b32.xlu1 %v10209_v44, %s8884_s3  ;;  %3903 = vrot.lane.b32.xlu0 %v2785_v49, %s8884_s3  ;;  %v6661_v62 = vpop.f32.mrb[33].mxu1  ;;  %v2994_v29 = vsel %vm196_vm9, %v2786_v8, %v2992_v59 }
0x10d4   :  { %3143 = vrot.lane.b32.xlu1 %v10219_v2, %s8884_s3 }
0x10d8   :  { %3447 = vrot.lane.b32.xlu1 %v10226_v53, %s8884_s3 }
0x10dc   :  { %3751 = vrot.lane.b32.xlu1 %v2786_v8, %s8884_s3 }
0x1142   :  { %v2834_v55 = vpop.permute.xlu1 %2833 }
0x1143   :  { %v2836_v34 = vsel %vm196_vm9, %v2785_v49, %v2834_v55  ;;  %5584 = vmatprep.mubr.msk.f32.mxu1 %vm1640_vm1, %v2834_v55 }
0x1144   :  { %2977 = vmatmul.mubr.f32.vlgmr.msra.gmra.mrb[34].mxu1 %v2836_v34 }
0x1145   :  { %7841 = vmatpush3.bf16.msra.mxu1 %v10109_v4  ;;  %6717 = vmatprep.mubr.msk.f32.mxu1 %vm8881_vm0, %v8882_v1 }
0x1146   :  { %7842 = vmatprep.subr.bf16.mxu1 %v8880_v0  ;;  %v3144_v39 = vpop.permute.xlu1 %3143 }
0x1147   :  { %v3146_v20 = vsel %vm196_vm9, %v10079_v42, %v3144_v39 }
0x1149   :  { %7844 = vmatpush3.bf16.msra.mxu1 %v10112_v22 }
0x114a   :  { %7845 = vmatprep.subr.bf16.mxu1 %v8880_v0  ;;  %v3448_v8 = vpop.permute.xlu1 %3447 }
0x114b   :  { %v3450_v55 = vsel %vm196_vm9, %v10070_v23, %v3448_v8 }
0x114d   :  { %7847 = vmatpush3.bf16.msra.mxu1 %v10118_v36 }
0x114e   :  { %7848 = vmatprep.subr.bf16.mxu1 %v8880_v0 }
0x1151   :  { %7850 = vmatpush3.bf16.msra.mxu1 %v10124_v30 }
0x1152   :  { %7851 = vmatprep.subr.bf16.mxu1 %v8880_v0 }
0x1155   :  { %7853 = vmatpush3.bf16.msra.mxu1 %v10130_v40 }
0x1156   :  { %7854 = vmatprep.subr.bf16.mxu1 %v8880_v0 }
0x1159   :  { %7856 = vmatpush3.bf16.msra.mxu1 %v10136_v37 }
0x115a   :  { %6715 = vmatprep.subr.mxu1 %v8882_v1 }
0x115d   :  { %6716 = vmatpush3.msk.msra.mxu1 %vm200_vm4, %v10144_v50 }
0x115e   :  { %7857 = vmatprep.subr.bf16.mxu1 %v8880_v0 }
0x1217   :  { %v2978_v15 = vpop.f32.mrb[34].mxu1 }
0x1218   :  { %v2979_v31 = vadd.f32 %v2978_v15, %v2906_v35  ;;  %v2980_v13 = vpop.f32.mrb[35].mxu1 }
0x121a   :  { %v2988_v25 = vadd.f32 %v10256_v61, %v2979_v31 }
0x121c   :  { %8677 = vtanh.f32 %v2988_v25  ;;  %v3600_v25 = vpop.permute.xlu0 %3599 }
0x1226   :  { %v10259_v19 = vpop.eup %8677 }
0x1227   :  { %6689 = vmatmul.mubr.msk.f32.vlgmr.msra.gmra.mrb[32].mxu0 %vm196_vm9, %v10259_v19 }
0x1228   :  { %7805 = vmatpush1.bf16.msra.mxu0 %v10147_v52  ;;  %5588 = vmatprep.mubr.msk.f32.mxu0 %vm1640_vm1, %v2992_v59  ;;  %v3602_v59 = vsel %vm196_vm9, %v10219_v2, %v3600_v25 }
0x1229   :  { %7806 = vmatprep.subr.bf16.mxu0 %v8880_v0 }
0x122c   :  { %7808 = vmatpush1.bf16.msra.mxu0 %v10156_v58 }
0x122d   :  { %7809 = vmatprep.subr.bf16.mxu0 %v8880_v0 }
0x1230   :  { %7811 = vmatpush1.bf16.msra.mxu0 %v10161_v17 }
0x1231   :  { %7812 = vmatprep.subr.bf16.mxu0 %v8880_v0 }
0x1234   :  { %7814 = vmatpush1.bf16.msra.mxu0 %v10165_v47 }
0x1235   :  { %7815 = vmatprep.subr.bf16.mxu0 %v8880_v0 }
0x1238   :  { %7817 = vmatpush1.bf16.msra.mxu0 %v10169_v7 }
0x1239   :  { %7818 = vmatprep.subr.bf16.mxu0 %v8880_v0 }
0x123c   :  { %7820 = vmatpush1.bf16.msra.mxu0 %v10173_v56 }
0x123d   :  { %7821 = vmatprep.subr.bf16.mxu0 %v8880_v0 }
0x1240   :  { %7823 = vmatpush1.bf16.msra.mxu0 %v10177_v10 }
0x1241   :  { %7824 = vmatprep.subr.bf16.mxu0 %v8880_v0 }
0x1244   :  { %7826 = vmatpush1.bf16.msra.mxu0 %v10181_v14 }
0x1245   :  { %7827 = vmatprep.subr.bf16.mxu0 %v8880_v0 }
0x1248   :  { %7829 = vmatpush1.bf16.msra.mxu0 %v10185_v27 }
0x1249   :  { %7830 = vmatprep.subr.bf16.mxu0 %v8880_v0 }
0x124c   :  { %7832 = vmatpush1.bf16.msra.mxu0 %v10189_v45 }
0x124d   :  { %7833 = vmatprep.subr.bf16.mxu0 %v8880_v0 }
0x1250   :  { %7835 = vmatpush1.bf16.msra.mxu0 %v10193_v63 }
0x1251   :  { %7836 = vmatprep.subr.bf16.mxu0 %v8880_v0 }
0x1254   :  { %7838 = vmatpush1.bf16.msra.mxu0 %v10197_v26 }
0x1255   :  { %3118 = vmatprep.subr.mxu0 %v8882_v1 }
0x1258   :  { %3119 = vmatpush1.msra.mxu0 %v10203_v41 }
0x1259   :  { %3135 = vmatmul.mubr.f32.vlgmr.msra.gmra.mrb[34].mxu0 %v2994_v29  ;;  %7893 = vmatprep.subr.bf16.mxu0 %v8880_v0 }
0x125a   :  { %7895 = vmatpush3.bf16.msra.mxu0 %v10109_v4  ;;  %6746 = vmatprep.mubr.msk.f32.mxu0 %vm8881_vm0, %v8882_v1 }
0x125b   :  { %7896 = vmatprep.subr.bf16.mxu0 %v8880_v0 }
0x125e   :  { %7898 = vmatpush3.bf16.msra.mxu0 %v10112_v22 }
0x125f   :  { %7899 = vmatprep.subr.bf16.mxu0 %v8880_v0 }
0x1262   :  { %7901 = vmatpush3.bf16.msra.mxu0 %v10118_v36 }
0x1263   :  { %7902 = vmatprep.subr.bf16.mxu0 %v8880_v0 }
0x1266   :  { %7904 = vmatpush3.bf16.msra.mxu0 %v10124_v30 }
0x1267   :  { %7905 = vmatprep.subr.bf16.mxu0 %v8880_v0 }
0x126a   :  { %7907 = vmatpush3.bf16.msra.mxu0 %v10130_v40 }
0x126b   :  { %7908 = vmatprep.subr.bf16.mxu0 %v8880_v0 }
0x126e   :  { %7910 = vmatpush3.bf16.msra.mxu0 %v10136_v37 }
0x126f   :  { %6744 = vmatprep.subr.mxu0 %v8882_v1 }
0x1272   :  { %6745 = vmatpush3.msk.msra.mxu0 %vm200_vm4, %v10144_v50 }
0x1273   :  { %7911 = vmatprep.subr.bf16.mxu0 %v8880_v0 }
0x12fa   :  { %v3064_v57 = vpop.f32.mrb[32].mxu0 }
0x12fb   :  { %v6690_v9 = vpop.f32.mrb[33].mxu0 }
0x132c   :  { %v3136_v51 = vpop.f32.mrb[34].mxu0 }
0x132d   :  { %v3137_v6 = vadd.f32 %v3136_v51, %v3064_v57  ;;  %v3138_v24 = vpop.f32.mrb[35].mxu0  ;;  %v3752_v57 = vpop.permute.xlu1 %3751 }
0x132f   :  { %v3140_v11 = vadd.f32 %v10256_v61, %v3137_v6 }
0x1331   :  { %8679 = vtanh.f32 %v3140_v11 }
0x133b   :  { %v10309_v12 = vpop.eup %8679 }
0x133c   :  { %6718 = vmatmul.mubr.msk.f32.vlgmr.msra.gmra.mrb[36].mxu1 %vm196_vm9, %v10309_v12 }
0x133d   :  { %7859 = vmatpush1.bf16.msra.mxu1 %v10147_v52  ;;  %5591 = vmatprep.mubr.msk.f32.mxu1 %vm1640_vm1, %v3144_v39 }
0x133e   :  { %7860 = vmatprep.subr.bf16.mxu1 %v8880_v0 }
0x1341   :  { %7862 = vmatpush1.bf16.msra.mxu1 %v10156_v58 }
0x1342   :  { %7863 = vmatprep.subr.bf16.mxu1 %v8880_v0 }
0x1345   :  { %7865 = vmatpush1.bf16.msra.mxu1 %v10161_v17 }
0x1346   :  { %7866 = vmatprep.subr.bf16.mxu1 %v8880_v0 }
0x1349   :  { %7868 = vmatpush1.bf16.msra.mxu1 %v10165_v47 }
0x134a   :  { %7869 = vmatprep.subr.bf16.mxu1 %v8880_v0 }
0x134d   :  { %7871 = vmatpush1.bf16.msra.mxu1 %v10169_v7 }
0x134e   :  { %7872 = vmatprep.subr.bf16.mxu1 %v8880_v0 }
0x1351   :  { %7874 = vmatpush1.bf16.msra.mxu1 %v10173_v56 }
0x1352   :  { %7875 = vmatprep.subr.bf16.mxu1 %v8880_v0 }
0x1355   :  { %7877 = vmatpush1.bf16.msra.mxu1 %v10177_v10 }
0x1356   :  { %7878 = vmatprep.subr.bf16.mxu1 %v8880_v0 }
0x1359   :  { %7880 = vmatpush1.bf16.msra.mxu1 %v10181_v14 }
0x135a   :  { %7881 = vmatprep.subr.bf16.mxu1 %v8880_v0 }
0x135d   :  { %7883 = vmatpush1.bf16.msra.mxu1 %v10185_v27 }
0x135e   :  { %7884 = vmatprep.subr.bf16.mxu1 %v8880_v0 }
0x1361   :  { %7886 = vmatpush1.bf16.msra.mxu1 %v10189_v45 }
0x1362   :  { %7887 = vmatprep.subr.bf16.mxu1 %v8880_v0 }
0x1365   :  { %7889 = vmatpush1.bf16.msra.mxu1 %v10193_v63 }
0x1366   :  { %7890 = vmatprep.subr.bf16.mxu1 %v8880_v0 }
0x1369   :  { %7892 = vmatpush1.bf16.msra.mxu1 %v10197_v26 }
0x136a   :  { %3270 = vmatprep.subr.mxu1 %v8882_v1 }
0x136d   :  { %3271 = vmatpush1.msra.mxu1 %v10203_v41 }
0x136e   :  { %3287 = vmatmul.mubr.f32.vlgmr.msra.gmra.mrb[38].mxu1 %v3146_v20  ;;  %7947 = vmatprep.subr.bf16.mxu1 %v8880_v0  ;;  %v3904_v20 = vpop.permute.xlu0 %3903 }
0x136f   :  { %7949 = vmatpush3.bf16.msra.mxu1 %v10109_v4  ;;  %6775 = vmatprep.mubr.msk.f32.mxu1 %vm8881_vm0, %v8882_v1 }
0x1370   :  { %7950 = vmatprep.subr.bf16.mxu1 %v8880_v0 }
0x1373   :  { %7952 = vmatpush3.bf16.msra.mxu1 %v10112_v22 }
0x1374   :  { %7953 = vmatprep.subr.bf16.mxu1 %v8880_v0 }
0x1377   :  { %7955 = vmatpush3.bf16.msra.mxu1 %v10118_v36 }
0x1378   :  { %7956 = vmatprep.subr.bf16.mxu1 %v8880_v0 }
0x137b   :  { %7958 = vmatpush3.bf16.msra.mxu1 %v10124_v30 }
0x137c   :  { %7959 = vmatprep.subr.bf16.mxu1 %v8880_v0 }
0x137f   :  { %7961 = vmatpush3.bf16.msra.mxu1 %v10130_v40 }
0x1380   :  { %7962 = vmatprep.subr.bf16.mxu1 %v8880_v0 }
0x1383   :  { %7964 = vmatpush3.bf16.msra.mxu1 %v10136_v37 }
0x1384   :  { %6773 = vmatprep.subr.mxu1 %v8882_v1 }
0x1387   :  { %6774 = vmatpush3.msk.msra.mxu1 %vm200_vm4, %v10144_v50 }
0x1388   :  { %7965 = vmatprep.subr.bf16.mxu1 %v8880_v0 }
0x140f   :  { %v3216_v42 = vpop.f32.mrb[36].mxu1 }
0x1410   :  { %v6719_v3 = vpop.f32.mrb[37].mxu1 }
0x1411   :  { %v4095_v3 = vld [vmem:[#allocation10 + $0x40] sm:$0xff] }
0x1441   :  { %v3288_v5 = vpop.f32.mrb[38].mxu1 }
0x1442   :  { %v3289_v32 = vadd.f32 %v3288_v5, %v3216_v42  ;;  %v3290_v33 = vpop.f32.mrb[39].mxu1  ;;  %v4096_v5 = vld [vmem:[#allocation10 + $0x48] sm:$0xff] }
0x1443   :  { %v4097_v33 = vld [vmem:[#allocation10 + $0x50] sm:$0xff] }
0x1444   :  { %v3292_v54 = vadd.f32 %v10256_v61, %v3289_v32  ;;  %v10626_v32 = vpack.c.bf16 %v4096_v5, %v4095_v3 }
0x1446   :  { %8681 = vtanh.f32 %v3292_v54  ;;  %v4098_v54 = vld [vmem:[#allocation10 + $0x58] sm:$0xff] }
0x1450   :  { %v10360_v60 = vpop.eup %8681 }
0x1451   :  { %6747 = vmatmul.mubr.msk.f32.vlgmr.msra.gmra.mrb[36].mxu0 %vm196_vm9, %v10360_v60 }
0x1452   :  { %7913 = vmatpush1.bf16.msra.mxu0 %v10147_v52  ;;  %5594 = vmatprep.mubr.msk.f32.mxu0 %vm1640_vm1, %v3296_v38  ;;  %v10632_v38 = vpack.c.bf16 %v4098_v54, %v4097_v33  ;;  %v10699_v33 = vld [vmem:[#allocation9 + $0xc0] sm:$0xff] }
0x1453   :  { %7914 = vmatprep.subr.bf16.mxu0 %v8880_v0 }
0x1456   :  { %7916 = vmatpush1.bf16.msra.mxu0 %v10156_v58 }
0x1457   :  { %7917 = vmatprep.subr.bf16.mxu0 %v8880_v0 }
0x145a   :  { %7919 = vmatpush1.bf16.msra.mxu0 %v10161_v17 }
0x145b   :  { %7920 = vmatprep.subr.bf16.mxu0 %v8880_v0 }
0x145e   :  { %7922 = vmatpush1.bf16.msra.mxu0 %v10165_v47 }
0x145f   :  { %7923 = vmatprep.subr.bf16.mxu0 %v8880_v0 }
0x1462   :  { %7925 = vmatpush1.bf16.msra.mxu0 %v10169_v7 }
0x1463   :  { %7926 = vmatprep.subr.bf16.mxu0 %v8880_v0 }
0x1466   :  { %7928 = vmatpush1.bf16.msra.mxu0 %v10173_v56 }
0x1467   :  { %7929 = vmatprep.subr.bf16.mxu0 %v8880_v0 }
0x146a   :  { %7931 = vmatpush1.bf16.msra.mxu0 %v10177_v10 }
0x146b   :  { %7932 = vmatprep.subr.bf16.mxu0 %v8880_v0 }
0x146e   :  { %7934 = vmatpush1.bf16.msra.mxu0 %v10181_v14 }
0x146f   :  { %7935 = vmatprep.subr.bf16.mxu0 %v8880_v0 }
0x1472   :  { %7937 = vmatpush1.bf16.msra.mxu0 %v10185_v27 }
0x1473   :  { %7938 = vmatprep.subr.bf16.mxu0 %v8880_v0 }
0x1476   :  { %7940 = vmatpush1.bf16.msra.mxu0 %v10189_v45 }
0x1477   :  { %7941 = vmatprep.subr.bf16.mxu0 %v8880_v0 }
0x147a   :  { %7943 = vmatpush1.bf16.msra.mxu0 %v10193_v63 }
0x147b   :  { %7944 = vmatprep.subr.bf16.mxu0 %v8880_v0 }
0x147e   :  { %7946 = vmatpush1.bf16.msra.mxu0 %v10197_v26 }
0x147f   :  { %3422 = vmatprep.subr.mxu0 %v8882_v1 }
0x1482   :  { %3423 = vmatpush1.msra.mxu0 %v10203_v41 }
0x1483   :  { %3439 = vmatmul.mubr.f32.vlgmr.msra.gmra.mrb[38].mxu0 %v3298_v21  ;;  %8001 = vmatprep.subr.bf16.mxu0 %v8880_v0  ;;  %v4062_v21 = vld [vmem:[#allocation9] sm:$0xff] }
0x1484   :  { %8003 = vmatpush3.bf16.msra.mxu0 %v10109_v4  ;;  %6804 = vmatprep.mubr.msk.f32.mxu0 %vm8881_vm0, %v8882_v1 }
0x1485   :  { %8004 = vmatprep.subr.bf16.mxu0 %v8880_v0 }
0x1488   :  { %8006 = vmatpush3.bf16.msra.mxu0 %v10112_v22 }
0x1489   :  { %8007 = vmatprep.subr.bf16.mxu0 %v8880_v0 }
0x148c   :  { %8009 = vmatpush3.bf16.msra.mxu0 %v10118_v36 }
0x148d   :  { %8010 = vmatprep.subr.bf16.mxu0 %v8880_v0 }
0x1490   :  { %8012 = vmatpush3.bf16.msra.mxu0 %v10124_v30 }
0x1491   :  { %8013 = vmatprep.subr.bf16.mxu0 %v8880_v0 }
0x1494   :  { %8015 = vmatpush3.bf16.msra.mxu0 %v10130_v40 }
0x1495   :  { %8016 = vmatprep.subr.bf16.mxu0 %v8880_v0 }
0x1498   :  { %8018 = vmatpush3.bf16.msra.mxu0 %v10136_v37 }
0x1499   :  { %6802 = vmatprep.subr.mxu0 %v8882_v1 }
0x149c   :  { %6803 = vmatpush3.msk.msra.mxu0 %vm200_vm4, %v10144_v50 }
0x149d   :  { %8019 = vmatprep.subr.bf16.mxu0 %v8880_v0 }
0x1524   :  { %v3368_v46 = vpop.f32.mrb[36].mxu0 }
0x1525   :  { %v6748_v48 = vpop.f32.mrb[37].mxu0 }
0x1526   :  { %v10640_v48 = vld [vmem:[#allocation10 + $0x60] sm:$0xf] }
0x1556   :  { %v3440_v16 = vpop.f32.mrb[38].mxu0 }
0x1557   :  { %v3441_v18 = vadd.f32 %v3440_v16, %v3368_v46  ;;  %v3442_v28 = vpop.f32.mrb[39].mxu0  ;;  %v4063_v46 = vld [vmem:[#allocation9 + $0x8] sm:$0xff] }
0x1558   :  { %v10643_v16 = vpack.c.bf16 %v4063_v46, %v4062_v21  ;;  %v4065_v28 = vld [vmem:[#allocation9 + $0x18] sm:$0xff] }
0x1559   :  { %v3444_v49 = vadd.f32 %v10256_v61, %v3441_v18  ;;  %v4064_v18 = vld [vmem:[#allocation9 + $0x10] sm:$0xff] }
0x155b   :  { %8683 = vtanh.f32 %v3444_v49  ;;  %v10652_v49 = vpack.c.bf16 %v4065_v28, %v4064_v18 }
0x1565   :  { %v10411_v53 = vpop.eup %8683 }
0x1566   :  { %6776 = vmatmul.mubr.msk.f32.vlgmr.msra.gmra.mrb[40].mxu1 %vm196_vm9, %v10411_v53 }
0x1567   :  { %7967 = vmatpush1.bf16.msra.mxu1 %v10147_v52  ;;  %5597 = vmatprep.mubr.msk.f32.mxu1 %vm1640_vm1, %v3448_v8  ;;  %v4066_v8 = vld [vmem:[#allocation9 + $0x20] sm:$0xff] }
0x1568   :  { %7968 = vmatprep.subr.bf16.mxu1 %v8880_v0 }
0x156b   :  { %7970 = vmatpush1.bf16.msra.mxu1 %v10156_v58 }
0x156c   :  { %7971 = vmatprep.subr.bf16.mxu1 %v8880_v0 }
0x156f   :  { %7973 = vmatpush1.bf16.msra.mxu1 %v10161_v17 }
0x1570   :  { %7974 = vmatprep.subr.bf16.mxu1 %v8880_v0 }
0x1573   :  { %7976 = vmatpush1.bf16.msra.mxu1 %v10165_v47 }
0x1574   :  { %7977 = vmatprep.subr.bf16.mxu1 %v8880_v0 }
0x1577   :  { %7979 = vmatpush1.bf16.msra.mxu1 %v10169_v7 }
0x1578   :  { %7980 = vmatprep.subr.bf16.mxu1 %v8880_v0 }
0x157b   :  { %7982 = vmatpush1.bf16.msra.mxu1 %v10173_v56 }
0x157c   :  { %7983 = vmatprep.subr.bf16.mxu1 %v8880_v0 }
0x157f   :  { %7985 = vmatpush1.bf16.msra.mxu1 %v10177_v10 }
0x1580   :  { %7986 = vmatprep.subr.bf16.mxu1 %v8880_v0 }
0x1583   :  { %7988 = vmatpush1.bf16.msra.mxu1 %v10181_v14 }
0x1584   :  { %7989 = vmatprep.subr.bf16.mxu1 %v8880_v0 }
0x1587   :  { %7991 = vmatpush1.bf16.msra.mxu1 %v10185_v27 }
0x1588   :  { %7992 = vmatprep.subr.bf16.mxu1 %v8880_v0 }
0x158b   :  { %7994 = vmatpush1.bf16.msra.mxu1 %v10189_v45 }
0x158c   :  { %7995 = vmatprep.subr.bf16.mxu1 %v8880_v0 }
0x158f   :  { %7997 = vmatpush1.bf16.msra.mxu1 %v10193_v63 }
0x1590   :  { %7998 = vmatprep.subr.bf16.mxu1 %v8880_v0 }
0x1593   :  { %8000 = vmatpush1.bf16.msra.mxu1 %v10197_v26 }
0x1594   :  { %3574 = vmatprep.subr.mxu1 %v8882_v1 }
0x1597   :  { %3575 = vmatpush1.msra.mxu1 %v10203_v41 }
0x1598   :  { %3591 = vmatmul.mubr.f32.vlgmr.msra.gmra.mrb[42].mxu1 %v3450_v55  ;;  %8055 = vmatprep.subr.bf16.mxu1 %v8880_v0  ;;  %v4067_v55 = vld [vmem:[#allocation9 + $0x28] sm:$0xff] }
0x1599   :  { %8057 = vmatpush3.bf16.msra.mxu1 %v10109_v4  ;;  %6833 = vmatprep.mubr.msk.f32.mxu1 %vm8881_vm0, %v8882_v1 }
0x159a   :  { %8058 = vmatprep.subr.bf16.mxu1 %v8880_v0 }
0x159d   :  { %8060 = vmatpush3.bf16.msra.mxu1 %v10112_v22 }
0x159e   :  { %8061 = vmatprep.subr.bf16.mxu1 %v8880_v0 }
0x15a1   :  { %8063 = vmatpush3.bf16.msra.mxu1 %v10118_v36 }
0x15a2   :  { %8064 = vmatprep.subr.bf16.mxu1 %v8880_v0 }
0x15a5   :  { %8066 = vmatpush3.bf16.msra.mxu1 %v10124_v30 }
0x15a6   :  { %8067 = vmatprep.subr.bf16.mxu1 %v8880_v0 }
0x15a9   :  { %8069 = vmatpush3.bf16.msra.mxu1 %v10130_v40 }
0x15aa   :  { %8070 = vmatprep.subr.bf16.mxu1 %v8880_v0 }
0x15ad   :  { %8072 = vmatpush3.bf16.msra.mxu1 %v10136_v37 }
0x15ae   :  { %6831 = vmatprep.subr.mxu1 %v8882_v1 }
0x15b1   :  { %6832 = vmatpush3.msk.msra.mxu1 %vm200_vm4, %v10144_v50 }
0x15b2   :  { %8073 = vmatprep.subr.bf16.mxu1 %v8880_v0 }
0x1639   :  { %v3520_v23 = vpop.f32.mrb[40].mxu1 }
0x163a   :  { %v6777_v34 = vpop.f32.mrb[41].mxu1 }
0x163b   :  { %v4068_v34 = vld [vmem:[#allocation9 + $0x30] sm:$0xff] }
0x166b   :  { %v3592_v35 = vpop.f32.mrb[42].mxu1 }
0x166c   :  { %v3593_v62 = vadd.f32 %v3592_v35, %v3520_v23  ;;  %v3594_v15 = vpop.f32.mrb[43].mxu1  ;;  %v10657_v23 = vpack.c.bf16 %v4067_v55, %v4066_v8  ;;  %v4069_v35 = vld [vmem:[#allocation9 + $0x38] sm:$0xff] }
0x166d   :  { %v4070_v15 = vld [vmem:[#allocation9 + $0x40] sm:$0xff] }
0x166e   :  { %v3596_v31 = vadd.f32 %v10256_v61, %v3593_v62  ;;  %v10661_v62 = vpack.c.bf16 %v4069_v35, %v4068_v34 }
0x1670   :  { %8685 = vtanh.f32 %v3596_v31  ;;  %v4071_v31 = vld [vmem:[#allocation9 + $0x48] sm:$0xff] }
0x167a   :  { %v10462_v13 = vpop.eup %8685 }
0x167b   :  { %6805 = vmatmul.mubr.msk.f32.vlgmr.msra.gmra.mrb[40].mxu0 %vm196_vm9, %v10462_v13  ;;  %v10566_v42 = vsel %vm1514_vm15, %v10462_v13, %v10411_v53  ;;  %v10722_v18 = vsel %vm1514_vm15, %v10411_v53, %v10462_v13  ;;  %v10752_v13 = vld [vmem:[%s11141_s12] ss:$0 sm:$0xff] }
0x167c   :  { %8021 = vmatpush1.bf16.msra.mxu0 %v10147_v52  ;;  %5600 = vmatprep.mubr.msk.f32.mxu0 %vm1640_vm1, %v3600_v25  ;;  %v10665_v25 = vpack.c.bf16 %v4071_v31, %v4070_v15 }
0x167d   :  { %8022 = vmatprep.subr.bf16.mxu0 %v8880_v0 }
0x1680   :  { %8024 = vmatpush1.bf16.msra.mxu0 %v10156_v58 }
0x1681   :  { %8025 = vmatprep.subr.bf16.mxu0 %v8880_v0 }
0x1684   :  { %8027 = vmatpush1.bf16.msra.mxu0 %v10161_v17 }
0x1685   :  { %8028 = vmatprep.subr.bf16.mxu0 %v8880_v0 }
0x1688   :  { %8030 = vmatpush1.bf16.msra.mxu0 %v10165_v47 }
0x1689   :  { %8031 = vmatprep.subr.bf16.mxu0 %v8880_v0 }
0x168c   :  { %8033 = vmatpush1.bf16.msra.mxu0 %v10169_v7 }
0x168d   :  { %8034 = vmatprep.subr.bf16.mxu0 %v8880_v0 }
0x1690   :  { %8036 = vmatpush1.bf16.msra.mxu0 %v10173_v56 }
0x1691   :  { %8037 = vmatprep.subr.bf16.mxu0 %v8880_v0 }
0x1694   :  { %8039 = vmatpush1.bf16.msra.mxu0 %v10177_v10 }
0x1695   :  { %8040 = vmatprep.subr.bf16.mxu0 %v8880_v0 }
0x1698   :  { %8042 = vmatpush1.bf16.msra.mxu0 %v10181_v14 }
0x1699   :  { %8043 = vmatprep.subr.bf16.mxu0 %v8880_v0 }
0x169c   :  { %8045 = vmatpush1.bf16.msra.mxu0 %v10185_v27 }
0x169d   :  { %8046 = vmatprep.subr.bf16.mxu0 %v8880_v0 }
0x16a0   :  { %8048 = vmatpush1.bf16.msra.mxu0 %v10189_v45 }
0x16a1   :  { %8049 = vmatprep.subr.bf16.mxu0 %v8880_v0 }
0x16a4   :  { %8051 = vmatpush1.bf16.msra.mxu0 %v10193_v63 }
0x16a5   :  { %8052 = vmatprep.subr.bf16.mxu0 %v8880_v0 }
0x16a8   :  { %8054 = vmatpush1.bf16.msra.mxu0 %v10197_v26 }
0x16a9   :  { %3726 = vmatprep.subr.mxu0 %v8882_v1 }
0x16ac   :  { %3727 = vmatpush1.msra.mxu0 %v10203_v41 }
0x16ad   :  { %3743 = vmatmul.mubr.f32.vlgmr.msra.gmra.mrb[42].mxu0 %v3602_v59  ;;  %8109 = vmatprep.subr.bf16.mxu0 %v8880_v0  ;;  %v4072_v59 = vld [vmem:[#allocation9 + $0x50] sm:$0xff] }
0x16ae   :  { %8111 = vmatpush3.bf16.msra.mxu0 %v10109_v4  ;;  %6862 = vmatprep.mubr.msk.f32.mxu0 %vm8881_vm0, %v8882_v1 }
0x16af   :  { %8112 = vmatprep.subr.bf16.mxu0 %v8880_v0 }
0x16b2   :  { %8114 = vmatpush3.bf16.msra.mxu0 %v10112_v22 }
0x16b3   :  { %8115 = vmatprep.subr.bf16.mxu0 %v8880_v0 }
0x16b6   :  { %8117 = vmatpush3.bf16.msra.mxu0 %v10118_v36 }
0x16b7   :  { %8118 = vmatprep.subr.bf16.mxu0 %v8880_v0 }
0x16ba   :  { %8120 = vmatpush3.bf16.msra.mxu0 %v10124_v30 }
0x16bb   :  { %8121 = vmatprep.subr.bf16.mxu0 %v8880_v0 }
0x16be   :  { %8123 = vmatpush3.bf16.msra.mxu0 %v10130_v40 }
0x16bf   :  { %8124 = vmatprep.subr.bf16.mxu0 %v8880_v0 }
0x16c2   :  { %8126 = vmatpush3.bf16.msra.mxu0 %v10136_v37  ;;  %v3754_v37 = vsel %vm196_vm9, %v10060_v43, %v3752_v57 }
0x16c3   :  { %6860 = vmatprep.subr.mxu0 %v8882_v1 }
0x16c6   :  { %6861 = vmatpush3.msk.msra.mxu0 %vm200_vm4, %v10144_v50 }
0x16c7   :  { %8127 = vmatprep.subr.bf16.mxu0 %v8880_v0 }
0x174e   :  { %v3672_v4 = vpop.f32.mrb[40].mxu0 }
0x174f   :  { %v6806_v22 = vpop.f32.mrb[41].mxu0 }
0x1780   :  { %v3744_v36 = vpop.f32.mrb[42].mxu0 }
0x1781   :  { %v3745_v2 = vadd.f32 %v3744_v36, %v3672_v4  ;;  %v3746_v30 = vpop.f32.mrb[43].mxu0  ;;  %v4073_v4 = vld [vmem:[#allocation9 + $0x58] sm:$0xff]  ;;  %v4074_v36 = vld [vmem:[#allocation9 + $0x60] sm:$0xff] }
0x1782   :  { %v10669_v22 = vpack.c.bf16 %v4073_v4, %v4072_v59 }
0x1783   :  { %v3748_v29 = vadd.f32 %v10256_v61, %v3745_v2  ;;  %v4075_v2 = vld [vmem:[#allocation9 + $0x68] sm:$0xff] }
0x1785   :  { %8687 = vtanh.f32 %v3748_v29  ;;  %v10673_v29 = vpack.c.bf16 %v4075_v2, %v4074_v36 }
0x178f   :  { %v10513_v40 = vpop.eup %8687 }
0x1790   :  { %6834 = vmatmul.mubr.msk.f32.vlgmr.msra.gmra.mrb[44].mxu1 %vm196_vm9, %v10513_v40 }
0x1791   :  { %8075 = vmatpush1.bf16.msra.mxu1 %v10147_v52  ;;  %5603 = vmatprep.mubr.msk.f32.mxu1 %vm1640_vm1, %v3752_v57 }
0x1792   :  { %8076 = vmatprep.subr.bf16.mxu1 %v8880_v0 }
0x1795   :  { %8078 = vmatpush1.bf16.msra.mxu1 %v10156_v58 }
0x1796   :  { %8079 = vmatprep.subr.bf16.mxu1 %v8880_v0 }
0x1799   :  { %8081 = vmatpush1.bf16.msra.mxu1 %v10161_v17 }
0x179a   :  { %8082 = vmatprep.subr.bf16.mxu1 %v8880_v0 }
0x179d   :  { %8084 = vmatpush1.bf16.msra.mxu1 %v10165_v47 }
0x179e   :  { %8085 = vmatprep.subr.bf16.mxu1 %v8880_v0 }
0x17a1   :  { %8087 = vmatpush1.bf16.msra.mxu1 %v10169_v7 }
0x17a2   :  { %8088 = vmatprep.subr.bf16.mxu1 %v8880_v0 }
0x17a5   :  { %8090 = vmatpush1.bf16.msra.mxu1 %v10173_v56 }
0x17a6   :  { %8091 = vmatprep.subr.bf16.mxu1 %v8880_v0 }
0x17a9   :  { %8093 = vmatpush1.bf16.msra.mxu1 %v10177_v10 }
0x17aa   :  { %8094 = vmatprep.subr.bf16.mxu1 %v8880_v0 }
0x17ad   :  { %8096 = vmatpush1.bf16.msra.mxu1 %v10181_v14 }
0x17ae   :  { %8097 = vmatprep.subr.bf16.mxu1 %v8880_v0 }
0x17b1   :  { %8099 = vmatpush1.bf16.msra.mxu1 %v10185_v27 }
0x17b2   :  { %8100 = vmatprep.subr.bf16.mxu1 %v8880_v0 }
0x17b5   :  { %8102 = vmatpush1.bf16.msra.mxu1 %v10189_v45 }
0x17b6   :  { %8103 = vmatprep.subr.bf16.mxu1 %v8880_v0 }
0x17b9   :  { %8105 = vmatpush1.bf16.msra.mxu1 %v10193_v63 }
0x17ba   :  { %8106 = vmatprep.subr.bf16.mxu1 %v8880_v0 }
0x17bd   :  { %8108 = vmatpush1.bf16.msra.mxu1 %v10197_v26 }
0x17be   :  { %3878 = vmatprep.subr.mxu1 %v8882_v1 }
0x17c1   :  { %3879 = vmatpush1.msra.mxu1 %v10203_v41 }
0x17c2   :  { %3895 = vmatmul.mubr.f32.vlgmr.msra.gmra.mrb[46].mxu1 %v3754_v37  ;;  %8163 = vmatprep.subr.bf16.mxu1 %v8880_v0  ;;  %v4076_v37 = vld [vmem:[#allocation9 + $0x70] sm:$0xff] }
0x17c3   :  { %6891 = vmatprep.mubr.msk.f32.mxu1 %vm8881_vm0, %v8882_v1 }
0x1863   :  { %v3824_v50 = vpop.f32.mrb[44].mxu1 }
0x1864   :  { %v6835_v9 = vpop.f32.mrb[45].mxu1 }
0x1895   :  { %v3896_v51 = vpop.f32.mrb[46].mxu1 }
0x1896   :  { %v3897_v6 = vadd.f32 %v3896_v51, %v3824_v50  ;;  %v3898_v24 = vpop.f32.mrb[47].mxu1  ;;  %v4077_v50 = vld [vmem:[#allocation9 + $0x78] sm:$0xff]  ;;  %v4078_v51 = vld [vmem:[#allocation9 + $0x80] sm:$0xff] }
0x1897   :  { %v10677_v9 = vpack.c.bf16 %v4077_v50, %v4076_v37 }
0x1898   :  { %v3900_v11 = vadd.f32 %v10256_v61, %v3897_v6  ;;  %v4079_v6 = vld [vmem:[#allocation9 + $0x88] sm:$0xff] }
0x1899   :  { %v10681_v24 = vpack.c.bf16 %v4079_v6, %v4078_v51 }
0x189a   :  { %8689 = vtanh.f32 %v3900_v11  ;;  %v4080_v11 = vld [vmem:[#allocation9 + $0x90] sm:$0xff] }
0x18a4   :  { %v10549_v39 = vpop.eup %8689 }
0x18a5   :  { %6863 = vmatmul.mubr.msk.f32.vlgmr.msra.gmra.mrb[44].mxu0 %vm196_vm9, %v10549_v39  ;;  %v10556_v43 = vsel %vm1514_vm15, %v10549_v39, %v10309_v12 }
0x18a6   :  { %8129 = vmatpush1.bf16.msra.mxu0 %v10147_v52  ;;  %4260 = vrot.lane.b32.xlu0 %v10556_v43, %s8884_s3  ;;  %v10575_v52 = vsel %vm1514_vm15, %v10360_v60, %v10513_v40 }
0x18a7   :  { %5606 = vmatprep.mubr.msk.f32.mxu0 %vm1640_vm1, %v3904_v20  ;;  %8130 = vmatprep.subr.bf16.mxu0 %v8880_v0 }
0x18aa   :  { %8132 = vmatpush1.bf16.msra.mxu0 %v10156_v58  ;;  %4564 = vrot.lane.b32.xlu0 %v10566_v42, %s8884_s3  ;;  %v3906_v58 = vsel %vm196_vm9, %v10209_v44, %v3904_v20  ;;  %v4081_v20 = vld [vmem:[#allocation9 + $0x98] sm:$0xff] }
0x18ab   :  { %8133 = vmatprep.subr.bf16.mxu0 %v8880_v0 }
0x18ae   :  { %8135 = vmatpush1.bf16.msra.mxu0 %v10161_v17  ;;  %4868 = vrot.lane.b32.xlu0 %v10575_v52, %s8884_s3  ;;  %v4087_v17 = vld [vmem:[#allocation10] sm:$0xff] }
0x18af   :  { %8136 = vmatprep.subr.bf16.mxu0 %v8880_v0 }
0x18b2   :  { %8138 = vmatpush1.bf16.msra.mxu0 %v10165_v47  ;;  %v4088_v47 = vld [vmem:[#allocation10 + $0x8] sm:$0xff] }
0x18b3   :  { %8139 = vmatprep.subr.bf16.mxu0 %v8880_v0 }
0x18b6   :  { %8141 = vmatpush1.bf16.msra.mxu0 %v10169_v7  ;;  %v4089_v7 = vld [vmem:[#allocation10 + $0x10] sm:$0xff] }
0x18b7   :  { %8142 = vmatprep.subr.bf16.mxu0 %v8880_v0 }
0x18ba   :  { %8144 = vmatpush1.bf16.msra.mxu0 %v10173_v56  ;;  %v10605_v56 = vpack.c.bf16 %v4088_v47, %v4087_v17  ;;  %v4082_v17 = vld [vmem:[#allocation9 + $0xa0] sm:$0xff]  ;;  %v4083_v47 = vld [vmem:[#allocation9 + $0xa8] sm:$0xff] }
0x18bb   :  { %8145 = vmatprep.subr.bf16.mxu0 %v8880_v0 }
0x18bc   :  { %8165 = vmatpush3.bf16.msra.mxu1 %v10605_v56 }
0x18bd   :  { %8166 = vmatprep.subr.bf16.mxu1 %v8880_v0 }
0x18be   :  { %8147 = vmatpush1.bf16.msra.mxu0 %v10177_v10  ;;  %v4090_v10 = vld [vmem:[#allocation10 + $0x18] sm:$0xff] }
0x18bf   :  { %8148 = vmatprep.subr.bf16.mxu0 %v8880_v0 }
0x18c2   :  { %8150 = vmatpush1.bf16.msra.mxu0 %v10181_v14  ;;  %v10608_v14 = vpack.c.bf16 %v4090_v10, %v4089_v7  ;;  %v10689_v7 = vpack.c.bf16 %v4083_v47, %v4082_v17  ;;  %v4084_v10 = vld [vmem:[#allocation9 + $0xb0] sm:$0xff] }
0x18c3   :  { %8151 = vmatprep.subr.bf16.mxu0 %v8880_v0 }
0x18c4   :  { %8168 = vmatpush3.bf16.msra.mxu1 %v10608_v14 }
0x18c5   :  { %8169 = vmatprep.subr.bf16.mxu1 %v8880_v0 }
0x18c6   :  { %8153 = vmatpush1.bf16.msra.mxu0 %v10185_v27  ;;  %v4091_v27 = vld [vmem:[#allocation10 + $0x20] sm:$0xff] }
0x18c7   :  { %8154 = vmatprep.subr.bf16.mxu0 %v8880_v0 }
0x18ca   :  { %8156 = vmatpush1.bf16.msra.mxu0 %v10189_v45  ;;  %v4092_v45 = vld [vmem:[#allocation10 + $0x28] sm:$0xff] }
0x18cb   :  { %8157 = vmatprep.subr.bf16.mxu0 %v8880_v0 }
0x18ce   :  { %8159 = vmatpush1.bf16.msra.mxu0 %v10193_v63  ;;  %v10614_v63 = vpack.c.bf16 %v4092_v45, %v4091_v27  ;;  %v4085_v27 = vld [vmem:[#allocation9 + $0xb8] sm:$0xff] }
0x18cf   :  { %8160 = vmatprep.subr.bf16.mxu0 %v8880_v0  ;;  %v10693_v45 = vpack.c.bf16 %v4085_v27, %v4084_v10 }
0x18d0   :  { %8171 = vmatpush3.bf16.msra.mxu1 %v10614_v63 }
0x18d1   :  { %8172 = vmatprep.subr.bf16.mxu1 %v8880_v0 }
0x18d2   :  { %8162 = vmatpush1.bf16.msra.mxu0 %v10197_v26  ;;  %v4093_v26 = vld [vmem:[#allocation10 + $0x30] sm:$0xff] }
0x18d3   :  { %4030 = vmatprep.subr.mxu0 %v8882_v1 }
0x18d6   :  { %4031 = vmatpush1.msra.mxu0 %v10203_v41  ;;  %v4094_v41 = vld [vmem:[#allocation10 + $0x38] sm:$0xff] }
0x18d7   :  { %4047 = vmatmul.mubr.f32.vlgmr.msra.gmra.mrb[46].mxu0 %v3906_v58  ;;  %8217 = vmatprep.subr.bf16.mxu0 %v8880_v0  ;;  %v10620_v44 = vpack.c.bf16 %v4094_v41, %v4093_v26  ;;  %v10685_v58 = vpack.c.bf16 %v4081_v20, %v4080_v11 }
0x18d8   :  { %6920 = vmatprep.mubr.msk.f32.mxu0 %vm8881_vm0, %v8882_v1  ;;  %8219 = vmatpush3.bf16.msra.mxu0 %v10605_v56 }
0x18d9   :  { %8220 = vmatprep.subr.bf16.mxu0 %v8880_v0  ;;  %8174 = vmatpush3.bf16.msra.mxu1 %v10620_v44 }
0x18da   :  { %8175 = vmatprep.subr.bf16.mxu1 %v8880_v0 }
0x18dc   :  { %8222 = vmatpush3.bf16.msra.mxu0 %v10608_v14 }
0x18dd   :  { %8223 = vmatprep.subr.bf16.mxu0 %v8880_v0  ;;  %8177 = vmatpush3.bf16.msra.mxu1 %v10626_v32 }
0x18de   :  { %8178 = vmatprep.subr.bf16.mxu1 %v8880_v0 }
0x18e0   :  { %8225 = vmatpush3.bf16.msra.mxu0 %v10614_v63 }
0x18e1   :  { %8226 = vmatprep.subr.bf16.mxu0 %v8880_v0  ;;  %8180 = vmatpush3.bf16.msra.mxu1 %v10632_v38 }
0x18e2   :  { %6889 = vmatprep.subr.mxu1 %v8882_v1 }
0x18e4   :  { %8228 = vmatpush3.bf16.msra.mxu0 %v10620_v44 }
0x18e5   :  { %8229 = vmatprep.subr.bf16.mxu0 %v8880_v0  ;;  %6890 = vmatpush3.msk.msra.mxu1 %vm200_vm4, %v10640_v48 }
0x18e6   :  { %6892 = vmatmul.mubr.f32.vlgmr.msra.gmra.mrb[48].mxu1 %v8882_v1  ;;  %8181 = vmatprep.subr.bf16.mxu1 %v8880_v0 }
0x18e7   :  { %8183 = vmatpush1.bf16.msra.mxu1 %v10643_v16 }
0x18e8   :  { %8231 = vmatpush3.bf16.msra.mxu0 %v10626_v32  ;;  %8184 = vmatprep.subr.bf16.mxu1 %v8880_v0 }
0x18e9   :  { %8232 = vmatprep.subr.bf16.mxu0 %v8880_v0 }
0x18eb   :  { %8186 = vmatpush1.bf16.msra.mxu1 %v10652_v49 }
0x18ec   :  { %8234 = vmatpush3.bf16.msra.mxu0 %v10632_v38  ;;  %8187 = vmatprep.subr.bf16.mxu1 %v8880_v0 }
0x18ed   :  { %6918 = vmatprep.subr.mxu0 %v8882_v1 }
0x18ef   :  { %8189 = vmatpush1.bf16.msra.mxu1 %v10657_v23 }
0x18f0   :  { %6919 = vmatpush3.msk.msra.mxu0 %vm200_vm4, %v10640_v48  ;;  %8190 = vmatprep.subr.bf16.mxu1 %v8880_v0 }
0x18f1   :  { %8235 = vmatprep.subr.bf16.mxu0 %v8880_v0 }
0x18f3   :  { %8192 = vmatpush1.bf16.msra.mxu1 %v10661_v62 }
0x18f4   :  { %8193 = vmatprep.subr.bf16.mxu1 %v8880_v0 }
0x18f7   :  { %8195 = vmatpush1.bf16.msra.mxu1 %v10665_v25 }
0x18f8   :  { %8196 = vmatprep.subr.bf16.mxu1 %v8880_v0 }
0x18fb   :  { %8198 = vmatpush1.bf16.msra.mxu1 %v10669_v22 }
0x18fc   :  { %8199 = vmatprep.subr.bf16.mxu1 %v8880_v0 }
0x18ff   :  { %8201 = vmatpush1.bf16.msra.mxu1 %v10673_v29 }
0x1900   :  { %8202 = vmatprep.subr.bf16.mxu1 %v8880_v0 }
0x1903   :  { %8204 = vmatpush1.bf16.msra.mxu1 %v10677_v9 }
0x1904   :  { %8205 = vmatprep.subr.bf16.mxu1 %v8880_v0 }
0x1907   :  { %8207 = vmatpush1.bf16.msra.mxu1 %v10681_v24 }
0x1908   :  { %8208 = vmatprep.subr.bf16.mxu1 %v8880_v0 }
0x190b   :  { %8210 = vmatpush1.bf16.msra.mxu1 %v10685_v58 }
0x190c   :  { %8211 = vmatprep.subr.bf16.mxu1 %v8880_v0 }
0x190f   :  { %8213 = vmatpush1.bf16.msra.mxu1 %v10689_v7 }
0x1910   :  { %8214 = vmatprep.subr.bf16.mxu1 %v8880_v0 }
0x1913   :  { %8216 = vmatpush1.bf16.msra.mxu1 %v10693_v45 }
0x1914   :  { %4229 = vmatprep.subr.mxu1 %v8882_v1 }
0x1917   :  { %4230 = vmatpush1.msra.mxu1 %v10699_v33 }
0x1918   :  { %8271 = vmatprep.subr.bf16.mxu1 %v8880_v0  ;;  %v4261_v35 = vpop.permute.xlu0 %4260 }
0x191c   :  { %v4565_v10 = vpop.permute.xlu0 %4564 }
0x191d   :  { %v4567_v27 = vsel %vm196_vm9, %v10722_v18, %v4565_v10 }
0x1978   :  { %v3976_v30 = vpop.f32.mrb[44].mxu0 }
0x1979   :  { %v6864_v57 = vpop.f32.mrb[45].mxu0 }
0x19aa   :  { %v4048_v26 = vpop.f32.mrb[46].mxu0 }
0x19ab   :  { %v4049_v41 = vadd.f32 %v4048_v26, %v3976_v30  ;;  %v4050_v3 = vpop.f32.mrb[47].mxu0 }
0x19ad   :  { %v4052_v5 = vadd.f32 %v10256_v61, %v4049_v41  ;;  %v10715_v61 = vsel %vm1514_vm15, %v10513_v40, %v10360_v60 }
0x19af   :  { %8691 = vtanh.f32 %v4052_v5 }
0x19b9   :  { %v8692_v54 = vpop.eup %8691 }
0x19ba   :  { %v10705_v21 = vsel %vm1514_vm15, %v8692_v54, %v10259_v19  ;;  %v4054_v46 = vsel %vm1514_vm15, %v10259_v19, %v8692_v54  ;;  %v4055_v19 = vsel %vm1514_vm15, %v10309_v12, %v10549_v39  ;;  %v4175_v12 = vpop.f32.mrb[48].mxu1 }
0x19bb   :  { %4102 = vrot.lane.b32.xlu1 %v10705_v21, %s8884_s3  ;;  %5172 = vrot.lane.b32.xlu0 %v4054_v46, %s8884_s3  ;;  %v6893_v53 = vpop.f32.mrb[49].mxu1  ;;  %v4263_v15 = vsel %vm196_vm9, %v4055_v19, %v4261_v35 }
0x19bf   :  { %4412 = vrot.lane.b32.xlu1 %v10715_v61, %s8884_s3 }
0x19c3   :  { %4716 = vrot.lane.b32.xlu1 %v10722_v18, %s8884_s3 }
0x19c7   :  { %5020 = vrot.lane.b32.xlu1 %v4055_v19, %s8884_s3 }
0x1a2d   :  { %v4103_v28 = vpop.permute.xlu1 %4102 }
0x1a2e   :  { %v4105_v60 = vsel %vm196_vm9, %v4054_v46, %v4103_v28  ;;  %5608 = vmatprep.mubr.msk.f32.mxu1 %vm1640_vm1, %v4103_v28 }
0x1a2f   :  { %4246 = vmatmul.mubr.f32.vlgmr.msra.gmra.mrb[50].mxu1 %v4105_v60 }
0x1a30   :  { %8273 = vmatpush3.bf16.msra.mxu1 %v10605_v56  ;;  %6949 = vmatprep.mubr.msk.f32.mxu1 %vm8881_vm0, %v8882_v1 }
0x1a31   :  { %8274 = vmatprep.subr.bf16.mxu1 %v8880_v0  ;;  %v4413_v37 = vpop.permute.xlu1 %4412 }
0x1a32   :  { %v4415_v50 = vsel %vm196_vm9, %v10575_v52, %v4413_v37 }
0x1a34   :  { %8276 = vmatpush3.bf16.msra.mxu1 %v10608_v14 }
0x1a35   :  { %8277 = vmatprep.subr.bf16.mxu1 %v8880_v0  ;;  %v4717_v19 = vpop.permute.xlu1 %4716 }
0x1a36   :  { %v4719_v28 = vsel %vm196_vm9, %v10566_v42, %v4717_v19 }
0x1a38   :  { %8279 = vmatpush3.bf16.msra.mxu1 %v10614_v63 }
0x1a39   :  { %8280 = vmatprep.subr.bf16.mxu1 %v8880_v0 }
0x1a3c   :  { %8282 = vmatpush3.bf16.msra.mxu1 %v10620_v44 }
0x1a3d   :  { %8283 = vmatprep.subr.bf16.mxu1 %v8880_v0 }
0x1a40   :  { %8285 = vmatpush3.bf16.msra.mxu1 %v10626_v32 }
0x1a41   :  { %8286 = vmatprep.subr.bf16.mxu1 %v8880_v0 }
0x1a44   :  { %8288 = vmatpush3.bf16.msra.mxu1 %v10632_v38 }
0x1a45   :  { %6947 = vmatprep.subr.mxu1 %v8882_v1 }
0x1a48   :  { %6948 = vmatpush3.msk.msra.mxu1 %vm200_vm4, %v10640_v48 }
0x1a49   :  { %8289 = vmatprep.subr.bf16.mxu1 %v8880_v0 }
0x1b02   :  { %v4247_v40 = vpop.f32.mrb[50].mxu1 }
0x1b03   :  { %v4248_v39 = vadd.f32 %v4247_v40, %v4175_v12  ;;  %v4249_v8 = vpop.f32.mrb[51].mxu1 }
0x1b05   :  { %v4257_v55 = vadd.f32 %v10752_v13, %v4248_v39 }
0x1b07   :  { %8693 = vtanh.f32 %v4257_v55  ;;  %v4869_v55 = vpop.permute.xlu0 %4868 }
0x1b11   :  { %v10755_v34 = vpop.eup %8693 }
0x1b12   :  { %6921 = vmatmul.mubr.msk.f32.vlgmr.msra.gmra.mrb[48].mxu0 %vm196_vm9, %v10755_v34 }
0x1b13   :  { %8237 = vmatpush1.bf16.msra.mxu0 %v10643_v16  ;;  %5612 = vmatprep.mubr.msk.f32.mxu0 %vm1640_vm1, %v4261_v35  ;;  %v4871_v35 = vsel %vm196_vm9, %v10715_v61, %v4869_v55 }
0x1b14   :  { %8238 = vmatprep.subr.bf16.mxu0 %v8880_v0 }
0x1b17   :  { %8240 = vmatpush1.bf16.msra.mxu0 %v10652_v49 }
0x1b18   :  { %8241 = vmatprep.subr.bf16.mxu0 %v8880_v0 }
0x1b1b   :  { %8243 = vmatpush1.bf16.msra.mxu0 %v10657_v23 }
0x1b1c   :  { %8244 = vmatprep.subr.bf16.mxu0 %v8880_v0 }
0x1b1f   :  { %8246 = vmatpush1.bf16.msra.mxu0 %v10661_v62 }
0x1b20   :  { %8247 = vmatprep.subr.bf16.mxu0 %v8880_v0 }
0x1b23   :  { %8249 = vmatpush1.bf16.msra.mxu0 %v10665_v25 }
0x1b24   :  { %8250 = vmatprep.subr.bf16.mxu0 %v8880_v0 }
0x1b27   :  { %8252 = vmatpush1.bf16.msra.mxu0 %v10669_v22 }
0x1b28   :  { %8253 = vmatprep.subr.bf16.mxu0 %v8880_v0 }
0x1b2b   :  { %8255 = vmatpush1.bf16.msra.mxu0 %v10673_v29 }
0x1b2c   :  { %8256 = vmatprep.subr.bf16.mxu0 %v8880_v0 }
0x1b2f   :  { %8258 = vmatpush1.bf16.msra.mxu0 %v10677_v9 }
0x1b30   :  { %8259 = vmatprep.subr.bf16.mxu0 %v8880_v0 }
0x1b33   :  { %8261 = vmatpush1.bf16.msra.mxu0 %v10681_v24 }
0x1b34   :  { %8262 = vmatprep.subr.bf16.mxu0 %v8880_v0 }
0x1b37   :  { %8264 = vmatpush1.bf16.msra.mxu0 %v10685_v58 }
0x1b38   :  { %8265 = vmatprep.subr.bf16.mxu0 %v8880_v0 }
0x1b3b   :  { %8267 = vmatpush1.bf16.msra.mxu0 %v10689_v7 }
0x1b3c   :  { %8268 = vmatprep.subr.bf16.mxu0 %v8880_v0 }
0x1b3f   :  { %8270 = vmatpush1.bf16.msra.mxu0 %v10693_v45 }
0x1b40   :  { %4387 = vmatprep.subr.mxu0 %v8882_v1 }
0x1b43   :  { %4388 = vmatpush1.msra.mxu0 %v10699_v33 }
0x1b44   :  { %4404 = vmatmul.mubr.f32.vlgmr.msra.gmra.mrb[50].mxu0 %v4263_v15  ;;  %8325 = vmatprep.subr.bf16.mxu0 %v8880_v0 }
0x1b45   :  { %8327 = vmatpush3.bf16.msra.mxu0 %v10605_v56  ;;  %6978 = vmatprep.mubr.msk.f32.mxu0 %vm8881_vm0, %v8882_v1 }
0x1b46   :  { %8328 = vmatprep.subr.bf16.mxu0 %v8880_v0 }
0x1b49   :  { %8330 = vmatpush3.bf16.msra.mxu0 %v10608_v14 }
0x1b4a   :  { %8331 = vmatprep.subr.bf16.mxu0 %v8880_v0 }
0x1b4d   :  { %8333 = vmatpush3.bf16.msra.mxu0 %v10614_v63 }
0x1b4e   :  { %8334 = vmatprep.subr.bf16.mxu0 %v8880_v0 }
0x1b51   :  { %8336 = vmatpush3.bf16.msra.mxu0 %v10620_v44 }
0x1b52   :  { %8337 = vmatprep.subr.bf16.mxu0 %v8880_v0 }
0x1b55   :  { %8339 = vmatpush3.bf16.msra.mxu0 %v10626_v32 }
0x1b56   :  { %8340 = vmatprep.subr.bf16.mxu0 %v8880_v0 }
0x1b59   :  { %8342 = vmatpush3.bf16.msra.mxu0 %v10632_v38 }
0x1b5a   :  { %6976 = vmatprep.subr.mxu0 %v8882_v1 }
0x1b5d   :  { %6977 = vmatpush3.msk.msra.mxu0 %vm200_vm4, %v10640_v48 }
0x1b5e   :  { %8343 = vmatprep.subr.bf16.mxu0 %v8880_v0 }
0x1be5   :  { %v4333_v31 = vpop.f32.mrb[48].mxu0 }
0x1be6   :  { %v6922_v59 = vpop.f32.mrb[49].mxu0 }
0x1c17   :  { %v4405_v4 = vpop.f32.mrb[50].mxu0 }
0x1c18   :  { %v4406_v36 = vadd.f32 %v4405_v4, %v4333_v31  ;;  %v4407_v2 = vpop.f32.mrb[51].mxu0  ;;  %v5021_v31 = vpop.permute.xlu1 %5020 }
0x1c1a   :  { %v4409_v30 = vadd.f32 %v10752_v13, %v4406_v36 }
0x1c1c   :  { %8695 = vtanh.f32 %v4409_v30 }
0x1c26   :  { %v8696_v57 = vpop.eup %8695 }
0x1c27   :  { %6950 = vmatmul.mubr.msk.f32.vlgmr.msra.gmra.mrb[52].mxu1 %vm196_vm9, %v8696_v57 }
0x1c28   :  { %8291 = vmatpush1.bf16.msra.mxu1 %v10643_v16  ;;  %5615 = vmatprep.mubr.msk.f32.mxu1 %vm1640_vm1, %v4413_v37  ;;  %v5173_v37 = vpop.permute.xlu0 %5172 }
0x1c29   :  { %8292 = vmatprep.subr.bf16.mxu1 %v8880_v0 }
0x1c2c   :  { %8294 = vmatpush1.bf16.msra.mxu1 %v10652_v49 }
0x1c2d   :  { %8295 = vmatprep.subr.bf16.mxu1 %v8880_v0 }
0x1c30   :  { %8297 = vmatpush1.bf16.msra.mxu1 %v10657_v23 }
0x1c31   :  { %8298 = vmatprep.subr.bf16.mxu1 %v8880_v0 }
0x1c34   :  { %8300 = vmatpush1.bf16.msra.mxu1 %v10661_v62 }
0x1c35   :  { %8301 = vmatprep.subr.bf16.mxu1 %v8880_v0 }
0x1c38   :  { %8303 = vmatpush1.bf16.msra.mxu1 %v10665_v25 }
0x1c39   :  { %8304 = vmatprep.subr.bf16.mxu1 %v8880_v0 }
0x1c3c   :  { %8306 = vmatpush1.bf16.msra.mxu1 %v10669_v22 }
0x1c3d   :  { %8307 = vmatprep.subr.bf16.mxu1 %v8880_v0 }
0x1c40   :  { %8309 = vmatpush1.bf16.msra.mxu1 %v10673_v29 }
0x1c41   :  { %8310 = vmatprep.subr.bf16.mxu1 %v8880_v0 }
0x1c44   :  { %8312 = vmatpush1.bf16.msra.mxu1 %v10677_v9 }
0x1c45   :  { %8313 = vmatprep.subr.bf16.mxu1 %v8880_v0 }
0x1c48   :  { %8315 = vmatpush1.bf16.msra.mxu1 %v10681_v24 }
0x1c49   :  { %8316 = vmatprep.subr.bf16.mxu1 %v8880_v0 }
0x1c4c   :  { %8318 = vmatpush1.bf16.msra.mxu1 %v10685_v58 }
0x1c4d   :  { %8319 = vmatprep.subr.bf16.mxu1 %v8880_v0 }
0x1c50   :  { %8321 = vmatpush1.bf16.msra.mxu1 %v10689_v7 }
0x1c51   :  { %8322 = vmatprep.subr.bf16.mxu1 %v8880_v0 }
0x1c54   :  { %8324 = vmatpush1.bf16.msra.mxu1 %v10693_v45 }
0x1c55   :  { %4539 = vmatprep.subr.mxu1 %v8882_v1 }
0x1c58   :  { %4540 = vmatpush1.msra.mxu1 %v10699_v33 }
0x1c59   :  { %4556 = vmatmul.mubr.f32.vlgmr.msra.gmra.mrb[54].mxu1 %v4415_v50  ;;  %8379 = vmatprep.subr.bf16.mxu1 %v8880_v0  ;;  %v5334_v50 = vld [vmem:[#allocation12 + $0x50] sm:$0xff] }
0x1c5a   :  { %8381 = vmatpush3.bf16.msra.mxu1 %v10605_v56  ;;  %7007 = vmatprep.mubr.msk.f32.mxu1 %vm8881_vm0, %v8882_v1 }
0x1c5b   :  { %8382 = vmatprep.subr.bf16.mxu1 %v8880_v0 }
0x1c5e   :  { %8384 = vmatpush3.bf16.msra.mxu1 %v10608_v14 }
0x1c5f   :  { %8385 = vmatprep.subr.bf16.mxu1 %v8880_v0 }
0x1c62   :  { %8387 = vmatpush3.bf16.msra.mxu1 %v10614_v63 }
0x1c63   :  { %8388 = vmatprep.subr.bf16.mxu1 %v8880_v0 }
0x1c66   :  { %8390 = vmatpush3.bf16.msra.mxu1 %v10620_v44 }
0x1c67   :  { %8391 = vmatprep.subr.bf16.mxu1 %v8880_v0 }
0x1c6a   :  { %8393 = vmatpush3.bf16.msra.mxu1 %v10626_v32 }
0x1c6b   :  { %8394 = vmatprep.subr.bf16.mxu1 %v8880_v0 }
0x1c6e   :  { %8396 = vmatpush3.bf16.msra.mxu1 %v10632_v38 }
0x1c6f   :  { %7005 = vmatprep.subr.mxu1 %v8882_v1 }
0x1c72   :  { %7006 = vmatpush3.msk.msra.mxu1 %vm200_vm4, %v10640_v48 }
0x1c73   :  { %8397 = vmatprep.subr.bf16.mxu1 %v8880_v0 }
0x1cfa   :  { %v4485_v52 = vpop.f32.mrb[52].mxu1 }
0x1cfb   :  { %v6951_v51 = vpop.f32.mrb[53].mxu1 }
0x1cfc   :  { %v5335_v51 = vld [vmem:[#allocation12 + $0x58] sm:$0xff] }
0x1d2c   :  { %v4557_v6 = vpop.f32.mrb[54].mxu1 }
0x1d2d   :  { %v4558_v11 = vadd.f32 %v4557_v6, %v4485_v52  ;;  %v4559_v20 = vpop.f32.mrb[55].mxu1  ;;  %v8611_v6 = vpack.c.bf16 %v5335_v51, %v5334_v50 }
0x1d2f   :  { %v4561_v17 = vadd.f32 %v10752_v13, %v4558_v11  ;;  %v5336_v11 = vld [vmem:[#allocation12 + $0x60] sm:$0xf] }
0x1d31   :  { %8697 = vtanh.f32 %v4561_v17 }
0x1d3b   :  { %v8698_v47 = vpop.eup %8697 }
0x1d3c   :  { %6979 = vmatmul.mubr.msk.f32.vlgmr.msra.gmra.mrb[52].mxu0 %vm196_vm9, %v8698_v47 }
0x1d3d   :  { %8345 = vmatpush1.bf16.msra.mxu0 %v10643_v16  ;;  %5618 = vmatprep.mubr.msk.f32.mxu0 %vm1640_vm1, %v4565_v10 }
0x1d3e   :  { %8346 = vmatprep.subr.bf16.mxu0 %v8880_v0 }
0x1d41   :  { %8348 = vmatpush1.bf16.msra.mxu0 %v10652_v49 }
0x1d42   :  { %8349 = vmatprep.subr.bf16.mxu0 %v8880_v0 }
0x1d45   :  { %8351 = vmatpush1.bf16.msra.mxu0 %v10657_v23 }
0x1d46   :  { %8352 = vmatprep.subr.bf16.mxu0 %v8880_v0 }
0x1d49   :  { %8354 = vmatpush1.bf16.msra.mxu0 %v10661_v62 }
0x1d4a   :  { %8355 = vmatprep.subr.bf16.mxu0 %v8880_v0 }
0x1d4d   :  { %8357 = vmatpush1.bf16.msra.mxu0 %v10665_v25 }
0x1d4e   :  { %8358 = vmatprep.subr.bf16.mxu0 %v8880_v0 }
0x1d51   :  { %8360 = vmatpush1.bf16.msra.mxu0 %v10669_v22 }
0x1d52   :  { %8361 = vmatprep.subr.bf16.mxu0 %v8880_v0 }
0x1d55   :  { %8363 = vmatpush1.bf16.msra.mxu0 %v10673_v29 }
0x1d56   :  { %8364 = vmatprep.subr.bf16.mxu0 %v8880_v0 }
0x1d59   :  { %8366 = vmatpush1.bf16.msra.mxu0 %v10677_v9 }
0x1d5a   :  { %8367 = vmatprep.subr.bf16.mxu0 %v8880_v0 }
0x1d5d   :  { %8369 = vmatpush1.bf16.msra.mxu0 %v10681_v24 }
0x1d5e   :  { %8370 = vmatprep.subr.bf16.mxu0 %v8880_v0 }
0x1d61   :  { %8372 = vmatpush1.bf16.msra.mxu0 %v10685_v58 }
0x1d62   :  { %8373 = vmatprep.subr.bf16.mxu0 %v8880_v0 }
0x1d65   :  { %8375 = vmatpush1.bf16.msra.mxu0 %v10689_v7 }
0x1d66   :  { %8376 = vmatprep.subr.bf16.mxu0 %v8880_v0 }
0x1d69   :  { %8378 = vmatpush1.bf16.msra.mxu0 %v10693_v45 }
0x1d6a   :  { %4691 = vmatprep.subr.mxu0 %v8882_v1 }
0x1d6d   :  { %4692 = vmatpush1.msra.mxu0 %v10699_v33 }
0x1d6e   :  { %4708 = vmatmul.mubr.f32.vlgmr.msra.gmra.mrb[54].mxu0 %v4567_v27  ;;  %8433 = vmatprep.subr.bf16.mxu0 %v8880_v0 }
0x1d6f   :  { %8435 = vmatpush3.bf16.msra.mxu0 %v10605_v56  ;;  %7036 = vmatprep.mubr.msk.f32.mxu0 %vm8881_vm0, %v8882_v1 }
0x1d70   :  { %8436 = vmatprep.subr.bf16.mxu0 %v8880_v0 }
0x1d73   :  { %8438 = vmatpush3.bf16.msra.mxu0 %v10608_v14 }
0x1d74   :  { %8439 = vmatprep.subr.bf16.mxu0 %v8880_v0 }
0x1d77   :  { %8441 = vmatpush3.bf16.msra.mxu0 %v10614_v63 }
0x1d78   :  { %8442 = vmatprep.subr.bf16.mxu0 %v8880_v0 }
0x1d7b   :  { %8444 = vmatpush3.bf16.msra.mxu0 %v10620_v44 }
0x1d7c   :  { %8445 = vmatprep.subr.bf16.mxu0 %v8880_v0 }
0x1d7f   :  { %8447 = vmatpush3.bf16.msra.mxu0 %v10626_v32 }
0x1d80   :  { %8448 = vmatprep.subr.bf16.mxu0 %v8880_v0 }
0x1d83   :  { %8450 = vmatpush3.bf16.msra.mxu0 %v10632_v38 }
0x1d84   :  { %7034 = vmatprep.subr.mxu0 %v8882_v1 }
0x1d87   :  { %7035 = vmatpush3.msk.msra.mxu0 %vm200_vm4, %v10640_v48 }
0x1d88   :  { %8451 = vmatprep.subr.bf16.mxu0 %v8880_v0 }
0x1e0f   :  { %v4637_v26 = vpop.f32.mrb[52].mxu0 }
0x1e10   :  { %v6980_v41 = vpop.f32.mrb[53].mxu0 }
0x1e11   :  { %v5421_v41 = vld [vmem:[%s11144_s15] sm:$0xff] }
0x1e41   :  { %v4709_v3 = vpop.f32.mrb[54].mxu0 }
0x1e42   :  { %v4710_v5 = vadd.f32 %v4709_v3, %v4637_v26  ;;  %v4711_v54 = vpop.f32.mrb[55].mxu0  ;;  %v5422_v3 = vld [vmem:[%s11144_s15 + $0x8] sm:$0xff] }
0x1e44   :  { %v4713_v46 = vadd.f32 %v10752_v13, %v4710_v5  ;;  %v8614_v5 = vpack.c.bf16 %v5422_v3, %v5421_v41 }
0x1e46   :  { %8699 = vtanh.f32 %v4713_v46  ;;  %v5423_v46 = vld [vmem:[%s11144_s15 + $0x10] sm:$0xff] }
0x1e50   :  { %v8700_v18 = vpop.eup %8699 }
0x1e51   :  { %7008 = vmatmul.mubr.msk.f32.vlgmr.msra.gmra.mrb[56].mxu1 %vm196_vm9, %v8700_v18  ;;  %v5424_v18 = vld [vmem:[%s11144_s15 + $0x18] sm:$0xff] }
0x1e52   :  { %8399 = vmatpush1.bf16.msra.mxu1 %v10643_v16  ;;  %5621 = vmatprep.mubr.msk.f32.mxu1 %vm1640_vm1, %v4717_v19  ;;  %v8617_v19 = vpack.c.bf16 %v5424_v18, %v5423_v46 }
0x1e53   :  { %8400 = vmatprep.subr.bf16.mxu1 %v8880_v0 }
0x1e56   :  { %8402 = vmatpush1.bf16.msra.mxu1 %v10652_v49 }
0x1e57   :  { %8403 = vmatprep.subr.bf16.mxu1 %v8880_v0 }
0x1e5a   :  { %8405 = vmatpush1.bf16.msra.mxu1 %v10657_v23 }
0x1e5b   :  { %8406 = vmatprep.subr.bf16.mxu1 %v8880_v0 }
0x1e5e   :  { %8408 = vmatpush1.bf16.msra.mxu1 %v10661_v62 }
0x1e5f   :  { %8409 = vmatprep.subr.bf16.mxu1 %v8880_v0 }
0x1e62   :  { %8411 = vmatpush1.bf16.msra.mxu1 %v10665_v25 }
0x1e63   :  { %8412 = vmatprep.subr.bf16.mxu1 %v8880_v0 }
0x1e66   :  { %8414 = vmatpush1.bf16.msra.mxu1 %v10669_v22 }
0x1e67   :  { %8415 = vmatprep.subr.bf16.mxu1 %v8880_v0 }
0x1e6a   :  { %8417 = vmatpush1.bf16.msra.mxu1 %v10673_v29 }
0x1e6b   :  { %8418 = vmatprep.subr.bf16.mxu1 %v8880_v0 }
0x1e6e   :  { %8420 = vmatpush1.bf16.msra.mxu1 %v10677_v9 }
0x1e6f   :  { %8421 = vmatprep.subr.bf16.mxu1 %v8880_v0 }
0x1e72   :  { %8423 = vmatpush1.bf16.msra.mxu1 %v10681_v24 }
0x1e73   :  { %8424 = vmatprep.subr.bf16.mxu1 %v8880_v0 }
0x1e76   :  { %8426 = vmatpush1.bf16.msra.mxu1 %v10685_v58 }
0x1e77   :  { %8427 = vmatprep.subr.bf16.mxu1 %v8880_v0 }
0x1e7a   :  { %8429 = vmatpush1.bf16.msra.mxu1 %v10689_v7 }
0x1e7b   :  { %8430 = vmatprep.subr.bf16.mxu1 %v8880_v0 }
0x1e7e   :  { %8432 = vmatpush1.bf16.msra.mxu1 %v10693_v45 }
0x1e7f   :  { %4843 = vmatprep.subr.mxu1 %v8882_v1 }
0x1e82   :  { %4844 = vmatpush1.msra.mxu1 %v10699_v33 }
0x1e83   :  { %4860 = vmatmul.mubr.f32.vlgmr.msra.gmra.mrb[58].mxu1 %v4719_v28  ;;  %8487 = vmatprep.subr.bf16.mxu1 %v8880_v0  ;;  %v5425_v28 = vld [vmem:[%s11144_s15 + $0x20] sm:$0xff] }
0x1e84   :  { %8489 = vmatpush3.bf16.msra.mxu1 %v10605_v56  ;;  %7065 = vmatprep.mubr.msk.f32.mxu1 %vm8881_vm0, %v8882_v1 }
0x1e85   :  { %8490 = vmatprep.subr.bf16.mxu1 %v8880_v0 }
0x1e88   :  { %8492 = vmatpush3.bf16.msra.mxu1 %v10608_v14 }
0x1e89   :  { %8493 = vmatprep.subr.bf16.mxu1 %v8880_v0 }
0x1e8c   :  { %8495 = vmatpush3.bf16.msra.mxu1 %v10614_v63 }
0x1e8d   :  { %8496 = vmatprep.subr.bf16.mxu1 %v8880_v0 }
0x1e90   :  { %8498 = vmatpush3.bf16.msra.mxu1 %v10620_v44 }
0x1e91   :  { %8499 = vmatprep.subr.bf16.mxu1 %v8880_v0 }
0x1e94   :  { %8501 = vmatpush3.bf16.msra.mxu1 %v10626_v32 }
0x1e95   :  { %8502 = vmatprep.subr.bf16.mxu1 %v8880_v0 }
0x1e98   :  { %8504 = vmatpush3.bf16.msra.mxu1 %v10632_v38 }
0x1e99   :  { %7063 = vmatprep.subr.mxu1 %v8882_v1 }
0x1e9c   :  { %7064 = vmatpush3.msk.msra.mxu1 %vm200_vm4, %v10640_v48 }
0x1e9d   :  { %8505 = vmatprep.subr.bf16.mxu1 %v8880_v0 }
0x1f24   :  { %v4789_v42 = vpop.f32.mrb[56].mxu1 }
0x1f25   :  { %v7009_v60 = vpop.f32.mrb[57].mxu1 }
0x1f56   :  { %v4861_v12 = vpop.f32.mrb[58].mxu1 }
0x1f57   :  { %v4862_v53 = vadd.f32 %v4861_v12, %v4789_v42  ;;  %v4863_v40 = vpop.f32.mrb[59].mxu1  ;;  %v5426_v42 = vld [vmem:[%s11144_s15 + $0x28] sm:$0xff]  ;;  %v5428_v12 = vld [vmem:[%s11144_s15 + $0x38] sm:$0xff] }
0x1f58   :  { %v8620_v60 = vpack.c.bf16 %v5426_v42, %v5425_v28  ;;  %v5429_v40 = vld [vmem:[%s11144_s15 + $0x40] sm:$0xff] }
0x1f59   :  { %v4865_v39 = vadd.f32 %v10752_v13, %v4862_v53 }
0x1f5b   :  { %8701 = vtanh.f32 %v4865_v39  ;;  %v5430_v39 = vld [vmem:[%s11144_s15 + $0x48] sm:$0xff] }
0x1f65   :  { %v8702_v8 = vpop.eup %8701 }
0x1f66   :  { %7037 = vmatmul.mubr.msk.f32.vlgmr.msra.gmra.mrb[56].mxu0 %vm196_vm9, %v8702_v8  ;;  %v8626_v8 = vpack.c.bf16 %v5430_v39, %v5429_v40 }
0x1f67   :  { %8453 = vmatpush1.bf16.msra.mxu0 %v10643_v16  ;;  %5624 = vmatprep.mubr.msk.f32.mxu0 %vm1640_vm1, %v4869_v55  ;;  %v5431_v55 = vld [vmem:[%s11144_s15 + $0x50] sm:$0xff] }
0x1f68   :  { %8454 = vmatprep.subr.bf16.mxu0 %v8880_v0 }
0x1f6b   :  { %8456 = vmatpush1.bf16.msra.mxu0 %v10652_v49 }
0x1f6c   :  { %8457 = vmatprep.subr.bf16.mxu0 %v8880_v0 }
0x1f6f   :  { %8459 = vmatpush1.bf16.msra.mxu0 %v10657_v23 }
0x1f70   :  { %8460 = vmatprep.subr.bf16.mxu0 %v8880_v0 }
0x1f73   :  { %8462 = vmatpush1.bf16.msra.mxu0 %v10661_v62 }
0x1f74   :  { %8463 = vmatprep.subr.bf16.mxu0 %v8880_v0 }
0x1f77   :  { %8465 = vmatpush1.bf16.msra.mxu0 %v10665_v25 }
0x1f78   :  { %8466 = vmatprep.subr.bf16.mxu0 %v8880_v0 }
0x1f7b   :  { %8468 = vmatpush1.bf16.msra.mxu0 %v10669_v22 }
0x1f7c   :  { %8469 = vmatprep.subr.bf16.mxu0 %v8880_v0 }
0x1f7f   :  { %8471 = vmatpush1.bf16.msra.mxu0 %v10673_v29 }
0x1f80   :  { %8472 = vmatprep.subr.bf16.mxu0 %v8880_v0 }
0x1f83   :  { %8474 = vmatpush1.bf16.msra.mxu0 %v10677_v9 }
0x1f84   :  { %8475 = vmatprep.subr.bf16.mxu0 %v8880_v0 }
0x1f87   :  { %8477 = vmatpush1.bf16.msra.mxu0 %v10681_v24 }
0x1f88   :  { %8478 = vmatprep.subr.bf16.mxu0 %v8880_v0 }
0x1f8b   :  { %8480 = vmatpush1.bf16.msra.mxu0 %v10685_v58 }
0x1f8c   :  { %8481 = vmatprep.subr.bf16.mxu0 %v8880_v0 }
0x1f8f   :  { %8483 = vmatpush1.bf16.msra.mxu0 %v10689_v7 }
0x1f90   :  { %8484 = vmatprep.subr.bf16.mxu0 %v8880_v0 }
0x1f93   :  { %8486 = vmatpush1.bf16.msra.mxu0 %v10693_v45 }
0x1f94   :  { %4995 = vmatprep.subr.mxu0 %v8882_v1 }
0x1f97   :  { %4996 = vmatpush1.msra.mxu0 %v10699_v33 }
0x1f98   :  { %5012 = vmatmul.mubr.f32.vlgmr.msra.gmra.mrb[58].mxu0 %v4871_v35  ;;  %8541 = vmatprep.subr.bf16.mxu0 %v8880_v0  ;;  %v5432_v35 = vld [vmem:[%s11144_s15 + $0x58] sm:$0xff] }
0x1f99   :  { %8543 = vmatpush3.bf16.msra.mxu0 %v10605_v56  ;;  %7094 = vmatprep.mubr.msk.f32.mxu0 %vm8881_vm0, %v8882_v1 }
0x1f9a   :  { %8544 = vmatprep.subr.bf16.mxu0 %v8880_v0 }
0x1f9d   :  { %8546 = vmatpush3.bf16.msra.mxu0 %v10608_v14 }
0x1f9e   :  { %8547 = vmatprep.subr.bf16.mxu0 %v8880_v0 }
0x1fa1   :  { %8549 = vmatpush3.bf16.msra.mxu0 %v10614_v63 }
0x1fa2   :  { %8550 = vmatprep.subr.bf16.mxu0 %v8880_v0 }
0x1fa5   :  { %8552 = vmatpush3.bf16.msra.mxu0 %v10620_v44 }
0x1fa6   :  { %8553 = vmatprep.subr.bf16.mxu0 %v8880_v0 }
0x1fa9   :  { %8555 = vmatpush3.bf16.msra.mxu0 %v10626_v32 }
0x1faa   :  { %8556 = vmatprep.subr.bf16.mxu0 %v8880_v0 }
0x1fad   :  { %8558 = vmatpush3.bf16.msra.mxu0 %v10632_v38  ;;  %v5023_v38 = vsel %vm196_vm9, %v10556_v43, %v5021_v31  ;;  %v5175_v43 = vsel %vm196_vm9, %v10705_v21, %v5173_v37  ;;  %v5333_v21 = vld [vmem:[#allocation12 + $0x48] sm:$0xff] }
0x1fae   :  { %7092 = vmatprep.subr.mxu0 %v8882_v1 }
0x1fb1   :  { %7093 = vmatpush3.msk.msra.mxu0 %vm200_vm4, %v10640_v48 }
0x1fb2   :  { %8559 = vmatprep.subr.bf16.mxu0 %v8880_v0 }
0x2039   :  { %v4941_v56 = vpop.f32.mrb[56].mxu0 }
0x203a   :  { %v7038_v14 = vpop.f32.mrb[57].mxu0 }
0x203b   :  { %v5433_v14 = vld [vmem:[%s11144_s15 + $0x60] sm:$0xf] }
0x206b   :  { %v5013_v63 = vpop.f32.mrb[58].mxu0 }
0x206c   :  { %v5014_v61 = vadd.f32 %v5013_v63, %v4941_v56  ;;  %v5015_v44 = vpop.f32.mrb[59].mxu0  ;;  %v8629_v56 = vpack.c.bf16 %v5432_v35, %v5431_v55 }
0x206e   :  { %v5017_v15 = vadd.f32 %v10752_v13, %v5014_v61 }
0x2070   :  { %8703 = vtanh.f32 %v5017_v15 }
0x207a   :  { %v8704_v32 = vpop.eup %8703 }
0x207b   :  { %7066 = vmatmul.mubr.msk.f32.vlgmr.msra.gmra.mrb[60].mxu1 %vm196_vm9, %v8704_v32 }
0x207c   :  { %8507 = vmatpush1.bf16.msra.mxu1 %v10643_v16  ;;  %5627 = vmatprep.mubr.msk.f32.mxu1 %vm1640_vm1, %v5021_v31 }
0x207d   :  { %8508 = vmatprep.subr.bf16.mxu1 %v8880_v0 }
0x2080   :  { %8510 = vmatpush1.bf16.msra.mxu1 %v10652_v49 }
0x2081   :  { %8511 = vmatprep.subr.bf16.mxu1 %v8880_v0 }
0x2084   :  { %8513 = vmatpush1.bf16.msra.mxu1 %v10657_v23 }
0x2085   :  { %8514 = vmatprep.subr.bf16.mxu1 %v8880_v0 }
0x2088   :  { %8516 = vmatpush1.bf16.msra.mxu1 %v10661_v62 }
0x2089   :  { %8517 = vmatprep.subr.bf16.mxu1 %v8880_v0 }
0x208c   :  { %8519 = vmatpush1.bf16.msra.mxu1 %v10665_v25 }
0x208d   :  { %8520 = vmatprep.subr.bf16.mxu1 %v8880_v0 }
0x2090   :  { %8522 = vmatpush1.bf16.msra.mxu1 %v10669_v22 }
0x2091   :  { %8523 = vmatprep.subr.bf16.mxu1 %v8880_v0 }
0x2094   :  { %8525 = vmatpush1.bf16.msra.mxu1 %v10673_v29 }
0x2095   :  { %8526 = vmatprep.subr.bf16.mxu1 %v8880_v0 }
0x2098   :  { %8528 = vmatpush1.bf16.msra.mxu1 %v10677_v9 }
0x2099   :  { %8529 = vmatprep.subr.bf16.mxu1 %v8880_v0 }
0x209c   :  { %8531 = vmatpush1.bf16.msra.mxu1 %v10681_v24 }
0x209d   :  { %8532 = vmatprep.subr.bf16.mxu1 %v8880_v0 }
0x20a0   :  { %8534 = vmatpush1.bf16.msra.mxu1 %v10685_v58 }
0x20a1   :  { %8535 = vmatprep.subr.bf16.mxu1 %v8880_v0 }
0x20a4   :  { %8537 = vmatpush1.bf16.msra.mxu1 %v10689_v7 }
0x20a5   :  { %8538 = vmatprep.subr.bf16.mxu1 %v8880_v0 }
0x20a8   :  { %8540 = vmatpush1.bf16.msra.mxu1 %v10693_v45 }
0x20a9   :  { %5147 = vmatprep.subr.mxu1 %v8882_v1 }
0x20ac   :  { %5148 = vmatpush1.msra.mxu1 %v10699_v33 }
0x20ad   :  { %5164 = vmatmul.mubr.f32.vlgmr.msra.gmra.mrb[62].mxu1 %v5023_v38  ;;  %8595 = vmatprep.subr.bf16.mxu1 %v8880_v0 }
0x20ae   :  { %7123 = vmatprep.mubr.msk.f32.mxu1 %vm8881_vm0, %v8882_v1 }
0x214e   :  { %v5093_v48 = vpop.f32.mrb[60].mxu1 }
0x214f   :  { %v7067_v59 = vpop.f32.mrb[61].mxu1 }
0x2180   :  { %v5165_v4 = vpop.f32.mrb[62].mxu1 }
0x2181   :  { %v5166_v36 = vadd.f32 %v5165_v4, %v5093_v48  ;;  %v5167_v2 = vpop.f32.mrb[63].mxu1 }
0x2183   :  { %v5169_v30 = vadd.f32 %v10752_v13, %v5166_v36 }
0x2185   :  { %8705 = vtanh.f32 %v5169_v30 }
0x218f   :  { %v8706_v57 = vpop.eup %8705 }
0x2190   :  { %7095 = vmatmul.mubr.msk.f32.vlgmr.msra.gmra.mrb[60].mxu0 %vm196_vm9, %v8706_v57 }
0x2191   :  { %8561 = vmatpush1.bf16.msra.mxu0 %v10643_v16  ;;  %5630 = vmatprep.mubr.msk.f32.mxu0 %vm1640_vm1, %v5173_v37  ;;  %v5324_v16 = vld [vmem:[#allocation12] sm:$0xff] }
0x2192   :  { %8562 = vmatprep.subr.bf16.mxu0 %v8880_v0 }
0x2195   :  { %8564 = vmatpush1.bf16.msra.mxu0 %v10652_v49  ;;  %v5325_v49 = vld [vmem:[#allocation12 + $0x8] sm:$0xff] }
0x2196   :  { %8565 = vmatprep.subr.bf16.mxu0 %v8880_v0 }
0x2199   :  { %8567 = vmatpush1.bf16.msra.mxu0 %v10657_v23  ;;  %v5326_v23 = vld [vmem:[#allocation12 + $0x10] sm:$0xff] }
0x219a   :  { %8568 = vmatprep.subr.bf16.mxu0 %v8880_v0 }
0x219d   :  { %8570 = vmatpush1.bf16.msra.mxu0 %v10661_v62  ;;  %v8596_v62 = vpack.c.bf16 %v5325_v49, %v5324_v16 }
0x219e   :  { %8571 = vmatprep.subr.bf16.mxu0 %v8880_v0 }
0x219f   :  { %8597 = vmatpush3.bf16.msra.mxu1 %v8596_v62 }
0x21a0   :  { %8598 = vmatprep.subr.bf16.mxu1 %v8880_v0 }
0x21a1   :  { %8573 = vmatpush1.bf16.msra.mxu0 %v10665_v25  ;;  %v5327_v25 = vld [vmem:[#allocation12 + $0x18] sm:$0xff] }
0x21a2   :  { %8574 = vmatprep.subr.bf16.mxu0 %v8880_v0 }
0x21a5   :  { %8576 = vmatpush1.bf16.msra.mxu0 %v10669_v22  ;;  %v8599_v22 = vpack.c.bf16 %v5327_v25, %v5326_v23 }
0x21a6   :  { %8577 = vmatprep.subr.bf16.mxu0 %v8880_v0 }
0x21a7   :  { %8600 = vmatpush3.bf16.msra.mxu1 %v8599_v22 }
0x21a8   :  { %8601 = vmatprep.subr.bf16.mxu1 %v8880_v0 }
0x21a9   :  { %8579 = vmatpush1.bf16.msra.mxu0 %v10673_v29  ;;  %v5328_v29 = vld [vmem:[#allocation12 + $0x20] sm:$0xff] }
0x21aa   :  { %8580 = vmatprep.subr.bf16.mxu0 %v8880_v0 }
0x21ad   :  { %8582 = vmatpush1.bf16.msra.mxu0 %v10677_v9  ;;  %v5329_v9 = vld [vmem:[#allocation12 + $0x28] sm:$0xff] }
0x21ae   :  { %8583 = vmatprep.subr.bf16.mxu0 %v8880_v0 }
0x21b1   :  { %8585 = vmatpush1.bf16.msra.mxu0 %v10681_v24  ;;  %v8602_v24 = vpack.c.bf16 %v5329_v9, %v5328_v29 }
0x21b2   :  { %8586 = vmatprep.subr.bf16.mxu0 %v8880_v0 }
0x21b3   :  { %8603 = vmatpush3.bf16.msra.mxu1 %v8602_v24 }
0x21b4   :  { %8604 = vmatprep.subr.bf16.mxu1 %v8880_v0 }
0x21b5   :  { %8588 = vmatpush1.bf16.msra.mxu0 %v10685_v58  ;;  %v5330_v58 = vld [vmem:[#allocation12 + $0x30] sm:$0xff] }
0x21b6   :  { %8589 = vmatprep.subr.bf16.mxu0 %v8880_v0 }
0x21b9   :  { %8591 = vmatpush1.bf16.msra.mxu0 %v10689_v7  ;;  %v5331_v7 = vld [vmem:[#allocation12 + $0x38] sm:$0xff] }
0x21ba   :  { %8592 = vmatprep.subr.bf16.mxu0 %v8880_v0 }
0x21bd   :  { %8594 = vmatpush1.bf16.msra.mxu0 %v10693_v45  ;;  %v8605_v45 = vpack.c.bf16 %v5331_v7, %v5330_v58 }
0x21be   :  { %5299 = vmatprep.subr.mxu0 %v8882_v1 }
0x21bf   :  { %8606 = vmatpush3.bf16.msra.mxu1 %v8605_v45 }
0x21c0   :  { %8607 = vmatprep.subr.bf16.mxu1 %v8880_v0 }
0x21c1   :  { %5300 = vmatpush1.msra.mxu0 %v10699_v33  ;;  %v5332_v33 = vld [vmem:[#allocation12 + $0x40] sm:$0xff] }
0x21c2   :  { %5316 = vmatmul.mubr.f32.vlgmr.msra.gmra.mrb[62].mxu0 %v5175_v43  ;;  %v8608_v52 = vpack.c.bf16 %v5333_v21, %v5332_v33 }
0x21c4   :  { %8609 = vmatpush3.bf16.msra.mxu1 %v8608_v52 }
0x21c5   :  { %8610 = vmatprep.subr.bf16.mxu1 %v8880_v0 }
0x21c8   :  { %8612 = vmatpush3.bf16.msra.mxu1 %v8611_v6 }
0x21c9   :  { %7121 = vmatprep.subr.mxu1 %v8882_v1 }
0x21cc   :  { %7122 = vmatpush3.msk.msra.mxu1 %vm200_vm4, %v5336_v11 }
0x21cd   :  { %8613 = vmatprep.subr.bf16.mxu1 %v8880_v0 }
0x2263   :  { %v5245_v20 = vpop.f32.mrb[60].mxu0 }
0x2264   :  { %v7096_v17 = vpop.f32.mrb[61].mxu0 }
0x2295   :  { %v5317_v47 = vpop.f32.mrb[62].mxu0 }
0x2296   :  { %v5318_v10 = vadd.f32 %v5317_v47, %v5245_v20  ;;  %v5319_v27 = vpop.f32.mrb[63].mxu0 }
0x2298   :  { %v5321_v26 = vadd.f32 %v10752_v13, %v5318_v10 }
0x229a   :  { %8707 = vtanh.f32 %v5321_v26 }
0x22a4   :  { %v8708_v54 = vpop.eup %8707 }
0x22a5   :  { %v5323_v13 = vsel %vm1514_vm15, %v8708_v54, %v10755_v34  ;;  %v5427_v34 = vld [vmem:[%s11144_s15 + $0x30] sm:$0xff] }
0x22a6   :  { %7124 = vmatmul.mubr.msk.f32.vlgmr.msra.gmra.mrb[64].mxu1 %vm196_vm9, %v5323_v13  ;;  %v8623_v53 = vpack.c.bf16 %v5428_v12, %v5427_v34 }
0x22a7   :  { %8615 = vmatpush3.bf16.msra.mxu1 %v8614_v5  ;;  %7152 = vmatprep.mubr.msk.f32.mxu1 %vm8881_vm0, %v8882_v1  ;;  %vm5517_vm0 = vcmask 11264  }
0x22a8   :  { %8616 = vmatprep.subr.bf16.mxu1 %v8880_v0 }
0x22ab   :  { %8618 = vmatpush3.bf16.msra.mxu1 %v8617_v19 }
0x22ac   :  { %8619 = vmatprep.subr.bf16.mxu1 %v8880_v0 }
0x22af   :  { %8621 = vmatpush3.bf16.msra.mxu1 %v8620_v60 }
0x22b0   :  { %8622 = vmatprep.subr.bf16.mxu1 %v8880_v0 }
0x22b3   :  { %8624 = vmatpush3.bf16.msra.mxu1 %v8623_v53 }
0x22b4   :  { %8625 = vmatprep.subr.bf16.mxu1 %v8880_v0 }
0x22b7   :  { %8627 = vmatpush3.bf16.msra.mxu1 %v8626_v8 }
0x22b8   :  { %8628 = vmatprep.subr.bf16.mxu1 %v8880_v0  ;;  %v5631_v0 = vld [vmem:[%s11143_s14] ss:$0 sm:$0xff] }
0x22bb   :  { %8630 = vmatpush3.bf16.msra.mxu1 %v8629_v56 }
0x22bc   :  { %7150 = vmatprep.subr.mxu1 %v8882_v1  ;;  %v5634_v1 = vld [vmem:[%s11145_s16] ss:$0 sm:$0xff] }
0x22bf   :  { %7151 = vmatpush3.msk.msra.mxu1 %vm200_vm4, %v5433_v14 }
0x2379   :  { %v5416_v63 = vpop.f32.mrb[64].mxu1 }
0x237a   :  { %v5417_v61 = vadd.f32 %v5631_v0, %v5416_v63  ;;  %v7125_v44 = vpop.f32.mrb[65].mxu1 }
0x237c   :  { %v5420_v15 = vmax.f32 %v5417_v61, 0.0 }
0x237e   :  { %7153 = vmatmul.mubr.msk.f32.vlgmr.msra.gmra.mrb[66].mxu1 %vm196_vm9, %v5420_v15 }
0x2451   :  { %v5513_v32 = vpop.f32.mrb[66].mxu1 }
0x2452   :  { %v5514_v31 = vadd.f32 %v5634_v1, %v5513_v32  ;;  %v7154_v38 = vpop.f32.mrb[67].mxu1 }
0x2454   :  { %5518 = vst.msk [vmem:[%s11146_s17] sm:$0xf] %vm5517_vm0, %v5514_v31 }
0x2455   :  { %5523 = vsyncpa [#allocation3], 1 }
0x2456   :  { %5524 = vsyncpa [#allocation5], 1 }
0x2457   :  { %5525 = vsyncpa [#allocation8], 1 }
0x2458   :  { %5526 = vsyncpa [#allocation11], 1 }

</bundles_post_ra>
